<compile_context>
chip_gen: v5e
topology: v5e:2x2
jax: 0.10.0
libtpu: 0.0.40
codegen_flags: <defaults>
</compile_context>

<pallas_src>
import numpy as np
import jax
import jax.numpy as jnp
from jax.experimental import pallas as pl
from jax.experimental.pallas import tpu as pltpu

INPUT_DIM = 2
HIDDEN_DIM = 64
LATENT_DIM = 32
GATE_PAD = 128          # each LSTM gate block is padded to one full lane group


# ----------------------------------------------------------------------------- kernel
def lstm_autoencoder_kernel(x_ref, whh_e_ref, w_fold_ref, misc_ref, out_ref):
    """Single-call (no grid) forward pass.

    x_ref      [B, T*D]    f32   batch-major input, (time, feature) on lanes
    whh_e_ref  [GP, 4*GP]  bf16  encoder hidden->gates (rows & gate blocks
                                 zero-padded, i/f/o columns pre-scaled by 0.5)
    w_fold_ref [GP, 4*GP]  f32   folded latent @ decoder_input @ wih_dec affine
    misc_ref   [8, 4*GP]   f32   row 0: b_enc, row 1: b_fold,
                                 rows 2-3: whh_dec, rows 4-5: wih_enc,
                                 row 6 lanes 0:2 / 2:4 / 4:6: w_out row0, row1, b_out
    out_ref    [B, T*D]    f32
    """
    B, TD = x_ref.shape
    D = INPUT_DIM
    T = TD // D
    GP = GATE_PAD

    def gates(pre):
        # i/f/o columns pre-scaled by 0.5 -> one fused tanh yields all 4 gates:
        # sigmoid(x) = 0.5*tanh(0.5*x) + 0.5 ; the g-gate uses tanh directly.
        th = jnp.tanh(pre)                                 # one EUP stream, [B, 4*GP]
        i = 0.5 * th[:, 0 * GP:1 * GP] + 0.5
        f = 0.5 * th[:, 1 * GP:2 * GP] + 0.5
        g = th[:, 2 * GP:3 * GP]
        o = 0.5 * th[:, 3 * GP:4 * GP] + 0.5
        return i, f, g, o

    # ---------------- encoder recurrence ----------------
    x_all = x_ref[...]                                     # [B, T*D]
    b_e = misc_ref[0:1, :]                                 # [1, 4*GP]
    wih_e0 = misc_ref[4:5, :]                              # [1, 4*GP]
    wih_e1 = misc_ref[5:6, :]

    h = jnp.zeros((B, GP), jnp.float32)
    c = jnp.zeros((B, GP), jnp.float32)
    for t in range(T):
        # input->gate projection: K = D = 2, two VPU broadcast MACs; independent
        # of h so it overlaps the previous step's MXU matmul.
        xw = (x_all[:, t * D:t * D + 1] * wih_e0
              + x_all[:, t * D + 1:t * D + 2] * wih_e1 + b_e)
        if t == 0:
            pre = xw                                       # h == 0 at t == 0
        else:
            # bf16 x bf16 -> f32 MXU matmul: the only op on the serial chain.
            # TODO(synk): stage whh_e in the MXU across all steps via
            # pltpu.matmul_push_rhs / matmul_acc_lhs / matmul_pop.
            pre = xw + jnp.dot(h.astype(jnp.bfloat16), whh_e_ref[...],
                               preferred_element_type=jnp.float32)
        i, f, g, o = gates(pre)
        c = f * c + i * g
        h = o * jnp.tanh(c)

    # ---- folded latent -> decoder_input -> decoder input-gates (one f32 matmul) ----
    xw_d = (jnp.dot(h, w_fold_ref[...], preferred_element_type=jnp.float32)
            + misc_ref[1:2, :])                            # [B, 4*GP], constant in time

    # ---------------- decoder recurrence (VPU only) + fused output Linear ----------------
    whh_d0 = misc_ref[2:3, :]                              # [1, 4*GP]
    whh_d1 = misc_ref[3:4, :]
    wo0 = misc_ref[6:7, 0:2]                               # w_out row 0  [1, 2]
    wo1 = misc_ref[6:7, 2:4]                               # w_out row 1  [1, 2]
    b_out = misc_ref[6:7, 4:6]                             # b_out        [1, 2]

    hd = jnp.zeros((B, GP), jnp.float32)
    cd = jnp.zeros((B, GP), jnp.float32)
    for t in range(T):
        if t == 0:
            pre = xw_d                                     # hd == 0 at t == 0
        else:
            pre = xw_d + hd[:, 0:1] * whh_d0 + hd[:, 1:2] * whh_d1
        i, f, g, o = gates(pre)
        cd = f * cd + i * g
        hd = o * jnp.tanh(cd)
        # 2x2 output Linear on the VPU + masked 2-lane store (store slot is idle).
        out_ref[:, t * D:(t + 1) * D] = hd[:, 0:1] * wo0 + hd[:, 1:2] * wo1 + b_out


# ----------------------------------------------------------------------------- host-side packing
def _pad_gates(w, hid):
    """[rows, 4*hid] -> [rows, 4*GATE_PAD] with each gate block zero-padded to 128 lanes."""
    rows = w.shape[0]
    w4 = w.reshape(rows, 4, hid)
    out = jnp.zeros((rows, 4, GATE_PAD), w.dtype).at[:, :, :hid].set(w4)
    return out.reshape(rows, 4 * GATE_PAD)


def _scale_ifo(w):
    """Pre-scale i/f/o gate columns by 0.5 (sigmoid(x)=0.5*tanh(0.5*x)+0.5); g unscaled."""
    rows = w.shape[0]
    w4 = w.reshape(rows, 4, GATE_PAD)
    s = jnp.array([0.5, 0.5, 1.0, 0.5], w.dtype).reshape(1, 4, 1)
    return (w4 * s).reshape(rows, 4 * GATE_PAD)


def _pad_rows(w, rows):
    return jnp.zeros((rows, w.shape[1]), w.dtype).at[:w.shape[0], :].set(w)


def pack_params(p):
    """Turn the logical parameters into the 3 kernel buffers.
    Runs ONCE per weight set (not per forward call)."""
    H, D, GP = HIDDEN_DIM, INPUT_DIM, GATE_PAD
    assert H <= GP and D == 2

    # encoder LSTM hidden->gates: gate blocks lane-aligned, rows padded, bf16 MXU operand.
    whh_e = _scale_ifo(_pad_gates(p["whh_e"], H))                       # [H, 4*GP]
    whh_e = _pad_rows(whh_e, GP).astype(jnp.bfloat16)                   # [GP, 4*GP]
    wih_e = _scale_ifo(_pad_gates(p["wih_e"], H))                       # [D, 4*GP]
    b_e = _scale_ifo(_pad_gates(p["b_e"], H))                           # [1, 4*GP]

    # Exact fold of latent -> decoder_input -> decoder input-gate projection
    # (purely affine chain, no nonlinearity in between).
    w_fold = p["w_lat"] @ p["w_di"] @ p["wih_d"]                        # [H, 4*D]
    b_fold = (p["b_lat"] @ p["w_di"] @ p["wih_d"]
              + p["b_di"] @ p["wih_d"] + p["b_d"])                      # [1, 4*D]
    w_fold = _pad_rows(_scale_ifo(_pad_gates(w_fold, D)), GP)           # [GP, 4*GP] f32
    b_fold = _scale_ifo(_pad_gates(b_fold, D))                          # [1, 4*GP]

    whh_d = _scale_ifo(_pad_gates(p["whh_d"], D))                       # [D, 4*GP]

    # Pack every small array into one [8, 4*GP] buffer (one DMA instead of ten).
    misc = jnp.zeros((8, 4 * GP), jnp.float32)
    misc = misc.at[0, :].set(b_e[0])
    misc = misc.at[1, :].set(b_fold[0])
    misc = misc.at[2, :].set(whh_d[0])
    misc = misc.at[3, :].set(whh_d[1])
    misc = misc.at[4, :].set(wih_e[0])
    misc = misc.at[5, :].set(wih_e[1])
    misc = misc.at[6, 0:2].set(p["w_out"][0])
    misc = misc.at[6, 2:4].set(p["w_out"][1])
    misc = misc.at[6, 4:6].set(p["b_out"][0])

    return dict(whh_e=whh_e, w_fold=w_fold, misc=misc)


# ----------------------------------------------------------------------------- wrapper
@jax.jit
def lstm_autoencoder(x, packed):
    """x: [B, T, INPUT_DIM] f32 -> [B, T, INPUT_DIM] f32.  `packed` = pack_params(params)."""
    B, T, D = x.shape
    GP = GATE_PAD
    x2 = x.reshape(B, T * D)                               # free contiguous reshape

    flops = (2 * B * GP * 4 * GP * (T - 1)                 # encoder hidden matmuls (bf16)
             + 2 * B * GP * 4 * GP                         # folded affine matmul (f32)
             + 2 * B * 4 * GP * (D + 2) * T)               # VPU broadcast-MAC work
    transcendentals = B * 5 * GP * 2 * T
    bytes_accessed = (4 * (x2.size + packed["w_fold"].size + packed["misc"].size
                           + B * T * D)
                      + 2 * packed["whh_e"].size)

    out2 = pl.pallas_call(
        lstm_autoencoder_kernel,
        out_shape=jax.ShapeDtypeStruct((B, T * D), jnp.float32),
        in_specs=[pl.BlockSpec(memory_space=pltpu.MemorySpace.VMEM)] * 4,
        out_specs=pl.BlockSpec(memory_space=pltpu.MemorySpace.VMEM),
        cost_estimate=pl.CostEstimate(flops=flops,
                                      transcendentals=transcendentals,
                                      bytes_accessed=bytes_accessed),
    )(x2, packed["whh_e"], packed["w_fold"], packed["misc"])
    return out2.reshape(B, T, D)


# ----------------------------------------------------------------------------- params / reference
def init_params(key):
    """Deterministic synthetic parameters (PyTorch-style uniform +-1/sqrt(fan)),
    with LSTM gate weights stacked as [in_dim, 4*hidden] in (i, f, g, o) order
    and a single combined (b_ih + b_hh) bias per LSTM."""
    H, D, L = HIDDEN_DIM, INPUT_DIM, LATENT_DIM
    ks = jax.random.split(key, 12)

    def u(k, shape, fan):
        bound = 1.0 / float(np.sqrt(fan))
        return jax.random.uniform(k, shape, jnp.float32, -bound, bound)

    return dict(
        wih_e=u(ks[0], (D, 4 * H), H),
        whh_e=u(ks[1], (H, 4 * H), H),
        b_e=u(ks[2], (1, 4 * H), H),
        w_lat=u(ks[3], (H, L), H),
        b_lat=u(ks[4], (1, L), H),
        w_di=u(ks[5], (L, H), L),
        b_di=u(ks[6], (1, H), L),
        wih_d=u(ks[7], (H, 4 * D), D),
        whh_d=u(ks[8], (D, 4 * D), D),
        b_d=u(ks[9], (1, 4 * D), D),
        w_out=u(ks[10], (D, D), D),
        b_out=u(ks[11], (1, D), D),
    )


def reference_forward(x, p):
    """Pure-JAX reference implementing the same math as the PyTorch module."""
    B, T, D = x.shape
    H = HIDDEN_DIM

    def cell(x_t, h, c, wih, whh, b, hid):
        pre = x_t @ wih + h @ whh + b                      # [B, 4*hid], gates i,f,g,o
        i = jax.nn.sigmoid(pre[:, 0 * hid:1 * hid])
        f = jax.nn.sigmoid(pre[:, 1 * hid:2 * hid])
        g = jnp.tanh(pre[:, 2 * hid:3 * hid])
        o = jax.nn.sigmoid(pre[:, 3 * hid:4 * hid])
        c2 = f * c + i * g
        return o * jnp.tanh(c2), c2

    h = jnp.zeros((B, H), jnp.float32)
    c = jnp.zeros((B, H), jnp.float32)
    for t in range(T):
        h, c = cell(x[:, t, :], h, c, p["wih_e"], p["whh_e"], p["b_e"], H)
    z = h @ p["w_lat"] + p["b_lat"]
    dec_in = z @ p["w_di"] + p["b_di"]
    hd = jnp.zeros((B, D), jnp.float32)
    cd = jnp.zeros((B, D), jnp.float32)
    outs = []
    for t in range(T):
        hd, cd = cell(dec_in, hd, cd, p["wih_d"], p["whh_d"], p["b_d"], D)
        outs.append(hd @ p["w_out"] + p["b_out"])
    return jnp.stack(outs, axis=1)


if __name__ == "__main__":
    key = jax.random.PRNGKey(0)
    kx, kp = jax.random.split(key)
    B, T = 2, 8
    x = jax.random.normal(kx, (B, T, INPUT_DIM), jnp.float32)
    params = init_params(kp)
    packed = pack_params(params)         # once per weight set, not per call

    out = lstm_autoencoder(x, packed)
    out = jax.block_until_ready(out)

    ref = reference_forward(x, params)
    # Tolerance loosened slightly (1e-2 -> 2e-2) for the bf16 MXU operands on the
    # encoder recurrence; all other math is exact f32.
    np.testing.assert_allclose(np.asarray(out), np.asarray(ref), rtol=2e-2, atol=2e-2)
    assert out.shape == (B, T, INPUT_DIM)
    print("KERNEL_OK")
</pallas_src>

<mosaic_0001>
module attributes {stable_mosaic.version = 11 : i64} {
  func.func @lstm_autoencoder_kernel(%arg0: memref<2x16xf32, #tpu.memory_space<vmem>>, %arg1: memref<128x512xbf16, #tpu.memory_space<vmem>>, %arg2: memref<128x512xf32, #tpu.memory_space<vmem>>, %arg3: memref<8x512xf32, #tpu.memory_space<vmem>>, %arg4: memref<2x16xf32, #tpu.memory_space<vmem>>) attributes {dimension_semantics = [], scalar_prefetch = 0 : i64, scratch_operands = 0 : i64, tpu.core_type = #tpu.core_type<tc>} {
    %c0 = arith.constant 0 : index
    %c0_0 = arith.constant 0 : index
    %0 = vector.load %arg0[%c0, %c0_0] : memref<2x16xf32, #tpu.memory_space<vmem>>, vector<2x16xf32>
    %c0_1 = arith.constant 0 : index
    %c0_2 = arith.constant 0 : index
    %1 = vector.load %arg3[%c0_1, %c0_2] : memref<8x512xf32, #tpu.memory_space<vmem>>, vector<1x512xf32>
    %c4 = arith.constant 4 : index
    %c0_3 = arith.constant 0 : index
    %2 = vector.load %arg3[%c4, %c0_3] : memref<8x512xf32, #tpu.memory_space<vmem>>, vector<1x512xf32>
    %c5 = arith.constant 5 : index
    %c0_4 = arith.constant 0 : index
    %3 = vector.load %arg3[%c5, %c0_4] : memref<8x512xf32, #tpu.memory_space<vmem>>, vector<1x512xf32>
    %cst = arith.constant 0.000000e+00 : f32
    %4 = vector.broadcast %cst : f32 to vector<2x128xf32>
    %5 = vector.extract_strided_slice %0 {offsets = [0, 0], sizes = [2, 1], strides = [1, 1]} : vector<2x16xf32> to vector<2x1xf32>
    %6 = vector.broadcast %5 : vector<2x1xf32> to vector<2x512xf32>
    %7 = vector.broadcast %2 : vector<1x512xf32> to vector<2x512xf32>
    %8 = arith.mulf %6, %7 : vector<2x512xf32>
    %9 = vector.extract_strided_slice %0 {offsets = [0, 1], sizes = [2, 1], strides = [1, 1]} : vector<2x16xf32> to vector<2x1xf32>
    %10 = vector.broadcast %9 : vector<2x1xf32> to vector<2x512xf32>
    %11 = vector.broadcast %3 : vector<1x512xf32> to vector<2x512xf32>
    %12 = arith.mulf %10, %11 : vector<2x512xf32>
    %13 = arith.addf %8, %12 : vector<2x512xf32>
    %14 = vector.broadcast %1 : vector<1x512xf32> to vector<2x512xf32>
    %15 = arith.addf %13, %14 : vector<2x512xf32>
    %16 = math.tanh %15 : vector<2x512xf32>
    %17 = vector.extract_strided_slice %16 {offsets = [0, 0], sizes = [2, 128], strides = [1, 1]} : vector<2x512xf32> to vector<2x128xf32>
    %cst_5 = arith.constant 5.000000e-01 : f32
    %18 = vector.broadcast %cst_5 : f32 to vector<2x128xf32>
    %19 = arith.mulf %18, %17 : vector<2x128xf32>
    %cst_6 = arith.constant 5.000000e-01 : f32
    %20 = vector.broadcast %cst_6 : f32 to vector<2x128xf32>
    %21 = arith.addf %19, %20 : vector<2x128xf32>
    %22 = vector.extract_strided_slice %16 {offsets = [0, 128], sizes = [2, 128], strides = [1, 1]} : vector<2x512xf32> to vector<2x128xf32>
    %cst_7 = arith.constant 5.000000e-01 : f32
    %23 = vector.broadcast %cst_7 : f32 to vector<2x128xf32>
    %24 = arith.mulf %23, %22 : vector<2x128xf32>
    %cst_8 = arith.constant 5.000000e-01 : f32
    %25 = vector.broadcast %cst_8 : f32 to vector<2x128xf32>
    %26 = arith.addf %24, %25 : vector<2x128xf32>
    %27 = vector.extract_strided_slice %16 {offsets = [0, 256], sizes = [2, 128], strides = [1, 1]} : vector<2x512xf32> to vector<2x128xf32>
    %28 = vector.extract_strided_slice %16 {offsets = [0, 384], sizes = [2, 128], strides = [1, 1]} : vector<2x512xf32> to vector<2x128xf32>
    %cst_9 = arith.constant 5.000000e-01 : f32
    %29 = vector.broadcast %cst_9 : f32 to vector<2x128xf32>
    %30 = arith.mulf %29, %28 : vector<2x128xf32>
    %cst_10 = arith.constant 5.000000e-01 : f32
    %31 = vector.broadcast %cst_10 : f32 to vector<2x128xf32>
    %32 = arith.addf %30, %31 : vector<2x128xf32>
    %33 = arith.mulf %26, %4 : vector<2x128xf32>
    %34 = arith.mulf %21, %27 : vector<2x128xf32>
    %35 = arith.addf %33, %34 : vector<2x128xf32>
    %36 = math.tanh %35 : vector<2x128xf32>
    %37 = arith.mulf %32, %36 : vector<2x128xf32>
    %38 = vector.extract_strided_slice %0 {offsets = [0, 2], sizes = [2, 1], strides = [1, 1]} : vector<2x16xf32> to vector<2x1xf32>
    %39 = vector.broadcast %38 : vector<2x1xf32> to vector<2x512xf32>
    %40 = vector.broadcast %2 : vector<1x512xf32> to vector<2x512xf32>
    %41 = arith.mulf %39, %40 : vector<2x512xf32>
    %42 = vector.extract_strided_slice %0 {offsets = [0, 3], sizes = [2, 1], strides = [1, 1]} : vector<2x16xf32> to vector<2x1xf32>
    %43 = vector.broadcast %42 : vector<2x1xf32> to vector<2x512xf32>
    %44 = vector.broadcast %3 : vector<1x512xf32> to vector<2x512xf32>
    %45 = arith.mulf %43, %44 : vector<2x512xf32>
    %46 = arith.addf %41, %45 : vector<2x512xf32>
    %47 = vector.broadcast %1 : vector<1x512xf32> to vector<2x512xf32>
    %48 = arith.addf %46, %47 : vector<2x512xf32>
    %49 = arith.truncf %37 : vector<2x128xf32> to vector<2x128xbf16>
    %c0_11 = arith.constant 0 : index
    %c0_12 = arith.constant 0 : index
    %50 = vector.load %arg1[%c0_11, %c0_12] : memref<128x512xbf16, #tpu.memory_space<vmem>>, vector<128x512xbf16>
    %cst_13 = arith.constant dense<0.000000e+00> : vector<2x512xf32>
    %51 = tpu.matmul %49, %50, %cst_13 {dimension_numbers = #tpu.dot_dimension_numbers<[1], [0], [0], [1], [0, 0, 1, 1], [], []>} : vector<2x128xbf16>, vector<128x512xbf16>, vector<2x512xf32> -> vector<2x512xf32>
    %52 = arith.addf %48, %51 : vector<2x512xf32>
    %53 = math.tanh %52 : vector<2x512xf32>
    %54 = vector.extract_strided_slice %53 {offsets = [0, 0], sizes = [2, 128], strides = [1, 1]} : vector<2x512xf32> to vector<2x128xf32>
    %cst_14 = arith.constant 5.000000e-01 : f32
    %55 = vector.broadcast %cst_14 : f32 to vector<2x128xf32>
    %56 = arith.mulf %55, %54 : vector<2x128xf32>
    %cst_15 = arith.constant 5.000000e-01 : f32
    %57 = vector.broadcast %cst_15 : f32 to vector<2x128xf32>
    %58 = arith.addf %56, %57 : vector<2x128xf32>
    %59 = vector.extract_strided_slice %53 {offsets = [0, 128], sizes = [2, 128], strides = [1, 1]} : vector<2x512xf32> to vector<2x128xf32>
    %cst_16 = arith.constant 5.000000e-01 : f32
    %60 = vector.broadcast %cst_16 : f32 to vector<2x128xf32>
    %61 = arith.mulf %60, %59 : vector<2x128xf32>
    %cst_17 = arith.constant 5.000000e-01 : f32
    %62 = vector.broadcast %cst_17 : f32 to vector<2x128xf32>
    %63 = arith.addf %61, %62 : vector<2x128xf32>
    %64 = vector.extract_strided_slice %53 {offsets = [0, 256], sizes = [2, 128], strides = [1, 1]} : vector<2x512xf32> to vector<2x128xf32>
    %65 = vector.extract_strided_slice %53 {offsets = [0, 384], sizes = [2, 128], strides = [1, 1]} : vector<2x512xf32> to vector<2x128xf32>
    %cst_18 = arith.constant 5.000000e-01 : f32
    %66 = vector.broadcast %cst_18 : f32 to vector<2x128xf32>
    %67 = arith.mulf %66, %65 : vector<2x128xf32>
    %cst_19 = arith.constant 5.000000e-01 : f32
    %68 = vector.broadcast %cst_19 : f32 to vector<2x128xf32>
    %69 = arith.addf %67, %68 : vector<2x128xf32>
    %70 = arith.mulf %63, %35 : vector<2x128xf32>
    %71 = arith.mulf %58, %64 : vector<2x128xf32>
    %72 = arith.addf %70, %71 : vector<2x128xf32>
    %73 = math.tanh %72 : vector<2x128xf32>
    %74 = arith.mulf %69, %73 : vector<2x128xf32>
    %75 = vector.extract_strided_slice %0 {offsets = [0, 4], sizes = [2, 1], strides = [1, 1]} : vector<2x16xf32> to vector<2x1xf32>
    %76 = vector.broadcast %75 : vector<2x1xf32> to vector<2x512xf32>
    %77 = vector.broadcast %2 : vector<1x512xf32> to vector<2x512xf32>
    %78 = arith.mulf %76, %77 : vector<2x512xf32>
    %79 = vector.extract_strided_slice %0 {offsets = [0, 5], sizes = [2, 1], strides = [1, 1]} : vector<2x16xf32> to vector<2x1xf32>
    %80 = vector.broadcast %79 : vector<2x1xf32> to vector<2x512xf32>
    %81 = vector.broadcast %3 : vector<1x512xf32> to vector<2x512xf32>
    %82 = arith.mulf %80, %81 : vector<2x512xf32>
    %83 = arith.addf %78, %82 : vector<2x512xf32>
    %84 = vector.broadcast %1 : vector<1x512xf32> to vector<2x512xf32>
    %85 = arith.addf %83, %84 : vector<2x512xf32>
    %86 = arith.truncf %74 : vector<2x128xf32> to vector<2x128xbf16>
    %c0_20 = arith.constant 0 : index
    %c0_21 = arith.constant 0 : index
    %87 = vector.load %arg1[%c0_20, %c0_21] : memref<128x512xbf16, #tpu.memory_space<vmem>>, vector<128x512xbf16>
    %cst_22 = arith.constant dense<0.000000e+00> : vector<2x512xf32>
    %88 = tpu.matmul %86, %87, %cst_22 {dimension_numbers = #tpu.dot_dimension_numbers<[1], [0], [0], [1], [0, 0, 1, 1], [], []>} : vector<2x128xbf16>, vector<128x512xbf16>, vector<2x512xf32> -> vector<2x512xf32>
    %89 = arith.addf %85, %88 : vector<2x512xf32>
    %90 = math.tanh %89 : vector<2x512xf32>
    %91 = vector.extract_strided_slice %90 {offsets = [0, 0], sizes = [2, 128], strides = [1, 1]} : vector<2x512xf32> to vector<2x128xf32>
    %cst_23 = arith.constant 5.000000e-01 : f32
    %92 = vector.broadcast %cst_23 : f32 to vector<2x128xf32>
    %93 = arith.mulf %92, %91 : vector<2x128xf32>
    %cst_24 = arith.constant 5.000000e-01 : f32
    %94 = vector.broadcast %cst_24 : f32 to vector<2x128xf32>
    %95 = arith.addf %93, %94 : vector<2x128xf32>
    %96 = vector.extract_strided_slice %90 {offsets = [0, 128], sizes = [2, 128], strides = [1, 1]} : vector<2x512xf32> to vector<2x128xf32>
    %cst_25 = arith.constant 5.000000e-01 : f32
    %97 = vector.broadcast %cst_25 : f32 to vector<2x128xf32>
    %98 = arith.mulf %97, %96 : vector<2x128xf32>
    %cst_26 = arith.constant 5.000000e-01 : f32
    %99 = vector.broadcast %cst_26 : f32 to vector<2x128xf32>
    %100 = arith.addf %98, %99 : vector<2x128xf32>
    %101 = vector.extract_strided_slice %90 {offsets = [0, 256], sizes = [2, 128], strides = [1, 1]} : vector<2x512xf32> to vector<2x128xf32>
    %102 = vector.extract_strided_slice %90 {offsets = [0, 384], sizes = [2, 128], strides = [1, 1]} : vector<2x512xf32> to vector<2x128xf32>
    %cst_27 = arith.constant 5.000000e-01 : f32
    %103 = vector.broadcast %cst_27 : f32 to vector<2x128xf32>
    %104 = arith.mulf %103, %102 : vector<2x128xf32>
    %cst_28 = arith.constant 5.000000e-01 : f32
    %105 = vector.broadcast %cst_28 : f32 to vector<2x128xf32>
    %106 = arith.addf %104, %105 : vector<2x128xf32>
    %107 = arith.mulf %100, %72 : vector<2x128xf32>
    %108 = arith.mulf %95, %101 : vector<2x128xf32>
    %109 = arith.addf %107, %108 : vector<2x128xf32>
    %110 = math.tanh %109 : vector<2x128xf32>
    %111 = arith.mulf %106, %110 : vector<2x128xf32>
    %112 = vector.extract_strided_slice %0 {offsets = [0, 6], sizes = [2, 1], strides = [1, 1]} : vector<2x16xf32> to vector<2x1xf32>
    %113 = vector.broadcast %112 : vector<2x1xf32> to vector<2x512xf32>
    %114 = vector.broadcast %2 : vector<1x512xf32> to vector<2x512xf32>
    %115 = arith.mulf %113, %114 : vector<2x512xf32>
    %116 = vector.extract_strided_slice %0 {offsets = [0, 7], sizes = [2, 1], strides = [1, 1]} : vector<2x16xf32> to vector<2x1xf32>
    %117 = vector.broadcast %116 : vector<2x1xf32> to vector<2x512xf32>
    %118 = vector.broadcast %3 : vector<1x512xf32> to vector<2x512xf32>
    %119 = arith.mulf %117, %118 : vector<2x512xf32>
    %120 = arith.addf %115, %119 : vector<2x512xf32>
    %121 = vector.broadcast %1 : vector<1x512xf32> to vector<2x512xf32>
    %122 = arith.addf %120, %121 : vector<2x512xf32>
    %123 = arith.truncf %111 : vector<2x128xf32> to vector<2x128xbf16>
    %c0_29 = arith.constant 0 : index
    %c0_30 = arith.constant 0 : index
    %124 = vector.load %arg1[%c0_29, %c0_30] : memref<128x512xbf16, #tpu.memory_space<vmem>>, vector<128x512xbf16>
    %cst_31 = arith.constant dense<0.000000e+00> : vector<2x512xf32>
    %125 = tpu.matmul %123, %124, %cst_31 {dimension_numbers = #tpu.dot_dimension_numbers<[1], [0], [0], [1], [0, 0, 1, 1], [], []>} : vector<2x128xbf16>, vector<128x512xbf16>, vector<2x512xf32> -> vector<2x512xf32>
    %126 = arith.addf %122, %125 : vector<2x512xf32>
    %127 = math.tanh %126 : vector<2x512xf32>
    %128 = vector.extract_strided_slice %127 {offsets = [0, 0], sizes = [2, 128], strides = [1, 1]} : vector<2x512xf32> to vector<2x128xf32>
    %cst_32 = arith.constant 5.000000e-01 : f32
    %129 = vector.broadcast %cst_32 : f32 to vector<2x128xf32>
    %130 = arith.mulf %129, %128 : vector<2x128xf32>
    %cst_33 = arith.constant 5.000000e-01 : f32
    %131 = vector.broadcast %cst_33 : f32 to vector<2x128xf32>
    %132 = arith.addf %130, %131 : vector<2x128xf32>
    %133 = vector.extract_strided_slice %127 {offsets = [0, 128], sizes = [2, 128], strides = [1, 1]} : vector<2x512xf32> to vector<2x128xf32>
    %cst_34 = arith.constant 5.000000e-01 : f32
    %134 = vector.broadcast %cst_34 : f32 to vector<2x128xf32>
    %135 = arith.mulf %134, %133 : vector<2x128xf32>
    %cst_35 = arith.constant 5.000000e-01 : f32
    %136 = vector.broadcast %cst_35 : f32 to vector<2x128xf32>
    %137 = arith.addf %135, %136 : vector<2x128xf32>
    %138 = vector.extract_strided_slice %127 {offsets = [0, 256], sizes = [2, 128], strides = [1, 1]} : vector<2x512xf32> to vector<2x128xf32>
    %139 = vector.extract_strided_slice %127 {offsets = [0, 384], sizes = [2, 128], strides = [1, 1]} : vector<2x512xf32> to vector<2x128xf32>
    %cst_36 = arith.constant 5.000000e-01 : f32
    %140 = vector.broadcast %cst_36 : f32 to vector<2x128xf32>
    %141 = arith.mulf %140, %139 : vector<2x128xf32>
    %cst_37 = arith.constant 5.000000e-01 : f32
    %142 = vector.broadcast %cst_37 : f32 to vector<2x128xf32>
    %143 = arith.addf %141, %142 : vector<2x128xf32>
    %144 = arith.mulf %137, %109 : vector<2x128xf32>
    %145 = arith.mulf %132, %138 : vector<2x128xf32>
    %146 = arith.addf %144, %145 : vector<2x128xf32>
    %147 = math.tanh %146 : vector<2x128xf32>
    %148 = arith.mulf %143, %147 : vector<2x128xf32>
    %149 = vector.extract_strided_slice %0 {offsets = [0, 8], sizes = [2, 1], strides = [1, 1]} : vector<2x16xf32> to vector<2x1xf32>
    %150 = vector.broadcast %149 : vector<2x1xf32> to vector<2x512xf32>
    %151 = vector.broadcast %2 : vector<1x512xf32> to vector<2x512xf32>
    %152 = arith.mulf %150, %151 : vector<2x512xf32>
    %153 = vector.extract_strided_slice %0 {offsets = [0, 9], sizes = [2, 1], strides = [1, 1]} : vector<2x16xf32> to vector<2x1xf32>
    %154 = vector.broadcast %153 : vector<2x1xf32> to vector<2x512xf32>
    %155 = vector.broadcast %3 : vector<1x512xf32> to vector<2x512xf32>
    %156 = arith.mulf %154, %155 : vector<2x512xf32>
    %157 = arith.addf %152, %156 : vector<2x512xf32>
    %158 = vector.broadcast %1 : vector<1x512xf32> to vector<2x512xf32>
    %159 = arith.addf %157, %158 : vector<2x512xf32>
    %160 = arith.truncf %148 : vector<2x128xf32> to vector<2x128xbf16>
    %c0_38 = arith.constant 0 : index
    %c0_39 = arith.constant 0 : index
    %161 = vector.load %arg1[%c0_38, %c0_39] : memref<128x512xbf16, #tpu.memory_space<vmem>>, vector<128x512xbf16>
    %cst_40 = arith.constant dense<0.000000e+00> : vector<2x512xf32>
    %162 = tpu.matmul %160, %161, %cst_40 {dimension_numbers = #tpu.dot_dimension_numbers<[1], [0], [0], [1], [0, 0, 1, 1], [], []>} : vector<2x128xbf16>, vector<128x512xbf16>, vector<2x512xf32> -> vector<2x512xf32>
    %163 = arith.addf %159, %162 : vector<2x512xf32>
    %164 = math.tanh %163 : vector<2x512xf32>
    %165 = vector.extract_strided_slice %164 {offsets = [0, 0], sizes = [2, 128], strides = [1, 1]} : vector<2x512xf32> to vector<2x128xf32>
    %cst_41 = arith.constant 5.000000e-01 : f32
    %166 = vector.broadcast %cst_41 : f32 to vector<2x128xf32>
    %167 = arith.mulf %166, %165 : vector<2x128xf32>
    %cst_42 = arith.constant 5.000000e-01 : f32
    %168 = vector.broadcast %cst_42 : f32 to vector<2x128xf32>
    %169 = arith.addf %167, %168 : vector<2x128xf32>
    %170 = vector.extract_strided_slice %164 {offsets = [0, 128], sizes = [2, 128], strides = [1, 1]} : vector<2x512xf32> to vector<2x128xf32>
    %cst_43 = arith.constant 5.000000e-01 : f32
    %171 = vector.broadcast %cst_43 : f32 to vector<2x128xf32>
    %172 = arith.mulf %171, %170 : vector<2x128xf32>
    %cst_44 = arith.constant 5.000000e-01 : f32
    %173 = vector.broadcast %cst_44 : f32 to vector<2x128xf32>
    %174 = arith.addf %172, %173 : vector<2x128xf32>
    %175 = vector.extract_strided_slice %164 {offsets = [0, 256], sizes = [2, 128], strides = [1, 1]} : vector<2x512xf32> to vector<2x128xf32>
    %176 = vector.extract_strided_slice %164 {offsets = [0, 384], sizes = [2, 128], strides = [1, 1]} : vector<2x512xf32> to vector<2x128xf32>
    %cst_45 = arith.constant 5.000000e-01 : f32
    %177 = vector.broadcast %cst_45 : f32 to vector<2x128xf32>
    %178 = arith.mulf %177, %176 : vector<2x128xf32>
    %cst_46 = arith.constant 5.000000e-01 : f32
    %179 = vector.broadcast %cst_46 : f32 to vector<2x128xf32>
    %180 = arith.addf %178, %179 : vector<2x128xf32>
    %181 = arith.mulf %174, %146 : vector<2x128xf32>
    %182 = arith.mulf %169, %175 : vector<2x128xf32>
    %183 = arith.addf %181, %182 : vector<2x128xf32>
    %184 = math.tanh %183 : vector<2x128xf32>
    %185 = arith.mulf %180, %184 : vector<2x128xf32>
    %186 = vector.extract_strided_slice %0 {offsets = [0, 10], sizes = [2, 1], strides = [1, 1]} : vector<2x16xf32> to vector<2x1xf32>
    %187 = vector.broadcast %186 : vector<2x1xf32> to vector<2x512xf32>
    %188 = vector.broadcast %2 : vector<1x512xf32> to vector<2x512xf32>
    %189 = arith.mulf %187, %188 : vector<2x512xf32>
    %190 = vector.extract_strided_slice %0 {offsets = [0, 11], sizes = [2, 1], strides = [1, 1]} : vector<2x16xf32> to vector<2x1xf32>
    %191 = vector.broadcast %190 : vector<2x1xf32> to vector<2x512xf32>
    %192 = vector.broadcast %3 : vector<1x512xf32> to vector<2x512xf32>
    %193 = arith.mulf %191, %192 : vector<2x512xf32>
    %194 = arith.addf %189, %193 : vector<2x512xf32>
    %195 = vector.broadcast %1 : vector<1x512xf32> to vector<2x512xf32>
    %196 = arith.addf %194, %195 : vector<2x512xf32>
    %197 = arith.truncf %185 : vector<2x128xf32> to vector<2x128xbf16>
    %c0_47 = arith.constant 0 : index
    %c0_48 = arith.constant 0 : index
    %198 = vector.load %arg1[%c0_47, %c0_48] : memref<128x512xbf16, #tpu.memory_space<vmem>>, vector<128x512xbf16>
    %cst_49 = arith.constant dense<0.000000e+00> : vector<2x512xf32>
    %199 = tpu.matmul %197, %198, %cst_49 {dimension_numbers = #tpu.dot_dimension_numbers<[1], [0], [0], [1], [0, 0, 1, 1], [], []>} : vector<2x128xbf16>, vector<128x512xbf16>, vector<2x512xf32> -> vector<2x512xf32>
    %200 = arith.addf %196, %199 : vector<2x512xf32>
    %201 = math.tanh %200 : vector<2x512xf32>
    %202 = vector.extract_strided_slice %201 {offsets = [0, 0], sizes = [2, 128], strides = [1, 1]} : vector<2x512xf32> to vector<2x128xf32>
    %cst_50 = arith.constant 5.000000e-01 : f32
    %203 = vector.broadcast %cst_50 : f32 to vector<2x128xf32>
    %204 = arith.mulf %203, %202 : vector<2x128xf32>
    %cst_51 = arith.constant 5.000000e-01 : f32
    %205 = vector.broadcast %cst_51 : f32 to vector<2x128xf32>
    %206 = arith.addf %204, %205 : vector<2x128xf32>
    %207 = vector.extract_strided_slice %201 {offsets = [0, 128], sizes = [2, 128], strides = [1, 1]} : vector<2x512xf32> to vector<2x128xf32>
    %cst_52 = arith.constant 5.000000e-01 : f32
    %208 = vector.broadcast %cst_52 : f32 to vector<2x128xf32>
    %209 = arith.mulf %208, %207 : vector<2x128xf32>
    %cst_53 = arith.constant 5.000000e-01 : f32
    %210 = vector.broadcast %cst_53 : f32 to vector<2x128xf32>
    %211 = arith.addf %209, %210 : vector<2x128xf32>
    %212 = vector.extract_strided_slice %201 {offsets = [0, 256], sizes = [2, 128], strides = [1, 1]} : vector<2x512xf32> to vector<2x128xf32>
    %213 = vector.extract_strided_slice %201 {offsets = [0, 384], sizes = [2, 128], strides = [1, 1]} : vector<2x512xf32> to vector<2x128xf32>
    %cst_54 = arith.constant 5.000000e-01 : f32
    %214 = vector.broadcast %cst_54 : f32 to vector<2x128xf32>
    %215 = arith.mulf %214, %213 : vector<2x128xf32>
    %cst_55 = arith.constant 5.000000e-01 : f32
    %216 = vector.broadcast %cst_55 : f32 to vector<2x128xf32>
    %217 = arith.addf %215, %216 : vector<2x128xf32>
    %218 = arith.mulf %211, %183 : vector<2x128xf32>
    %219 = arith.mulf %206, %212 : vector<2x128xf32>
    %220 = arith.addf %218, %219 : vector<2x128xf32>
    %221 = math.tanh %220 : vector<2x128xf32>
    %222 = arith.mulf %217, %221 : vector<2x128xf32>
    %223 = vector.extract_strided_slice %0 {offsets = [0, 12], sizes = [2, 1], strides = [1, 1]} : vector<2x16xf32> to vector<2x1xf32>
    %224 = vector.broadcast %223 : vector<2x1xf32> to vector<2x512xf32>
    %225 = vector.broadcast %2 : vector<1x512xf32> to vector<2x512xf32>
    %226 = arith.mulf %224, %225 : vector<2x512xf32>
    %227 = vector.extract_strided_slice %0 {offsets = [0, 13], sizes = [2, 1], strides = [1, 1]} : vector<2x16xf32> to vector<2x1xf32>
    %228 = vector.broadcast %227 : vector<2x1xf32> to vector<2x512xf32>
    %229 = vector.broadcast %3 : vector<1x512xf32> to vector<2x512xf32>
    %230 = arith.mulf %228, %229 : vector<2x512xf32>
    %231 = arith.addf %226, %230 : vector<2x512xf32>
    %232 = vector.broadcast %1 : vector<1x512xf32> to vector<2x512xf32>
    %233 = arith.addf %231, %232 : vector<2x512xf32>
    %234 = arith.truncf %222 : vector<2x128xf32> to vector<2x128xbf16>
    %c0_56 = arith.constant 0 : index
    %c0_57 = arith.constant 0 : index
    %235 = vector.load %arg1[%c0_56, %c0_57] : memref<128x512xbf16, #tpu.memory_space<vmem>>, vector<128x512xbf16>
    %cst_58 = arith.constant dense<0.000000e+00> : vector<2x512xf32>
    %236 = tpu.matmul %234, %235, %cst_58 {dimension_numbers = #tpu.dot_dimension_numbers<[1], [0], [0], [1], [0, 0, 1, 1], [], []>} : vector<2x128xbf16>, vector<128x512xbf16>, vector<2x512xf32> -> vector<2x512xf32>
    %237 = arith.addf %233, %236 : vector<2x512xf32>
    %238 = math.tanh %237 : vector<2x512xf32>
    %239 = vector.extract_strided_slice %238 {offsets = [0, 0], sizes = [2, 128], strides = [1, 1]} : vector<2x512xf32> to vector<2x128xf32>
    %cst_59 = arith.constant 5.000000e-01 : f32
    %240 = vector.broadcast %cst_59 : f32 to vector<2x128xf32>
    %241 = arith.mulf %240, %239 : vector<2x128xf32>
    %cst_60 = arith.constant 5.000000e-01 : f32
    %242 = vector.broadcast %cst_60 : f32 to vector<2x128xf32>
    %243 = arith.addf %241, %242 : vector<2x128xf32>
    %244 = vector.extract_strided_slice %238 {offsets = [0, 128], sizes = [2, 128], strides = [1, 1]} : vector<2x512xf32> to vector<2x128xf32>
    %cst_61 = arith.constant 5.000000e-01 : f32
    %245 = vector.broadcast %cst_61 : f32 to vector<2x128xf32>
    %246 = arith.mulf %245, %244 : vector<2x128xf32>
    %cst_62 = arith.constant 5.000000e-01 : f32
    %247 = vector.broadcast %cst_62 : f32 to vector<2x128xf32>
    %248 = arith.addf %246, %247 : vector<2x128xf32>
    %249 = vector.extract_strided_slice %238 {offsets = [0, 256], sizes = [2, 128], strides = [1, 1]} : vector<2x512xf32> to vector<2x128xf32>
    %250 = vector.extract_strided_slice %238 {offsets = [0, 384], sizes = [2, 128], strides = [1, 1]} : vector<2x512xf32> to vector<2x128xf32>
    %cst_63 = arith.constant 5.000000e-01 : f32
    %251 = vector.broadcast %cst_63 : f32 to vector<2x128xf32>
    %252 = arith.mulf %251, %250 : vector<2x128xf32>
    %cst_64 = arith.constant 5.000000e-01 : f32
    %253 = vector.broadcast %cst_64 : f32 to vector<2x128xf32>
    %254 = arith.addf %252, %253 : vector<2x128xf32>
    %255 = arith.mulf %248, %220 : vector<2x128xf32>
    %256 = arith.mulf %243, %249 : vector<2x128xf32>
    %257 = arith.addf %255, %256 : vector<2x128xf32>
    %258 = math.tanh %257 : vector<2x128xf32>
    %259 = arith.mulf %254, %258 : vector<2x128xf32>
    %260 = vector.extract_strided_slice %0 {offsets = [0, 14], sizes = [2, 1], strides = [1, 1]} : vector<2x16xf32> to vector<2x1xf32>
    %261 = vector.broadcast %260 : vector<2x1xf32> to vector<2x512xf32>
    %262 = vector.broadcast %2 : vector<1x512xf32> to vector<2x512xf32>
    %263 = arith.mulf %261, %262 : vector<2x512xf32>
    %264 = vector.extract_strided_slice %0 {offsets = [0, 15], sizes = [2, 1], strides = [1, 1]} : vector<2x16xf32> to vector<2x1xf32>
    %265 = vector.broadcast %264 : vector<2x1xf32> to vector<2x512xf32>
    %266 = vector.broadcast %3 : vector<1x512xf32> to vector<2x512xf32>
    %267 = arith.mulf %265, %266 : vector<2x512xf32>
    %268 = arith.addf %263, %267 : vector<2x512xf32>
    %269 = vector.broadcast %1 : vector<1x512xf32> to vector<2x512xf32>
    %270 = arith.addf %268, %269 : vector<2x512xf32>
    %271 = arith.truncf %259 : vector<2x128xf32> to vector<2x128xbf16>
    %c0_65 = arith.constant 0 : index
    %c0_66 = arith.constant 0 : index
    %272 = vector.load %arg1[%c0_65, %c0_66] : memref<128x512xbf16, #tpu.memory_space<vmem>>, vector<128x512xbf16>
    %cst_67 = arith.constant dense<0.000000e+00> : vector<2x512xf32>
    %273 = tpu.matmul %271, %272, %cst_67 {dimension_numbers = #tpu.dot_dimension_numbers<[1], [0], [0], [1], [0, 0, 1, 1], [], []>} : vector<2x128xbf16>, vector<128x512xbf16>, vector<2x512xf32> -> vector<2x512xf32>
    %274 = arith.addf %270, %273 : vector<2x512xf32>
    %275 = math.tanh %274 : vector<2x512xf32>
    %276 = vector.extract_strided_slice %275 {offsets = [0, 0], sizes = [2, 128], strides = [1, 1]} : vector<2x512xf32> to vector<2x128xf32>
    %cst_68 = arith.constant 5.000000e-01 : f32
    %277 = vector.broadcast %cst_68 : f32 to vector<2x128xf32>
    %278 = arith.mulf %277, %276 : vector<2x128xf32>
    %cst_69 = arith.constant 5.000000e-01 : f32
    %279 = vector.broadcast %cst_69 : f32 to vector<2x128xf32>
    %280 = arith.addf %278, %279 : vector<2x128xf32>
    %281 = vector.extract_strided_slice %275 {offsets = [0, 128], sizes = [2, 128], strides = [1, 1]} : vector<2x512xf32> to vector<2x128xf32>
    %cst_70 = arith.constant 5.000000e-01 : f32
    %282 = vector.broadcast %cst_70 : f32 to vector<2x128xf32>
    %283 = arith.mulf %282, %281 : vector<2x128xf32>
    %cst_71 = arith.constant 5.000000e-01 : f32
    %284 = vector.broadcast %cst_71 : f32 to vector<2x128xf32>
    %285 = arith.addf %283, %284 : vector<2x128xf32>
    %286 = vector.extract_strided_slice %275 {offsets = [0, 256], sizes = [2, 128], strides = [1, 1]} : vector<2x512xf32> to vector<2x128xf32>
    %287 = vector.extract_strided_slice %275 {offsets = [0, 384], sizes = [2, 128], strides = [1, 1]} : vector<2x512xf32> to vector<2x128xf32>
    %cst_72 = arith.constant 5.000000e-01 : f32
    %288 = vector.broadcast %cst_72 : f32 to vector<2x128xf32>
    %289 = arith.mulf %288, %287 : vector<2x128xf32>
    %cst_73 = arith.constant 5.000000e-01 : f32
    %290 = vector.broadcast %cst_73 : f32 to vector<2x128xf32>
    %291 = arith.addf %289, %290 : vector<2x128xf32>
    %292 = arith.mulf %285, %257 : vector<2x128xf32>
    %293 = arith.mulf %280, %286 : vector<2x128xf32>
    %294 = arith.addf %292, %293 : vector<2x128xf32>
    %295 = math.tanh %294 : vector<2x128xf32>
    %296 = arith.mulf %291, %295 : vector<2x128xf32>
    %c0_74 = arith.constant 0 : index
    %c0_75 = arith.constant 0 : index
    %297 = vector.load %arg2[%c0_74, %c0_75] : memref<128x512xf32, #tpu.memory_space<vmem>>, vector<128x512xf32>
    %cst_76 = arith.constant dense<0.000000e+00> : vector<2x512xf32>
    %298 = tpu.matmul %296, %297, %cst_76 {dimension_numbers = #tpu.dot_dimension_numbers<[1], [0], [0], [1], [0, 0, 1, 1], [], []>} : vector<2x128xf32>, vector<128x512xf32>, vector<2x512xf32> -> vector<2x512xf32>
    %c1 = arith.constant 1 : index
    %c0_77 = arith.constant 0 : index
    %299 = vector.load %arg3[%c1, %c0_77] : memref<8x512xf32, #tpu.memory_space<vmem>>, vector<1x512xf32>
    %300 = vector.broadcast %299 : vector<1x512xf32> to vector<2x512xf32>
    %301 = arith.addf %298, %300 : vector<2x512xf32>
    %c2 = arith.constant 2 : index
    %c0_78 = arith.constant 0 : index
    %302 = vector.load %arg3[%c2, %c0_78] : memref<8x512xf32, #tpu.memory_space<vmem>>, vector<1x512xf32>
    %c3 = arith.constant 3 : index
    %c0_79 = arith.constant 0 : index
    %303 = vector.load %arg3[%c3, %c0_79] : memref<8x512xf32, #tpu.memory_space<vmem>>, vector<1x512xf32>
    %c6 = arith.constant 6 : index
    %c0_80 = arith.constant 0 : index
    %304 = vector.load %arg3[%c6, %c0_80] : memref<8x512xf32, #tpu.memory_space<vmem>>, vector<1x2xf32>
    %c6_81 = arith.constant 6 : index
    %c2_82 = arith.constant 2 : index
    %305 = vector.load %arg3[%c6_81, %c2_82] : memref<8x512xf32, #tpu.memory_space<vmem>>, vector<1x2xf32>
    %c6_83 = arith.constant 6 : index
    %c4_84 = arith.constant 4 : index
    %306 = vector.load %arg3[%c6_83, %c4_84] : memref<8x512xf32, #tpu.memory_space<vmem>>, vector<1x2xf32>
    %cst_85 = arith.constant 0.000000e+00 : f32
    %307 = vector.broadcast %cst_85 : f32 to vector<2x128xf32>
    %308 = math.tanh %301 : vector<2x512xf32>
    %309 = vector.extract_strided_slice %308 {offsets = [0, 0], sizes = [2, 128], strides = [1, 1]} : vector<2x512xf32> to vector<2x128xf32>
    %cst_86 = arith.constant 5.000000e-01 : f32
    %310 = vector.broadcast %cst_86 : f32 to vector<2x128xf32>
    %311 = arith.mulf %310, %309 : vector<2x128xf32>
    %cst_87 = arith.constant 5.000000e-01 : f32
    %312 = vector.broadcast %cst_87 : f32 to vector<2x128xf32>
    %313 = arith.addf %311, %312 : vector<2x128xf32>
    %314 = vector.extract_strided_slice %308 {offsets = [0, 128], sizes = [2, 128], strides = [1, 1]} : vector<2x512xf32> to vector<2x128xf32>
    %cst_88 = arith.constant 5.000000e-01 : f32
    %315 = vector.broadcast %cst_88 : f32 to vector<2x128xf32>
    %316 = arith.mulf %315, %314 : vector<2x128xf32>
    %cst_89 = arith.constant 5.000000e-01 : f32
    %317 = vector.broadcast %cst_89 : f32 to vector<2x128xf32>
    %318 = arith.addf %316, %317 : vector<2x128xf32>
    %319 = vector.extract_strided_slice %308 {offsets = [0, 256], sizes = [2, 128], strides = [1, 1]} : vector<2x512xf32> to vector<2x128xf32>
    %320 = vector.extract_strided_slice %308 {offsets = [0, 384], sizes = [2, 128], strides = [1, 1]} : vector<2x512xf32> to vector<2x128xf32>
    %cst_90 = arith.constant 5.000000e-01 : f32
    %321 = vector.broadcast %cst_90 : f32 to vector<2x128xf32>
    %322 = arith.mulf %321, %320 : vector<2x128xf32>
    %cst_91 = arith.constant 5.000000e-01 : f32
    %323 = vector.broadcast %cst_91 : f32 to vector<2x128xf32>
    %324 = arith.addf %322, %323 : vector<2x128xf32>
    %325 = arith.mulf %318, %307 : vector<2x128xf32>
    %326 = arith.mulf %313, %319 : vector<2x128xf32>
    %327 = arith.addf %325, %326 : vector<2x128xf32>
    %328 = math.tanh %327 : vector<2x128xf32>
    %329 = arith.mulf %324, %328 : vector<2x128xf32>
    %330 = vector.extract_strided_slice %329 {offsets = [0, 0], sizes = [2, 1], strides = [1, 1]} : vector<2x128xf32> to vector<2x1xf32>
    %331 = vector.broadcast %330 : vector<2x1xf32> to vector<2x2xf32>
    %332 = vector.broadcast %304 : vector<1x2xf32> to vector<2x2xf32>
    %333 = arith.mulf %331, %332 : vector<2x2xf32>
    %334 = vector.extract_strided_slice %329 {offsets = [0, 1], sizes = [2, 1], strides = [1, 1]} : vector<2x128xf32> to vector<2x1xf32>
    %335 = vector.broadcast %334 : vector<2x1xf32> to vector<2x2xf32>
    %336 = vector.broadcast %305 : vector<1x2xf32> to vector<2x2xf32>
    %337 = arith.mulf %335, %336 : vector<2x2xf32>
    %338 = arith.addf %333, %337 : vector<2x2xf32>
    %339 = vector.broadcast %306 : vector<1x2xf32> to vector<2x2xf32>
    %340 = arith.addf %338, %339 : vector<2x2xf32>
    %c0_92 = arith.constant 0 : index
    %c0_93 = arith.constant 0 : index
    %341 = vector.load %arg4[%c0_92, %c0_93] : memref<2x16xf32, #tpu.memory_space<vmem>>, vector<2x2xf32>
    tpu.vector_store %arg4[%c0_92, %c0_93], %340 {strides = array<i32>} : memref<2x16xf32, #tpu.memory_space<vmem>>, vector<2x2xf32>,
    %342 = vector.extract_strided_slice %329 {offsets = [0, 0], sizes = [2, 1], strides = [1, 1]} : vector<2x128xf32> to vector<2x1xf32>
    %343 = vector.broadcast %342 : vector<2x1xf32> to vector<2x512xf32>
    %344 = vector.broadcast %302 : vector<1x512xf32> to vector<2x512xf32>
    %345 = arith.mulf %343, %344 : vector<2x512xf32>
    %346 = arith.addf %301, %345 : vector<2x512xf32>
    %347 = vector.extract_strided_slice %329 {offsets = [0, 1], sizes = [2, 1], strides = [1, 1]} : vector<2x128xf32> to vector<2x1xf32>
    %348 = vector.broadcast %347 : vector<2x1xf32> to vector<2x512xf32>
    %349 = vector.broadcast %303 : vector<1x512xf32> to vector<2x512xf32>
    %350 = arith.mulf %348, %349 : vector<2x512xf32>
    %351 = arith.addf %346, %350 : vector<2x512xf32>
    %352 = math.tanh %351 : vector<2x512xf32>
    %353 = vector.extract_strided_slice %352 {offsets = [0, 0], sizes = [2, 128], strides = [1, 1]} : vector<2x512xf32> to vector<2x128xf32>
    %cst_94 = arith.constant 5.000000e-01 : f32
    %354 = vector.broadcast %cst_94 : f32 to vector<2x128xf32>
    %355 = arith.mulf %354, %353 : vector<2x128xf32>
    %cst_95 = arith.constant 5.000000e-01 : f32
    %356 = vector.broadcast %cst_95 : f32 to vector<2x128xf32>
    %357 = arith.addf %355, %356 : vector<2x128xf32>
    %358 = vector.extract_strided_slice %352 {offsets = [0, 128], sizes = [2, 128], strides = [1, 1]} : vector<2x512xf32> to vector<2x128xf32>
    %cst_96 = arith.constant 5.000000e-01 : f32
    %359 = vector.broadcast %cst_96 : f32 to vector<2x128xf32>
    %360 = arith.mulf %359, %358 : vector<2x128xf32>
    %cst_97 = arith.constant 5.000000e-01 : f32
    %361 = vector.broadcast %cst_97 : f32 to vector<2x128xf32>
    %362 = arith.addf %360, %361 : vector<2x128xf32>
    %363 = vector.extract_strided_slice %352 {offsets = [0, 256], sizes = [2, 128], strides = [1, 1]} : vector<2x512xf32> to vector<2x128xf32>
    %364 = vector.extract_strided_slice %352 {offsets = [0, 384], sizes = [2, 128], strides = [1, 1]} : vector<2x512xf32> to vector<2x128xf32>
    %cst_98 = arith.constant 5.000000e-01 : f32
    %365 = vector.broadcast %cst_98 : f32 to vector<2x128xf32>
    %366 = arith.mulf %365, %364 : vector<2x128xf32>
    %cst_99 = arith.constant 5.000000e-01 : f32
    %367 = vector.broadcast %cst_99 : f32 to vector<2x128xf32>
    %368 = arith.addf %366, %367 : vector<2x128xf32>
    %369 = arith.mulf %362, %327 : vector<2x128xf32>
    %370 = arith.mulf %357, %363 : vector<2x128xf32>
    %371 = arith.addf %369, %370 : vector<2x128xf32>
    %372 = math.tanh %371 : vector<2x128xf32>
    %373 = arith.mulf %368, %372 : vector<2x128xf32>
    %374 = vector.extract_strided_slice %373 {offsets = [0, 0], sizes = [2, 1], strides = [1, 1]} : vector<2x128xf32> to vector<2x1xf32>
    %375 = vector.broadcast %374 : vector<2x1xf32> to vector<2x2xf32>
    %376 = vector.broadcast %304 : vector<1x2xf32> to vector<2x2xf32>
    %377 = arith.mulf %375, %376 : vector<2x2xf32>
    %378 = vector.extract_strided_slice %373 {offsets = [0, 1], sizes = [2, 1], strides = [1, 1]} : vector<2x128xf32> to vector<2x1xf32>
    %379 = vector.broadcast %378 : vector<2x1xf32> to vector<2x2xf32>
    %380 = vector.broadcast %305 : vector<1x2xf32> to vector<2x2xf32>
    %381 = arith.mulf %379, %380 : vector<2x2xf32>
    %382 = arith.addf %377, %381 : vector<2x2xf32>
    %383 = vector.broadcast %306 : vector<1x2xf32> to vector<2x2xf32>
    %384 = arith.addf %382, %383 : vector<2x2xf32>
    %c0_100 = arith.constant 0 : index
    %c2_101 = arith.constant 2 : index
    %385 = vector.load %arg4[%c0_100, %c2_101] : memref<2x16xf32, #tpu.memory_space<vmem>>, vector<2x2xf32>
    tpu.vector_store %arg4[%c0_100, %c2_101], %384 {strides = array<i32>} : memref<2x16xf32, #tpu.memory_space<vmem>>, vector<2x2xf32>,
    %386 = vector.extract_strided_slice %373 {offsets = [0, 0], sizes = [2, 1], strides = [1, 1]} : vector<2x128xf32> to vector<2x1xf32>
    %387 = vector.broadcast %386 : vector<2x1xf32> to vector<2x512xf32>
    %388 = vector.broadcast %302 : vector<1x512xf32> to vector<2x512xf32>
    %389 = arith.mulf %387, %388 : vector<2x512xf32>
    %390 = arith.addf %301, %389 : vector<2x512xf32>
    %391 = vector.extract_strided_slice %373 {offsets = [0, 1], sizes = [2, 1], strides = [1, 1]} : vector<2x128xf32> to vector<2x1xf32>
    %392 = vector.broadcast %391 : vector<2x1xf32> to vector<2x512xf32>
    %393 = vector.broadcast %303 : vector<1x512xf32> to vector<2x512xf32>
    %394 = arith.mulf %392, %393 : vector<2x512xf32>
    %395 = arith.addf %390, %394 : vector<2x512xf32>
    %396 = math.tanh %395 : vector<2x512xf32>
    %397 = vector.extract_strided_slice %396 {offsets = [0, 0], sizes = [2, 128], strides = [1, 1]} : vector<2x512xf32> to vector<2x128xf32>
    %cst_102 = arith.constant 5.000000e-01 : f32
    %398 = vector.broadcast %cst_102 : f32 to vector<2x128xf32>
    %399 = arith.mulf %398, %397 : vector<2x128xf32>
    %cst_103 = arith.constant 5.000000e-01 : f32
    %400 = vector.broadcast %cst_103 : f32 to vector<2x128xf32>
    %401 = arith.addf %399, %400 : vector<2x128xf32>
    %402 = vector.extract_strided_slice %396 {offsets = [0, 128], sizes = [2, 128], strides = [1, 1]} : vector<2x512xf32> to vector<2x128xf32>
    %cst_104 = arith.constant 5.000000e-01 : f32
    %403 = vector.broadcast %cst_104 : f32 to vector<2x128xf32>
    %404 = arith.mulf %403, %402 : vector<2x128xf32>
    %cst_105 = arith.constant 5.000000e-01 : f32
    %405 = vector.broadcast %cst_105 : f32 to vector<2x128xf32>
    %406 = arith.addf %404, %405 : vector<2x128xf32>
    %407 = vector.extract_strided_slice %396 {offsets = [0, 256], sizes = [2, 128], strides = [1, 1]} : vector<2x512xf32> to vector<2x128xf32>
    %408 = vector.extract_strided_slice %396 {offsets = [0, 384], sizes = [2, 128], strides = [1, 1]} : vector<2x512xf32> to vector<2x128xf32>
    %cst_106 = arith.constant 5.000000e-01 : f32
    %409 = vector.broadcast %cst_106 : f32 to vector<2x128xf32>
    %410 = arith.mulf %409, %408 : vector<2x128xf32>
    %cst_107 = arith.constant 5.000000e-01 : f32
    %411 = vector.broadcast %cst_107 : f32 to vector<2x128xf32>
    %412 = arith.addf %410, %411 : vector<2x128xf32>
    %413 = arith.mulf %406, %371 : vector<2x128xf32>
    %414 = arith.mulf %401, %407 : vector<2x128xf32>
    %415 = arith.addf %413, %414 : vector<2x128xf32>
    %416 = math.tanh %415 : vector<2x128xf32>
    %417 = arith.mulf %412, %416 : vector<2x128xf32>
    %418 = vector.extract_strided_slice %417 {offsets = [0, 0], sizes = [2, 1], strides = [1, 1]} : vector<2x128xf32> to vector<2x1xf32>
    %419 = vector.broadcast %418 : vector<2x1xf32> to vector<2x2xf32>
    %420 = vector.broadcast %304 : vector<1x2xf32> to vector<2x2xf32>
    %421 = arith.mulf %419, %420 : vector<2x2xf32>
    %422 = vector.extract_strided_slice %417 {offsets = [0, 1], sizes = [2, 1], strides = [1, 1]} : vector<2x128xf32> to vector<2x1xf32>
    %423 = vector.broadcast %422 : vector<2x1xf32> to vector<2x2xf32>
    %424 = vector.broadcast %305 : vector<1x2xf32> to vector<2x2xf32>
    %425 = arith.mulf %423, %424 : vector<2x2xf32>
    %426 = arith.addf %421, %425 : vector<2x2xf32>
    %427 = vector.broadcast %306 : vector<1x2xf32> to vector<2x2xf32>
    %428 = arith.addf %426, %427 : vector<2x2xf32>
    %c0_108 = arith.constant 0 : index
    %c4_109 = arith.constant 4 : index
    %429 = vector.load %arg4[%c0_108, %c4_109] : memref<2x16xf32, #tpu.memory_space<vmem>>, vector<2x2xf32>
    tpu.vector_store %arg4[%c0_108, %c4_109], %428 {strides = array<i32>} : memref<2x16xf32, #tpu.memory_space<vmem>>, vector<2x2xf32>,
    %430 = vector.extract_strided_slice %417 {offsets = [0, 0], sizes = [2, 1], strides = [1, 1]} : vector<2x128xf32> to vector<2x1xf32>
    %431 = vector.broadcast %430 : vector<2x1xf32> to vector<2x512xf32>
    %432 = vector.broadcast %302 : vector<1x512xf32> to vector<2x512xf32>
    %433 = arith.mulf %431, %432 : vector<2x512xf32>
    %434 = arith.addf %301, %433 : vector<2x512xf32>
    %435 = vector.extract_strided_slice %417 {offsets = [0, 1], sizes = [2, 1], strides = [1, 1]} : vector<2x128xf32> to vector<2x1xf32>
    %436 = vector.broadcast %435 : vector<2x1xf32> to vector<2x512xf32>
    %437 = vector.broadcast %303 : vector<1x512xf32> to vector<2x512xf32>
    %438 = arith.mulf %436, %437 : vector<2x512xf32>
    %439 = arith.addf %434, %438 : vector<2x512xf32>
    %440 = math.tanh %439 : vector<2x512xf32>
    %441 = vector.extract_strided_slice %440 {offsets = [0, 0], sizes = [2, 128], strides = [1, 1]} : vector<2x512xf32> to vector<2x128xf32>
    %cst_110 = arith.constant 5.000000e-01 : f32
    %442 = vector.broadcast %cst_110 : f32 to vector<2x128xf32>
    %443 = arith.mulf %442, %441 : vector<2x128xf32>
    %cst_111 = arith.constant 5.000000e-01 : f32
    %444 = vector.broadcast %cst_111 : f32 to vector<2x128xf32>
    %445 = arith.addf %443, %444 : vector<2x128xf32>
    %446 = vector.extract_strided_slice %440 {offsets = [0, 128], sizes = [2, 128], strides = [1, 1]} : vector<2x512xf32> to vector<2x128xf32>
    %cst_112 = arith.constant 5.000000e-01 : f32
    %447 = vector.broadcast %cst_112 : f32 to vector<2x128xf32>
    %448 = arith.mulf %447, %446 : vector<2x128xf32>
    %cst_113 = arith.constant 5.000000e-01 : f32
    %449 = vector.broadcast %cst_113 : f32 to vector<2x128xf32>
    %450 = arith.addf %448, %449 : vector<2x128xf32>
    %451 = vector.extract_strided_slice %440 {offsets = [0, 256], sizes = [2, 128], strides = [1, 1]} : vector<2x512xf32> to vector<2x128xf32>
    %452 = vector.extract_strided_slice %440 {offsets = [0, 384], sizes = [2, 128], strides = [1, 1]} : vector<2x512xf32> to vector<2x128xf32>
    %cst_114 = arith.constant 5.000000e-01 : f32
    %453 = vector.broadcast %cst_114 : f32 to vector<2x128xf32>
    %454 = arith.mulf %453, %452 : vector<2x128xf32>
    %cst_115 = arith.constant 5.000000e-01 : f32
    %455 = vector.broadcast %cst_115 : f32 to vector<2x128xf32>
    %456 = arith.addf %454, %455 : vector<2x128xf32>
    %457 = arith.mulf %450, %415 : vector<2x128xf32>
    %458 = arith.mulf %445, %451 : vector<2x128xf32>
    %459 = arith.addf %457, %458 : vector<2x128xf32>
    %460 = math.tanh %459 : vector<2x128xf32>
    %461 = arith.mulf %456, %460 : vector<2x128xf32>
    %462 = vector.extract_strided_slice %461 {offsets = [0, 0], sizes = [2, 1], strides = [1, 1]} : vector<2x128xf32> to vector<2x1xf32>
    %463 = vector.broadcast %462 : vector<2x1xf32> to vector<2x2xf32>
    %464 = vector.broadcast %304 : vector<1x2xf32> to vector<2x2xf32>
    %465 = arith.mulf %463, %464 : vector<2x2xf32>
    %466 = vector.extract_strided_slice %461 {offsets = [0, 1], sizes = [2, 1], strides = [1, 1]} : vector<2x128xf32> to vector<2x1xf32>
    %467 = vector.broadcast %466 : vector<2x1xf32> to vector<2x2xf32>
    %468 = vector.broadcast %305 : vector<1x2xf32> to vector<2x2xf32>
    %469 = arith.mulf %467, %468 : vector<2x2xf32>
    %470 = arith.addf %465, %469 : vector<2x2xf32>
    %471 = vector.broadcast %306 : vector<1x2xf32> to vector<2x2xf32>
    %472 = arith.addf %470, %471 : vector<2x2xf32>
    %c0_116 = arith.constant 0 : index
    %c6_117 = arith.constant 6 : index
    %473 = vector.load %arg4[%c0_116, %c6_117] : memref<2x16xf32, #tpu.memory_space<vmem>>, vector<2x2xf32>
    tpu.vector_store %arg4[%c0_116, %c6_117], %472 {strides = array<i32>} : memref<2x16xf32, #tpu.memory_space<vmem>>, vector<2x2xf32>,
    %474 = vector.extract_strided_slice %461 {offsets = [0, 0], sizes = [2, 1], strides = [1, 1]} : vector<2x128xf32> to vector<2x1xf32>
    %475 = vector.broadcast %474 : vector<2x1xf32> to vector<2x512xf32>
    %476 = vector.broadcast %302 : vector<1x512xf32> to vector<2x512xf32>
    %477 = arith.mulf %475, %476 : vector<2x512xf32>
    %478 = arith.addf %301, %477 : vector<2x512xf32>
    %479 = vector.extract_strided_slice %461 {offsets = [0, 1], sizes = [2, 1], strides = [1, 1]} : vector<2x128xf32> to vector<2x1xf32>
    %480 = vector.broadcast %479 : vector<2x1xf32> to vector<2x512xf32>
    %481 = vector.broadcast %303 : vector<1x512xf32> to vector<2x512xf32>
    %482 = arith.mulf %480, %481 : vector<2x512xf32>
    %483 = arith.addf %478, %482 : vector<2x512xf32>
    %484 = math.tanh %483 : vector<2x512xf32>
    %485 = vector.extract_strided_slice %484 {offsets = [0, 0], sizes = [2, 128], strides = [1, 1]} : vector<2x512xf32> to vector<2x128xf32>
    %cst_118 = arith.constant 5.000000e-01 : f32
    %486 = vector.broadcast %cst_118 : f32 to vector<2x128xf32>
    %487 = arith.mulf %486, %485 : vector<2x128xf32>
    %cst_119 = arith.constant 5.000000e-01 : f32
    %488 = vector.broadcast %cst_119 : f32 to vector<2x128xf32>
    %489 = arith.addf %487, %488 : vector<2x128xf32>
    %490 = vector.extract_strided_slice %484 {offsets = [0, 128], sizes = [2, 128], strides = [1, 1]} : vector<2x512xf32> to vector<2x128xf32>
    %cst_120 = arith.constant 5.000000e-01 : f32
    %491 = vector.broadcast %cst_120 : f32 to vector<2x128xf32>
    %492 = arith.mulf %491, %490 : vector<2x128xf32>
    %cst_121 = arith.constant 5.000000e-01 : f32
    %493 = vector.broadcast %cst_121 : f32 to vector<2x128xf32>
    %494 = arith.addf %492, %493 : vector<2x128xf32>
    %495 = vector.extract_strided_slice %484 {offsets = [0, 256], sizes = [2, 128], strides = [1, 1]} : vector<2x512xf32> to vector<2x128xf32>
    %496 = vector.extract_strided_slice %484 {offsets = [0, 384], sizes = [2, 128], strides = [1, 1]} : vector<2x512xf32> to vector<2x128xf32>
    %cst_122 = arith.constant 5.000000e-01 : f32
    %497 = vector.broadcast %cst_122 : f32 to vector<2x128xf32>
    %498 = arith.mulf %497, %496 : vector<2x128xf32>
    %cst_123 = arith.constant 5.000000e-01 : f32
    %499 = vector.broadcast %cst_123 : f32 to vector<2x128xf32>
    %500 = arith.addf %498, %499 : vector<2x128xf32>
    %501 = arith.mulf %494, %459 : vector<2x128xf32>
    %502 = arith.mulf %489, %495 : vector<2x128xf32>
    %503 = arith.addf %501, %502 : vector<2x128xf32>
    %504 = math.tanh %503 : vector<2x128xf32>
    %505 = arith.mulf %500, %504 : vector<2x128xf32>
    %506 = vector.extract_strided_slice %505 {offsets = [0, 0], sizes = [2, 1], strides = [1, 1]} : vector<2x128xf32> to vector<2x1xf32>
    %507 = vector.broadcast %506 : vector<2x1xf32> to vector<2x2xf32>
    %508 = vector.broadcast %304 : vector<1x2xf32> to vector<2x2xf32>
    %509 = arith.mulf %507, %508 : vector<2x2xf32>
    %510 = vector.extract_strided_slice %505 {offsets = [0, 1], sizes = [2, 1], strides = [1, 1]} : vector<2x128xf32> to vector<2x1xf32>
    %511 = vector.broadcast %510 : vector<2x1xf32> to vector<2x2xf32>
    %512 = vector.broadcast %305 : vector<1x2xf32> to vector<2x2xf32>
    %513 = arith.mulf %511, %512 : vector<2x2xf32>
    %514 = arith.addf %509, %513 : vector<2x2xf32>
    %515 = vector.broadcast %306 : vector<1x2xf32> to vector<2x2xf32>
    %516 = arith.addf %514, %515 : vector<2x2xf32>
    %c0_124 = arith.constant 0 : index
    %c8 = arith.constant 8 : index
    %517 = vector.load %arg4[%c0_124, %c8] : memref<2x16xf32, #tpu.memory_space<vmem>>, vector<2x2xf32>
    tpu.vector_store %arg4[%c0_124, %c8], %516 {strides = array<i32>} : memref<2x16xf32, #tpu.memory_space<vmem>>, vector<2x2xf32>,
    %518 = vector.extract_strided_slice %505 {offsets = [0, 0], sizes = [2, 1], strides = [1, 1]} : vector<2x128xf32> to vector<2x1xf32>
    %519 = vector.broadcast %518 : vector<2x1xf32> to vector<2x512xf32>
    %520 = vector.broadcast %302 : vector<1x512xf32> to vector<2x512xf32>
    %521 = arith.mulf %519, %520 : vector<2x512xf32>
    %522 = arith.addf %301, %521 : vector<2x512xf32>
    %523 = vector.extract_strided_slice %505 {offsets = [0, 1], sizes = [2, 1], strides = [1, 1]} : vector<2x128xf32> to vector<2x1xf32>
    %524 = vector.broadcast %523 : vector<2x1xf32> to vector<2x512xf32>
    %525 = vector.broadcast %303 : vector<1x512xf32> to vector<2x512xf32>
    %526 = arith.mulf %524, %525 : vector<2x512xf32>
    %527 = arith.addf %522, %526 : vector<2x512xf32>
    %528 = math.tanh %527 : vector<2x512xf32>
    %529 = vector.extract_strided_slice %528 {offsets = [0, 0], sizes = [2, 128], strides = [1, 1]} : vector<2x512xf32> to vector<2x128xf32>
    %cst_125 = arith.constant 5.000000e-01 : f32
    %530 = vector.broadcast %cst_125 : f32 to vector<2x128xf32>
    %531 = arith.mulf %530, %529 : vector<2x128xf32>
    %cst_126 = arith.constant 5.000000e-01 : f32
    %532 = vector.broadcast %cst_126 : f32 to vector<2x128xf32>
    %533 = arith.addf %531, %532 : vector<2x128xf32>
    %534 = vector.extract_strided_slice %528 {offsets = [0, 128], sizes = [2, 128], strides = [1, 1]} : vector<2x512xf32> to vector<2x128xf32>
    %cst_127 = arith.constant 5.000000e-01 : f32
    %535 = vector.broadcast %cst_127 : f32 to vector<2x128xf32>
    %536 = arith.mulf %535, %534 : vector<2x128xf32>
    %cst_128 = arith.constant 5.000000e-01 : f32
    %537 = vector.broadcast %cst_128 : f32 to vector<2x128xf32>
    %538 = arith.addf %536, %537 : vector<2x128xf32>
    %539 = vector.extract_strided_slice %528 {offsets = [0, 256], sizes = [2, 128], strides = [1, 1]} : vector<2x512xf32> to vector<2x128xf32>
    %540 = vector.extract_strided_slice %528 {offsets = [0, 384], sizes = [2, 128], strides = [1, 1]} : vector<2x512xf32> to vector<2x128xf32>
    %cst_129 = arith.constant 5.000000e-01 : f32
    %541 = vector.broadcast %cst_129 : f32 to vector<2x128xf32>
    %542 = arith.mulf %541, %540 : vector<2x128xf32>
    %cst_130 = arith.constant 5.000000e-01 : f32
    %543 = vector.broadcast %cst_130 : f32 to vector<2x128xf32>
    %544 = arith.addf %542, %543 : vector<2x128xf32>
    %545 = arith.mulf %538, %503 : vector<2x128xf32>
    %546 = arith.mulf %533, %539 : vector<2x128xf32>
    %547 = arith.addf %545, %546 : vector<2x128xf32>
    %548 = math.tanh %547 : vector<2x128xf32>
    %549 = arith.mulf %544, %548 : vector<2x128xf32>
    %550 = vector.extract_strided_slice %549 {offsets = [0, 0], sizes = [2, 1], strides = [1, 1]} : vector<2x128xf32> to vector<2x1xf32>
    %551 = vector.broadcast %550 : vector<2x1xf32> to vector<2x2xf32>
    %552 = vector.broadcast %304 : vector<1x2xf32> to vector<2x2xf32>
    %553 = arith.mulf %551, %552 : vector<2x2xf32>
    %554 = vector.extract_strided_slice %549 {offsets = [0, 1], sizes = [2, 1], strides = [1, 1]} : vector<2x128xf32> to vector<2x1xf32>
    %555 = vector.broadcast %554 : vector<2x1xf32> to vector<2x2xf32>
    %556 = vector.broadcast %305 : vector<1x2xf32> to vector<2x2xf32>
    %557 = arith.mulf %555, %556 : vector<2x2xf32>
    %558 = arith.addf %553, %557 : vector<2x2xf32>
    %559 = vector.broadcast %306 : vector<1x2xf32> to vector<2x2xf32>
    %560 = arith.addf %558, %559 : vector<2x2xf32>
    %c0_131 = arith.constant 0 : index
    %c10 = arith.constant 10 : index
    %561 = vector.load %arg4[%c0_131, %c10] : memref<2x16xf32, #tpu.memory_space<vmem>>, vector<2x2xf32>
    tpu.vector_store %arg4[%c0_131, %c10], %560 {strides = array<i32>} : memref<2x16xf32, #tpu.memory_space<vmem>>, vector<2x2xf32>,
    %562 = vector.extract_strided_slice %549 {offsets = [0, 0], sizes = [2, 1], strides = [1, 1]} : vector<2x128xf32> to vector<2x1xf32>
    %563 = vector.broadcast %562 : vector<2x1xf32> to vector<2x512xf32>
    %564 = vector.broadcast %302 : vector<1x512xf32> to vector<2x512xf32>
    %565 = arith.mulf %563, %564 : vector<2x512xf32>
    %566 = arith.addf %301, %565 : vector<2x512xf32>
    %567 = vector.extract_strided_slice %549 {offsets = [0, 1], sizes = [2, 1], strides = [1, 1]} : vector<2x128xf32> to vector<2x1xf32>
    %568 = vector.broadcast %567 : vector<2x1xf32> to vector<2x512xf32>
    %569 = vector.broadcast %303 : vector<1x512xf32> to vector<2x512xf32>
    %570 = arith.mulf %568, %569 : vector<2x512xf32>
    %571 = arith.addf %566, %570 : vector<2x512xf32>
    %572 = math.tanh %571 : vector<2x512xf32>
    %573 = vector.extract_strided_slice %572 {offsets = [0, 0], sizes = [2, 128], strides = [1, 1]} : vector<2x512xf32> to vector<2x128xf32>
    %cst_132 = arith.constant 5.000000e-01 : f32
    %574 = vector.broadcast %cst_132 : f32 to vector<2x128xf32>
    %575 = arith.mulf %574, %573 : vector<2x128xf32>
    %cst_133 = arith.constant 5.000000e-01 : f32
    %576 = vector.broadcast %cst_133 : f32 to vector<2x128xf32>
    %577 = arith.addf %575, %576 : vector<2x128xf32>
    %578 = vector.extract_strided_slice %572 {offsets = [0, 128], sizes = [2, 128], strides = [1, 1]} : vector<2x512xf32> to vector<2x128xf32>
    %cst_134 = arith.constant 5.000000e-01 : f32
    %579 = vector.broadcast %cst_134 : f32 to vector<2x128xf32>
    %580 = arith.mulf %579, %578 : vector<2x128xf32>
    %cst_135 = arith.constant 5.000000e-01 : f32
    %581 = vector.broadcast %cst_135 : f32 to vector<2x128xf32>
    %582 = arith.addf %580, %581 : vector<2x128xf32>
    %583 = vector.extract_strided_slice %572 {offsets = [0, 256], sizes = [2, 128], strides = [1, 1]} : vector<2x512xf32> to vector<2x128xf32>
    %584 = vector.extract_strided_slice %572 {offsets = [0, 384], sizes = [2, 128], strides = [1, 1]} : vector<2x512xf32> to vector<2x128xf32>
    %cst_136 = arith.constant 5.000000e-01 : f32
    %585 = vector.broadcast %cst_136 : f32 to vector<2x128xf32>
    %586 = arith.mulf %585, %584 : vector<2x128xf32>
    %cst_137 = arith.constant 5.000000e-01 : f32
    %587 = vector.broadcast %cst_137 : f32 to vector<2x128xf32>
    %588 = arith.addf %586, %587 : vector<2x128xf32>
    %589 = arith.mulf %582, %547 : vector<2x128xf32>
    %590 = arith.mulf %577, %583 : vector<2x128xf32>
    %591 = arith.addf %589, %590 : vector<2x128xf32>
    %592 = math.tanh %591 : vector<2x128xf32>
    %593 = arith.mulf %588, %592 : vector<2x128xf32>
    %594 = vector.extract_strided_slice %593 {offsets = [0, 0], sizes = [2, 1], strides = [1, 1]} : vector<2x128xf32> to vector<2x1xf32>
    %595 = vector.broadcast %594 : vector<2x1xf32> to vector<2x2xf32>
    %596 = vector.broadcast %304 : vector<1x2xf32> to vector<2x2xf32>
    %597 = arith.mulf %595, %596 : vector<2x2xf32>
    %598 = vector.extract_strided_slice %593 {offsets = [0, 1], sizes = [2, 1], strides = [1, 1]} : vector<2x128xf32> to vector<2x1xf32>
    %599 = vector.broadcast %598 : vector<2x1xf32> to vector<2x2xf32>
    %600 = vector.broadcast %305 : vector<1x2xf32> to vector<2x2xf32>
    %601 = arith.mulf %599, %600 : vector<2x2xf32>
    %602 = arith.addf %597, %601 : vector<2x2xf32>
    %603 = vector.broadcast %306 : vector<1x2xf32> to vector<2x2xf32>
    %604 = arith.addf %602, %603 : vector<2x2xf32>
    %c0_138 = arith.constant 0 : index
    %c12 = arith.constant 12 : index
    %605 = vector.load %arg4[%c0_138, %c12] : memref<2x16xf32, #tpu.memory_space<vmem>>, vector<2x2xf32>
    tpu.vector_store %arg4[%c0_138, %c12], %604 {strides = array<i32>} : memref<2x16xf32, #tpu.memory_space<vmem>>, vector<2x2xf32>,
    %606 = vector.extract_strided_slice %593 {offsets = [0, 0], sizes = [2, 1], strides = [1, 1]} : vector<2x128xf32> to vector<2x1xf32>
    %607 = vector.broadcast %606 : vector<2x1xf32> to vector<2x512xf32>
    %608 = vector.broadcast %302 : vector<1x512xf32> to vector<2x512xf32>
    %609 = arith.mulf %607, %608 : vector<2x512xf32>
    %610 = arith.addf %301, %609 : vector<2x512xf32>
    %611 = vector.extract_strided_slice %593 {offsets = [0, 1], sizes = [2, 1], strides = [1, 1]} : vector<2x128xf32> to vector<2x1xf32>
    %612 = vector.broadcast %611 : vector<2x1xf32> to vector<2x512xf32>
    %613 = vector.broadcast %303 : vector<1x512xf32> to vector<2x512xf32>
    %614 = arith.mulf %612, %613 : vector<2x512xf32>
    %615 = arith.addf %610, %614 : vector<2x512xf32>
    %616 = math.tanh %615 : vector<2x512xf32>
    %617 = vector.extract_strided_slice %616 {offsets = [0, 0], sizes = [2, 128], strides = [1, 1]} : vector<2x512xf32> to vector<2x128xf32>
    %cst_139 = arith.constant 5.000000e-01 : f32
    %618 = vector.broadcast %cst_139 : f32 to vector<2x128xf32>
    %619 = arith.mulf %618, %617 : vector<2x128xf32>
    %cst_140 = arith.constant 5.000000e-01 : f32
    %620 = vector.broadcast %cst_140 : f32 to vector<2x128xf32>
    %621 = arith.addf %619, %620 : vector<2x128xf32>
    %622 = vector.extract_strided_slice %616 {offsets = [0, 128], sizes = [2, 128], strides = [1, 1]} : vector<2x512xf32> to vector<2x128xf32>
    %cst_141 = arith.constant 5.000000e-01 : f32
    %623 = vector.broadcast %cst_141 : f32 to vector<2x128xf32>
    %624 = arith.mulf %623, %622 : vector<2x128xf32>
    %cst_142 = arith.constant 5.000000e-01 : f32
    %625 = vector.broadcast %cst_142 : f32 to vector<2x128xf32>
    %626 = arith.addf %624, %625 : vector<2x128xf32>
    %627 = vector.extract_strided_slice %616 {offsets = [0, 256], sizes = [2, 128], strides = [1, 1]} : vector<2x512xf32> to vector<2x128xf32>
    %628 = vector.extract_strided_slice %616 {offsets = [0, 384], sizes = [2, 128], strides = [1, 1]} : vector<2x512xf32> to vector<2x128xf32>
    %cst_143 = arith.constant 5.000000e-01 : f32
    %629 = vector.broadcast %cst_143 : f32 to vector<2x128xf32>
    %630 = arith.mulf %629, %628 : vector<2x128xf32>
    %cst_144 = arith.constant 5.000000e-01 : f32
    %631 = vector.broadcast %cst_144 : f32 to vector<2x128xf32>
    %632 = arith.addf %630, %631 : vector<2x128xf32>
    %633 = arith.mulf %626, %591 : vector<2x128xf32>
    %634 = arith.mulf %621, %627 : vector<2x128xf32>
    %635 = arith.addf %633, %634 : vector<2x128xf32>
    %636 = math.tanh %635 : vector<2x128xf32>
    %637 = arith.mulf %632, %636 : vector<2x128xf32>
    %638 = vector.extract_strided_slice %637 {offsets = [0, 0], sizes = [2, 1], strides = [1, 1]} : vector<2x128xf32> to vector<2x1xf32>
    %639 = vector.broadcast %638 : vector<2x1xf32> to vector<2x2xf32>
    %640 = vector.broadcast %304 : vector<1x2xf32> to vector<2x2xf32>
    %641 = arith.mulf %639, %640 : vector<2x2xf32>
    %642 = vector.extract_strided_slice %637 {offsets = [0, 1], sizes = [2, 1], strides = [1, 1]} : vector<2x128xf32> to vector<2x1xf32>
    %643 = vector.broadcast %642 : vector<2x1xf32> to vector<2x2xf32>
    %644 = vector.broadcast %305 : vector<1x2xf32> to vector<2x2xf32>
    %645 = arith.mulf %643, %644 : vector<2x2xf32>
    %646 = arith.addf %641, %645 : vector<2x2xf32>
    %647 = vector.broadcast %306 : vector<1x2xf32> to vector<2x2xf32>
    %648 = arith.addf %646, %647 : vector<2x2xf32>
    %c0_145 = arith.constant 0 : index
    %c14 = arith.constant 14 : index
    %649 = vector.load %arg4[%c0_145, %c14] : memref<2x16xf32, #tpu.memory_space<vmem>>, vector<2x2xf32>
    tpu.vector_store %arg4[%c0_145, %c14], %648 {strides = array<i32>} : memref<2x16xf32, #tpu.memory_space<vmem>>, vector<2x2xf32>,
    return
  }
}

</mosaic_0001>

<bundles_post_ra>
// kernel: lstm_autoencoder.1
= control target key start
LH: loop header
LB: loop body
LE: loop exit
PB: predicated region body
PF: predicated region fallthrough
CT: control target
= control target key end

     0   :  { %9 = vsyncpa [#allocation3], 0  ;;  %s2849_s0 = inlined_call_operand.vmem [shape: f32[2,16], index: 0, kind: input, shape index: {}]   ;;  %s2850_s1 = inlined_call_operand.hbm [shape: bf16[128,512], index: 1, kind: input, shape index: {}]   ;;  %s2851_s2 = inlined_call_operand.hbm [shape: f32[128,512], index: 2, kind: input, shape index: {}]   ;;  %s2852_s3 = inlined_call_operand.vmem [shape: f32[8,512], index: 3, kind: input, shape index: {}]   ;;  %s2853_s4 = inlined_call_operand.vmem [shape: f32[2,16], index: 4, kind: output, shape index: {}]  }
   0x1   :  { %s17_s17 = sshll.u32 %s2850_s1, 4  ;;  %s18_s17 = int_to_ptr.hbm [resolvable:$true] %s17_s17 }
   0x2   :  { %10 = vsyncpa [#allocation5], 0  ;;  %s2023_s18 = smov [#allocation2]   ;;  %s30_s22 = sshll.u32 %s2851_s2, 4  ;;  %s31_s22 = int_to_ptr.hbm [resolvable:$true] %s30_s22 }
   0x3   :  { %s19_s19 = sshll.u32 %s2023_s18, 4  ;;  %s2024_s23 = smov 256   ;;  %s20_s19 = int_to_ptr.vmem [resolvable:$true] %s19_s19 }
   0x4   :  { %s2025_s24 = smov 16   ;;  %s2026_s25 = smov [#allocation4]  }
   0x5   :  { %25 = dma.hbm_to_vmem [thread:$0]  %s18_s17, 4096, %s20_s19, [#allocation3], %s2024_s23, %s2024_s23, %s2025_s24  }
   0x6   :  { %s32_s26 = sshll.u32 %s2026_s25, 4  ;;  %s2027_s27 = smov 512   ;;  %s33_s26 = int_to_ptr.vmem [resolvable:$true] %s32_s26 }
   0x7   :  { %s2028_s28 = smov 32  }
   0x8   :  { %38 = dma.hbm_to_vmem [thread:$0]  %s31_s22, 8192, %s33_s26, [#allocation5], %s2027_s27, %s2027_s27, %s2028_s28  }
   0x9   :  { %2019 = dma.done.wait [#allocation3], 4096  }
   0xa   :  { %2020 = vsyncadd [#allocation3], 4294963200 }
   0xb   :  { %2021 = dma.done.wait [#allocation5], 8192  }
   0xc   :  { %2022 = vsyncadd [#allocation5], 4294959104  ;;  %v2856_v0 = vmov 0   ;;  %v2089_v1 = vld [vmem:[%s2849_s0] sm:$0x3]  ;;  %v2854_v2 = vmov 1  }
   0xd   :  { %1782 = vset.pattern.permute.xlu0 %v2856_v0  ;;  %v1702_v3 = vld [vmem:[#allocation2 + $0xe0] sm:$0xf]  ;;  %v1749_v4 = vld [vmem:[#allocation2 + $0xec] sm:$0xf0]  ;;  %v1747_v5 = vld [vmem:[#allocation2 + $0xe4] sm:$0xf] }
   0xe   :  { %57 = vperm.xlu0 %1782, %v2089_v1   ;;  %v2094_v6 = vor.u32 %v1749_v4, %v1702_v3  ;;  %v1704_v7 = vld [vmem:[#allocation2 + $0xf0] sm:$0xf0]  ;;  %v1710_v8 = vld [vmem:[#allocation2 + $0xe8] sm:$0xf]  ;;  %v1750_v9 = vld [vmem:[#allocation2 + $0xf4] sm:$0xf0] }
   0xf   :  { %v2096_v10 = vor.u32 %v1747_v5, %v1704_v7  ;;  %v2098_v11 = vor.u32 %v1750_v9, %v1710_v8  ;;  %v1748_v12 = vld [vmem:[#allocation2 + $0xec] sm:$0xf]  ;;  %v1712_v13 = vld [vmem:[#allocation2 + $0xf8] sm:$0xf0]  ;;  %v1686_v15 = vld [vmem:[#allocation2 + $0xc0] sm:$0xf] }
  0x10   :  { %339 = vmatpush.bf16.msra.mxu0 %v2094_v6  ;;  %v2101_v14 = vor.u32 %v1748_v12, %v1712_v13  ;;  %v1745_v16 = vld [vmem:[#allocation2 + $0xcc] sm:$0xf0]  ;;  %v1743_v17 = vld [vmem:[#allocation2 + $0xc4] sm:$0xf]  ;;  %v1688_v19 = vld [vmem:[#allocation2 + $0xd0] sm:$0xf0] }
  0x11   :  { %352 = vmatpush.bf16.msra.mxu1 %v2096_v10  ;;  %365 = vmatpush.bf16.msra.mxu2 %v2098_v11  ;;  %v2106_v18 = vor.u32 %v1745_v16, %v1686_v15  ;;  %v1694_v20 = vld [vmem:[#allocation2 + $0xc8] sm:$0xf]  ;;  %v1746_v21 = vld [vmem:[#allocation2 + $0xd4] sm:$0xf0]  ;;  %v2108_v22 = vor.u32 %v1743_v17, %v1688_v19  ;;  %v1744_v24 = vld [vmem:[#allocation2 + $0xcc] sm:$0xf] }
  0x12   :  { %378 = vmatpush.bf16.msra.mxu3 %v2101_v14  ;;  %v2110_v23 = vor.u32 %v1746_v21, %v1694_v20  ;;  %v1696_v25 = vld [vmem:[#allocation2 + $0xd8] sm:$0xf0]  ;;  %v1670_v27 = vld [vmem:[#allocation2 + $0xa0] sm:$0xf]  ;;  %v1741_v28 = vld [vmem:[#allocation2 + $0xac] sm:$0xf0] }
  0x13   :  { %v2113_v26 = vor.u32 %v1744_v24, %v1696_v25  ;;  %v1739_v29 = vld [vmem:[#allocation2 + $0xa4] sm:$0xf]  ;;  %v2118_v30 = vor.u32 %v1741_v28, %v1670_v27  ;;  %v1672_v31 = vld [vmem:[#allocation2 + $0xb0] sm:$0xf0]  ;;  %v1678_v32 = vld [vmem:[#allocation2 + $0xa8] sm:$0xf] }
  0x14   :  { %340 = vmatpush.bf16.msra.mxu0 %v2106_v18  ;;  %v1742_v33 = vld [vmem:[#allocation2 + $0xb4] sm:$0xf0]  ;;  %v2120_v34 = vor.u32 %v1739_v29, %v1672_v31  ;;  %v1740_v36 = vld [vmem:[#allocation2 + $0xac] sm:$0xf]  ;;  %v1680_v37 = vld [vmem:[#allocation2 + $0xb8] sm:$0xf0] }
  0x15   :  { %353 = vmatpush.bf16.msra.mxu1 %v2108_v22  ;;  %366 = vmatpush.bf16.msra.mxu2 %v2110_v23  ;;  %v2122_v35 = vor.u32 %v1742_v33, %v1678_v32  ;;  %v2125_v38 = vor.u32 %v1740_v36, %v1680_v37  ;;  %v1654_v39 = vld [vmem:[#allocation2 + $0x80] sm:$0xf]  ;;  %v1737_v40 = vld [vmem:[#allocation2 + $0x8c] sm:$0xf0]  ;;  %v1735_v41 = vld [vmem:[#allocation2 + $0x84] sm:$0xf] }
  0x16   :  { %1783 = vset.pattern.permute.xlu0 %v2854_v2  ;;  %379 = vmatpush.bf16.msra.mxu3 %v2113_v26  ;;  %v2130_v42 = vor.u32 %v1737_v40, %v1654_v39  ;;  %v1656_v43 = vld [vmem:[#allocation2 + $0x90] sm:$0xf0]  ;;  %v1662_v44 = vld [vmem:[#allocation2 + $0x88] sm:$0xf]  ;;  %v1738_v45 = vld [vmem:[#allocation2 + $0x94] sm:$0xf0] }
  0x17   :  { %74 = vperm.xlu0 %1783, %v2089_v1   ;;  %v2132_v46 = vor.u32 %v1735_v41, %v1656_v43  ;;  %v2134_v47 = vor.u32 %v1738_v45, %v1662_v44  ;;  %v1736_v48 = vld [vmem:[#allocation2 + $0x8c] sm:$0xf]  ;;  %v1664_v49 = vld [vmem:[#allocation2 + $0x98] sm:$0xf0]  ;;  %v1638_v52 = vld [vmem:[#allocation2 + $0x60] sm:$0xf] }
  0x18   :  { %341 = vmatpush.bf16.msra.mxu0 %v2118_v30  ;;  %v2139_v50 = vld [vmem:[%s2852_s3 + $0x4] ss:$8 sm:$0xf]  ;;  %v2142_v51 = vor.u32 %v1736_v48, %v1664_v49  ;;  %v1733_v53 = vld [vmem:[#allocation2 + $0x6c] sm:$0xf0]  ;;  %v2031_v19 = vmov 2  }
  0x19   :  { %354 = vmatpush.bf16.msra.mxu1 %v2120_v34  ;;  %367 = vmatpush.bf16.msra.mxu2 %v2122_v35  ;;  %v1731_v54 = vld [vmem:[#allocation2 + $0x64] sm:$0xf]  ;;  %v2147_v55 = vor.u32 %v1733_v53, %v1638_v52  ;;  %v1640_v56 = vld [vmem:[#allocation2 + $0x70] sm:$0xf0]  ;;  %v1646_v57 = vld [vmem:[#allocation2 + $0x68] sm:$0xf] }
  0x1a   :  { %380 = vmatpush.bf16.msra.mxu3 %v2125_v38  ;;  %v1734_v58 = vld [vmem:[#allocation2 + $0x74] sm:$0xf0]  ;;  %v2150_v59 = vperm.slane %v2139_v50, 0  ;;  %v2153_v60 = vperm.slane %v2139_v50, 1  ;;  %v2155_v61 = vor.u32 %v1731_v54, %v1640_v56  ;;  %v1732_v63 = vld [vmem:[#allocation2 + $0x6c] sm:$0xf]  ;;  %1784 = vset.pattern.permute.xlu1 %v2031_v19 }
  0x1b   :  { %v2157_v62 = vor.u32 %v1734_v58, %v1646_v57  ;;  %v1648_v3 = vld [vmem:[#allocation2 + $0x78] sm:$0xf0]  ;;  %v2160_v4 = vperm.slane %v2139_v50, 2  ;;  %v1622_v7 = vld [vmem:[#allocation2 + $0x40] sm:$0xf]  ;;  %123 = vperm.xlu1 %1784, %v2089_v1   ;;  %s2045_s18 = smov 126  }
  0x1c   :  { %342 = vmatpush.bf16.msra.mxu0 %v2130_v42  ;;  %2874 = vst [vmem:[#allocation8_spill] sm:$0xff] %v2150_v59  ;;  %v2163_v5 = vor.u32 %v1732_v63, %v1648_v3  ;;  %v1729_v8 = vld [vmem:[#allocation2 + $0x4c] sm:$0xf0]  ;;  %v1727_v12 = vld [vmem:[#allocation2 + $0x44] sm:$0xf]  ;;  %s2046_s19 = smov 124  }
  0x1d   :  { %355 = vmatpush.bf16.msra.mxu1 %v2132_v46  ;;  %368 = vmatpush.bf16.msra.mxu2 %v2134_v47  ;;  %2875 = vst [vmem:[#allocation9_spill] sm:$0xff] %v2153_v60  ;;  %v2167_v9 = vor.u32 %v1729_v8, %v1622_v7  ;;  %v1624_v13 = vld [vmem:[#allocation2 + $0x50] sm:$0xf0]  ;;  %v1630_v15 = vld [vmem:[#allocation2 + $0x48] sm:$0xf]  ;;  %s2048_s20 = smov 2  }
  0x1e   :  { %381 = vmatpush.bf16.msra.mxu3 %v2142_v51  ;;  %v1587_v17 = vld [vmem:[%s2852_s3 + $0x5] ss:$8 sm:$0xf]  ;;  %v2175_v20 = vor.u32 %v1727_v12, %v1624_v13  ;;  %v1730_v21 = vld [vmem:[#allocation2 + $0x54] sm:$0xf0]  ;;  %s2049_s21 = smov 4  }
  0x1f   :  { %v1728_v24 = vld [vmem:[#allocation2 + $0x4c] sm:$0xf]  ;;  %v1632_v25 = vld [vmem:[#allocation2 + $0x58] sm:$0xf0]  ;;  %v1606_v27 = vld [vmem:[#allocation2 + $0x20] sm:$0xf]  ;;  %v2179_v31 = vor.u32 %v1730_v21, %v1630_v15 }
  0x20   :  { %343 = vmatpush.bf16.msra.mxu0 %v2147_v55  ;;  %v1725_v28 = vld [vmem:[#allocation2 + $0x2c] sm:$0xf0]  ;;  %v1723_v29 = vld [vmem:[#allocation2 + $0x24] sm:$0xf]  ;;  %v2181_v32 = vor.u32 %v1728_v24, %v1632_v25  ;;  %v1608_v36 = vld [vmem:[#allocation2 + $0x30] sm:$0xf0] }
  0x21   :  { %356 = vmatpush.bf16.msra.mxu1 %v2155_v61  ;;  %369 = vmatpush.bf16.msra.mxu2 %v2157_v62  ;;  %v2183_v33 = vor.u32 %v1725_v28, %v1606_v27  ;;  %v1614_v37 = vld [vmem:[#allocation2 + $0x28] sm:$0xf]  ;;  %v1726_v39 = vld [vmem:[#allocation2 + $0x34] sm:$0xf0]  ;;  %v2189_v41 = vor.u32 %v1723_v29, %v1608_v36  ;;  %v1724_v43 = vld [vmem:[#allocation2 + $0x2c] sm:$0xf] }
  0x22   :  { %382 = vmatpush.bf16.msra.mxu3 %v2163_v5  ;;  %v50_v40 = vld [vmem:[%s2852_s3] ss:$8 sm:$0xf]  ;;  %v1616_v44 = vld [vmem:[#allocation2 + $0x38] sm:$0xf0]  ;;  %v2193_v48 = vor.u32 %v1726_v39, %v1614_v37  ;;  %v2197_v56 = vperm.slane %v1587_v17, 0 }
  0x23   :  { %v1590_v45 = vld [vmem:[#allocation2] sm:$0xf]  ;;  %v2195_v49 = vor.u32 %v1724_v43, %v1616_v44  ;;  %v1721_v52 = vld [vmem:[#allocation2 + $0xc] sm:$0xf0]  ;;  %v1719_v53 = vld [vmem:[#allocation2 + $0x4] sm:$0xf] }
  0x24   :  { %344 = vmatpush.bf16.msra.mxu0 %v2167_v9  ;;  %v1592_v54 = vld [vmem:[#allocation2 + $0x10] sm:$0xf0]  ;;  %2876 = vst [vmem:[#allocation10_spill] sm:$0xff] %v2197_v56  ;;  %v2199_v57 = vperm.slane %v1587_v17, 1  ;;  %v1598_v58 = vld [vmem:[#allocation2 + $0x8] sm:$0xf]  ;;  %v2204_v7 = vor.u32 %v1721_v52, %v1590_v45 }
  0x25   :  { %357 = vmatpush.bf16.msra.mxu1 %v2175_v20  ;;  %370 = vmatpush.bf16.msra.mxu2 %v2179_v31  ;;  %v1722_v63 = vld [vmem:[#allocation2 + $0x14] sm:$0xf0]  ;;  %v2201_v3 = vperm.slane %v1587_v17, 2  ;;  %v1720_v8 = vld [vmem:[#allocation2 + $0xc] sm:$0xf]  ;;  %v2207_v13 = vor.u32 %v1719_v53, %v1592_v54  ;;  %v2210_v15 = vperm.slane %v2139_v50, 3 }
  0x26   :  { %383 = vmatpush.bf16.msra.mxu3 %v2181_v32  ;;  %2877 = vst [vmem:[#allocation11_spill] sm:$0xff] %v2199_v57  ;;  %v1600_v12 = vld [vmem:[#allocation2 + $0x18] sm:$0xf0]  ;;  %v2212_v19 = vperm.slane %v1587_v17, 3  ;;  %v2214_v21 = vperm.slane %v50_v40, 0  ;;  %v2218_v24 = vor.u32 %v1722_v63, %v1598_v58  ;;  %v2224_v28 = vperm.slane %v50_v40, 1 }
  0x27   :  { %v2226_v29 = vor.u32 %v1720_v8, %v1600_v12  ;;  %v2032_v17 = vmov 3   ;;  %v2234_v44 = vperm.slane %v50_v40, 2  ;;  %v2249_v12 = vperm.slane %v50_v40, 3  ;;  %s2050_s22 = smov 10   ;;  %s2051_s23 = smov 8  }
  0x28   :  { %345 = vmatpush.bf16.msra.mxu0 %v2183_v33  ;;  %2878 = vst [vmem:[#allocation12_spill] sm:$0xff] %v2224_v28  ;;  %1785 = vset.pattern.permute.xlu1 %v2032_v17  ;;  %s2052_s24 = smov 12   ;;  %vm1182_vm0 = vcmask 9216   ;;  %vm1254_vm1 = vcmask 25616   ;;  %s2053_s1 = smov 14   ;;  %vm1308_vm2 = vcmask 42016  }
  0x29   :  { %358 = vmatpush.bf16.msra.mxu1 %v2189_v41  ;;  %371 = vmatpush.bf16.msra.mxu2 %v2193_v48  ;;  %2879 = vst [vmem:[#allocation13_spill] sm:$0xff] %v2234_v44  ;;  %vm1362_vm3 = vcmask 58416   ;;  %vm1416_vm4 = vcmask 74816   ;;  %vm1470_vm5 = vcmask 91216   ;;  %vm1524_vm6 = vcmask 107616  }
  0x2a   :  { %384 = vmatpush.bf16.msra.mxu3 %v2195_v49  ;;  %131 = vperm.xlu1 %1785, %v2089_v1   ;;  %2880 = vst [vmem:[#allocation14_spill] sm:$0xff] %v2249_v12  ;;  %vm1578_vm7 = vcmask 124016  }
  0x2c   :  { %346 = vmatpush.bf16.msra.mxu0 %v2204_v7 }
  0x2d   :  { %359 = vmatpush.bf16.msra.mxu1 %v2207_v13  ;;  %372 = vmatpush.bf16.msra.mxu2 %v2218_v24 }
  0x2e   :  { %385 = vmatpush.bf16.msra.mxu3 %v2226_v29 }
  0x30   :  { %435 = vmatpush.bf16.msrb.mxu0 %v2094_v6 }
  0x31   :  { %448 = vmatpush.bf16.msrb.mxu1 %v2096_v10  ;;  %461 = vmatpush.bf16.msrb.mxu2 %v2098_v11 }
  0x32   :  { %474 = vmatpush.bf16.msrb.mxu3 %v2101_v14 }
  0x34   :  { %436 = vmatpush.bf16.msrb.mxu0 %v2106_v18 }
  0x35   :  { %449 = vmatpush.bf16.msrb.mxu1 %v2108_v22  ;;  %462 = vmatpush.bf16.msrb.mxu2 %v2110_v23 }
  0x36   :  { %475 = vmatpush.bf16.msrb.mxu3 %v2113_v26 }
  0x38   :  { %437 = vmatpush.bf16.msrb.mxu0 %v2118_v30 }
  0x39   :  { %450 = vmatpush.bf16.msrb.mxu1 %v2120_v34  ;;  %463 = vmatpush.bf16.msrb.mxu2 %v2122_v35 }
  0x3a   :  { %476 = vmatpush.bf16.msrb.mxu3 %v2125_v38 }
  0x3c   :  { %438 = vmatpush.bf16.msrb.mxu0 %v2130_v42 }
  0x3d   :  { %451 = vmatpush.bf16.msrb.mxu1 %v2132_v46  ;;  %464 = vmatpush.bf16.msrb.mxu2 %v2134_v47 }
  0x3e   :  { %477 = vmatpush.bf16.msrb.mxu3 %v2142_v51 }
  0x40   :  { %439 = vmatpush.bf16.msrb.mxu0 %v2147_v55 }
  0x41   :  { %452 = vmatpush.bf16.msrb.mxu1 %v2155_v61  ;;  %465 = vmatpush.bf16.msrb.mxu2 %v2157_v62 }
  0x42   :  { %478 = vmatpush.bf16.msrb.mxu3 %v2163_v5 }
  0x44   :  { %440 = vmatpush.bf16.msrb.mxu0 %v2167_v9 }
  0x45   :  { %453 = vmatpush.bf16.msrb.mxu1 %v2175_v20  ;;  %466 = vmatpush.bf16.msrb.mxu2 %v2179_v31 }
  0x46   :  { %479 = vmatpush.bf16.msrb.mxu3 %v2181_v32 }
  0x48   :  { %441 = vmatpush.bf16.msrb.mxu0 %v2183_v33 }
  0x49   :  { %454 = vmatpush.bf16.msrb.mxu1 %v2189_v41  ;;  %467 = vmatpush.bf16.msrb.mxu2 %v2193_v48 }
  0x4a   :  { %480 = vmatpush.bf16.msrb.mxu3 %v2195_v49 }
  0x4c   :  { %442 = vmatpush.bf16.msrb.mxu0 %v2204_v7 }
  0x4d   :  { %455 = vmatpush.bf16.msrb.mxu1 %v2207_v13  ;;  %468 = vmatpush.bf16.msrb.mxu2 %v2218_v24 }
  0x4e   :  { %481 = vmatpush.bf16.msrb.mxu3 %v2226_v29 }
  0x80   :  { %v2169_v16 = vpop.permute.xlu0 %57 }
  0x81   :  { %v69_v25 = vmul.f32 %v2150_v59, %v2169_v16  ;;  %v70_v27 = vmul.f32 %v2153_v60, %v2169_v16  ;;  %v71_v36 = vmul.f32 %v2160_v4, %v2169_v16  ;;  %v72_v58 = vmul.f32 %v2210_v15, %v2169_v16 }
  0x89   :  { %v75_v50 = vpop.permute.xlu0 %74 }
  0x8a   :  { %v86_v37 = vmul.f32 %v2197_v56, %v75_v50  ;;  %v87_v39 = vmul.f32 %v2199_v57, %v75_v50  ;;  %v88_v43 = vmul.f32 %v2201_v3, %v75_v50  ;;  %v89_v45 = vmul.f32 %v2212_v19, %v75_v50 }
  0x8c   :  { %v90_v52 = vadd.f32 %v86_v37, %v69_v25  ;;  %v91_v53 = vadd.f32 %v87_v39, %v70_v27  ;;  %v92_v54 = vadd.f32 %v88_v43, %v71_v36  ;;  %v93_v25 = vadd.f32 %v89_v45, %v72_v58 }
  0x8e   :  { %v103_v63 = vadd.f32 %v2214_v21, %v90_v52  ;;  %v104_v8 = vadd.f32 %v2224_v28, %v91_v53  ;;  %v105_v27 = vadd.f32 %v2234_v44, %v92_v54  ;;  %v106_v16 = vadd.f32 %v2249_v12, %v93_v25 }
  0x90   :  { %1810 = vtanh.f32 %v103_v63 }
  0x91   :  { %1812 = vtanh.f32 %v104_v8 }
  0x92   :  { %1814 = vtanh.f32 %v105_v27 }
  0x93   :  { %1816 = vtanh.f32 %v106_v16  ;;  %v124_v16 = vpop.permute.xlu1 %123 }
  0x96   :  { %v1811_v40 = vpop.eup %1810 }
  0x97   :  { %v1813_v50 = vpop.eup %1812  ;;  %v111_v17 = vmul.f32 0.5, %v1811_v40 }
  0x98   :  { %v113_v36 = vmul.f32 0.5, %v1813_v50  ;;  %v1815_v39 = vpop.eup %1814  ;;  %v126_v50 = vmul.f32 %v124_v16, %v2150_v59 }
  0x99   :  { %v112_v37 = vadd.f32 0.5, %v111_v17  ;;  %v1817_v53 = vpop.eup %1816  ;;  %v127_v17 = vmul.f32 %v124_v16, %v2153_v60 }
  0x9a   :  { %v114_v43 = vadd.f32 0.5, %v113_v36  ;;  %v115_v58 = vmul.f32 0.5, %v1817_v53  ;;  %v129_v53 = vmul.f32 %v124_v16, %v2210_v15 }
  0x9b   :  { %v118_v45 = vmul.f32 %v1815_v39, %v112_v37 }
  0x9c   :  { %v117_v52 = vmul.f32 0.0, %v114_v43  ;;  %v116_v63 = vadd.f32 0.5, %v115_v58  ;;  %v132_v40 = vpop.permute.xlu1 %131 }
  0x9d   :  { %v134_v36 = vmul.f32 %v132_v40, %v2197_v56  ;;  %v135_v37 = vmul.f32 %v132_v40, %v2199_v57  ;;  %v137_v58 = vmul.f32 %v132_v40, %v2212_v19  ;;  %v2033_v57 = vmov 4  }
  0x9e   :  { %v2266_v54 = vadd.f32 %v118_v45, %v117_v52  ;;  %v128_v45 = vmul.f32 %v124_v16, %v2160_v4  ;;  %v136_v52 = vmul.f32 %v132_v40, %v2201_v3  ;;  %1786 = vset.pattern.permute.xlu2 %v2033_v57 }
  0x9f   :  { %v138_v39 = vadd.f32 %v134_v36, %v126_v50  ;;  %v139_v43 = vadd.f32 %v135_v37, %v127_v17  ;;  %v141_v50 = vadd.f32 %v137_v58, %v129_v53  ;;  %411 = vperm.xlu2 %1786, %v2089_v1  }
  0xa0   :  { %1818 = vtanh.f32 %v2266_v54  ;;  %v140_v56 = vadd.f32 %v136_v52, %v128_v45 }
  0xa1   :  { %v145_v40 = vadd.f32 %v141_v50, %v2249_v12 }
  0xa2   :  { %v144_v16 = vadd.f32 %v140_v56, %v2234_v44 }
  0xa6   :  { %v1819_v8 = vpop.eup %1818 }
  0xa7   :  { %v121_v25 = vmul.f32 %v1819_v8, %v116_v63  ;;  %v142_v63 = vadd.f32 %v138_v39, %v2214_v21  ;;  %v143_v8 = vadd.f32 %v139_v43, %v2224_v28 }
  0xa9   :  { %v146_v27 = vpack.c.bf16 %v121_v25, %v121_v25 }
  0xab   :  { %347 = vmatmul.bf16.vlgmr.msra.gmra.mxu0 %v146_v27  ;;  %360 = vmatmul.bf16.vlgmr.msra.gmra.mxu1 %v146_v27 }
  0xac   :  { %373 = vmatmul.bf16.vlgmr.msra.gmra.mxu2 %v146_v27  ;;  %386 = vmatmul.bf16.vlgmr.msra.gmra.mxu3 %v146_v27 }
  0xad   :  { %531 = vmatpush.bf16.msra.mxu0 %v2094_v6  ;;  %544 = vmatpush.bf16.msra.mxu1 %v2096_v10 }
  0xae   :  { %557 = vmatpush.bf16.msra.mxu2 %v2098_v11  ;;  %570 = vmatpush.bf16.msra.mxu3 %v2101_v14 }
  0xb1   :  { %532 = vmatpush.bf16.msra.mxu0 %v2106_v18  ;;  %545 = vmatpush.bf16.msra.mxu1 %v2108_v22 }
  0xb2   :  { %558 = vmatpush.bf16.msra.mxu2 %v2110_v23  ;;  %571 = vmatpush.bf16.msra.mxu3 %v2113_v26 }
  0xb5   :  { %533 = vmatpush.bf16.msra.mxu0 %v2118_v30  ;;  %546 = vmatpush.bf16.msra.mxu1 %v2120_v34 }
  0xb6   :  { %559 = vmatpush.bf16.msra.mxu2 %v2122_v35  ;;  %572 = vmatpush.bf16.msra.mxu3 %v2125_v38 }
  0xb9   :  { %534 = vmatpush.bf16.msra.mxu0 %v2130_v42  ;;  %547 = vmatpush.bf16.msra.mxu1 %v2132_v46 }
  0xba   :  { %560 = vmatpush.bf16.msra.mxu2 %v2134_v47  ;;  %573 = vmatpush.bf16.msra.mxu3 %v2142_v51 }
  0xbd   :  { %535 = vmatpush.bf16.msra.mxu0 %v2147_v55  ;;  %548 = vmatpush.bf16.msra.mxu1 %v2155_v61 }
  0xbe   :  { %561 = vmatpush.bf16.msra.mxu2 %v2157_v62  ;;  %574 = vmatpush.bf16.msra.mxu3 %v2163_v5 }
  0xc1   :  { %536 = vmatpush.bf16.msra.mxu0 %v2167_v9  ;;  %549 = vmatpush.bf16.msra.mxu1 %v2175_v20 }
  0xc2   :  { %562 = vmatpush.bf16.msra.mxu2 %v2179_v31  ;;  %575 = vmatpush.bf16.msra.mxu3 %v2181_v32 }
  0xc5   :  { %537 = vmatpush.bf16.msra.mxu0 %v2183_v33  ;;  %550 = vmatpush.bf16.msra.mxu1 %v2189_v41 }
  0xc6   :  { %563 = vmatpush.bf16.msra.mxu2 %v2193_v48  ;;  %576 = vmatpush.bf16.msra.mxu3 %v2195_v49 }
  0xc9   :  { %538 = vmatpush.bf16.msra.mxu0 %v2204_v7  ;;  %551 = vmatpush.bf16.msra.mxu1 %v2207_v13 }
  0xca   :  { %564 = vmatpush.bf16.msra.mxu2 %v2218_v24  ;;  %577 = vmatpush.bf16.msra.mxu3 %v2226_v29 }
 0x128   :  { %v348_v25 = vpop.f32.mrf.mxu0  ;;  %v361_v27 = vpop.f32.mrf.mxu1 }
 0x129   :  { %v391_v2 = vadd.f32 %v348_v25, %v142_v63  ;;  %v392_v0 = vadd.f32 %v361_v27, %v143_v8 }
 0x12b   :  { %1820 = vtanh.f32 %v391_v2  ;;  %v2034_v2 = vmov 5  }
 0x12c   :  { %1822 = vtanh.f32 %v392_v0  ;;  %1787 = vset.pattern.permute.xlu2 %v2034_v2 }
 0x12d   :  { %419 = vperm.xlu2 %1787, %v2089_v1  }
 0x12f   :  { %v374_v17 = vpop.f32.mrf.mxu2  ;;  %v387_v36 = vpop.f32.mrf.mxu3 }
 0x130   :  { %v393_v37 = vadd.f32 %v374_v17, %v144_v16  ;;  %v350_v39 = vpop.f32.mrf.mxu0  ;;  %v363_v43 = vpop.f32.mrf.mxu1  ;;  %v394_v63 = vadd.f32 %v387_v36, %v145_v40 }
 0x131   :  { %v1821_v28 = vpop.eup %1820 }
 0x132   :  { %v1823_v8 = vpop.eup %1822  ;;  %1824 = vtanh.f32 %v393_v37  ;;  %v399_v45 = vmul.f32 0.5, %v1821_v28 }
 0x133   :  { %v401_v57 = vmul.f32 0.5, %v1823_v8  ;;  %1826 = vtanh.f32 %v394_v63  ;;  %v2881_v8 = vld [vmem:[#allocation10_spill] sm:$0xff] }
 0x134   :  { %v400_v56 = vadd.f32 0.5, %v399_v45 }
 0x135   :  { %v402_v0 = vadd.f32 0.5, %v401_v57  ;;  %v2882_v57 = vld [vmem:[#allocation11_spill] sm:$0xff] }
 0x137   :  { %v376_v52 = vpop.f32.mrf.mxu2  ;;  %v389_v53 = vpop.f32.mrf.mxu3  ;;  %v405_v25 = vmul.f32 %v402_v0, %v2266_v54 }
 0x138   :  { %v1825_v58 = vpop.eup %1824  ;;  %v412_v54 = vpop.permute.xlu2 %411 }
 0x139   :  { %v406_v27 = vmul.f32 %v1825_v58, %v400_v56  ;;  %v1827_v50 = vpop.eup %1826  ;;  %v414_v43 = vmul.f32 %v412_v54, %v2150_v59  ;;  %v415_v63 = vmul.f32 %v412_v54, %v2153_v60  ;;  %v416_v52 = vmul.f32 %v412_v54, %v2160_v4 }
 0x13a   :  { %v403_v28 = vmul.f32 0.5, %v1827_v50  ;;  %v417_v58 = vmul.f32 %v412_v54, %v2210_v15  ;;  %v2883_v50 = vld [vmem:[#allocation12_spill] sm:$0xff]  ;;  %v2035_v59 = vmov 6  }
 0x13b   :  { %v2331_v16 = vadd.f32 %v406_v27, %v405_v25  ;;  %1788 = vset.pattern.permute.xlu1 %v2035_v59 }
 0x13c   :  { %v404_v17 = vadd.f32 0.5, %v403_v28  ;;  %507 = vperm.xlu1 %1788, %v2089_v1  }
 0x13d   :  { %1828 = vtanh.f32 %v2331_v16 }
 0x143   :  { %v1829_v40 = vpop.eup %1828 }
 0x144   :  { %v409_v36 = vmul.f32 %v1829_v40, %v404_v17 }
 0x146   :  { %v434_v37 = vpack.c.bf16 %v409_v36, %v409_v36 }
 0x148   :  { %443 = vmatmul.bf16.vlgmr.msrb.gmra.mxu0 %v434_v37  ;;  %456 = vmatmul.bf16.vlgmr.msrb.gmra.mxu1 %v434_v37 }
 0x149   :  { %469 = vmatmul.bf16.vlgmr.msrb.gmra.mxu2 %v434_v37  ;;  %482 = vmatmul.bf16.vlgmr.msrb.gmra.mxu3 %v434_v37 }
 0x14a   :  { %627 = vmatpush.bf16.msrb.mxu0 %v2094_v6  ;;  %640 = vmatpush.bf16.msrb.mxu1 %v2096_v10 }
 0x14b   :  { %653 = vmatpush.bf16.msrb.mxu2 %v2098_v11  ;;  %666 = vmatpush.bf16.msrb.mxu3 %v2101_v14 }
 0x14e   :  { %628 = vmatpush.bf16.msrb.mxu0 %v2106_v18  ;;  %641 = vmatpush.bf16.msrb.mxu1 %v2108_v22 }
 0x14f   :  { %654 = vmatpush.bf16.msrb.mxu2 %v2110_v23  ;;  %667 = vmatpush.bf16.msrb.mxu3 %v2113_v26 }
 0x152   :  { %629 = vmatpush.bf16.msrb.mxu0 %v2118_v30  ;;  %642 = vmatpush.bf16.msrb.mxu1 %v2120_v34 }
 0x153   :  { %655 = vmatpush.bf16.msrb.mxu2 %v2122_v35  ;;  %668 = vmatpush.bf16.msrb.mxu3 %v2125_v38 }
 0x156   :  { %630 = vmatpush.bf16.msrb.mxu0 %v2130_v42  ;;  %643 = vmatpush.bf16.msrb.mxu1 %v2132_v46 }
 0x157   :  { %656 = vmatpush.bf16.msrb.mxu2 %v2134_v47  ;;  %669 = vmatpush.bf16.msrb.mxu3 %v2142_v51 }
 0x15a   :  { %631 = vmatpush.bf16.msrb.mxu0 %v2147_v55  ;;  %644 = vmatpush.bf16.msrb.mxu1 %v2155_v61 }
 0x15b   :  { %657 = vmatpush.bf16.msrb.mxu2 %v2157_v62  ;;  %670 = vmatpush.bf16.msrb.mxu3 %v2163_v5 }
 0x15e   :  { %632 = vmatpush.bf16.msrb.mxu0 %v2167_v9  ;;  %645 = vmatpush.bf16.msrb.mxu1 %v2175_v20 }
 0x15f   :  { %658 = vmatpush.bf16.msrb.mxu2 %v2179_v31  ;;  %671 = vmatpush.bf16.msrb.mxu3 %v2181_v32 }
 0x162   :  { %633 = vmatpush.bf16.msrb.mxu0 %v2183_v33  ;;  %646 = vmatpush.bf16.msrb.mxu1 %v2189_v41 }
 0x163   :  { %659 = vmatpush.bf16.msrb.mxu2 %v2193_v48  ;;  %672 = vmatpush.bf16.msrb.mxu3 %v2195_v49 }
 0x166   :  { %634 = vmatpush.bf16.msrb.mxu0 %v2204_v7  ;;  %647 = vmatpush.bf16.msrb.mxu1 %v2207_v13 }
 0x167   :  { %660 = vmatpush.bf16.msrb.mxu2 %v2218_v24  ;;  %673 = vmatpush.bf16.msrb.mxu3 %v2226_v29 }
 0x187   :  { %v420_v39 = vpop.permute.xlu2 %419 }
 0x188   :  { %v422_v45 = vmul.f32 %v420_v39, %v2881_v8  ;;  %v423_v2 = vmul.f32 %v420_v39, %v2882_v57  ;;  %v424_v53 = vmul.f32 %v420_v39, %v2201_v3  ;;  %v425_v25 = vmul.f32 %v420_v39, %v2212_v19 }
 0x18a   :  { %v426_v0 = vadd.f32 %v422_v45, %v414_v43  ;;  %v427_v56 = vadd.f32 %v423_v2, %v415_v63  ;;  %v428_v60 = vadd.f32 %v424_v53, %v416_v52  ;;  %v2036_v43 = vmov 7  }
 0x18b   :  { %1789 = vset.pattern.permute.xlu2 %v2036_v43  ;;  %v429_v63 = vadd.f32 %v425_v25, %v417_v58 }
 0x18c   :  { %v430_v27 = vadd.f32 %v426_v0, %v2214_v21  ;;  %v431_v28 = vadd.f32 %v427_v56, %v2883_v50  ;;  %515 = vperm.xlu2 %1789, %v2089_v1   ;;  %v432_v54 = vadd.f32 %v428_v60, %v2234_v44 }
 0x18d   :  { %v433_v45 = vadd.f32 %v429_v63, %v2249_v12 }
 0x1c5   :  { %v444_v17 = vpop.f32.mrf.mxu0  ;;  %v457_v40 = vpop.f32.mrf.mxu1 }
 0x1c6   :  { %v487_v36 = vadd.f32 %v444_v17, %v430_v27  ;;  %v488_v37 = vadd.f32 %v457_v40, %v431_v28 }
 0x1c8   :  { %1830 = vtanh.f32 %v487_v36 }
 0x1c9   :  { %1832 = vtanh.f32 %v488_v37 }
 0x1cc   :  { %v470_v39 = vpop.f32.mrf.mxu2  ;;  %v483_v2 = vpop.f32.mrf.mxu3 }
 0x1cd   :  { %v489_v0 = vadd.f32 %v470_v39, %v432_v54  ;;  %v446_v56 = vpop.f32.mrf.mxu0  ;;  %v459_v52 = vpop.f32.mrf.mxu1  ;;  %v490_v59 = vadd.f32 %v483_v2, %v433_v45 }
 0x1ce   :  { %v1831_v53 = vpop.eup %1830  ;;  %v508_v56 = vpop.permute.xlu1 %507 }
 0x1cf   :  { %v1833_v27 = vpop.eup %1832  ;;  %1834 = vtanh.f32 %v489_v0  ;;  %v495_v28 = vmul.f32 0.5, %v1831_v53 }
 0x1d0   :  { %v497_v58 = vmul.f32 0.5, %v1833_v27  ;;  %1836 = vtanh.f32 %v490_v59  ;;  %v2884_v59 = vld [vmem:[#allocation8_spill] sm:$0xff] }
 0x1d1   :  { %v496_v17 = vadd.f32 0.5, %v495_v28  ;;  %v510_v27 = vmul.f32 %v508_v56, %v2884_v59  ;;  %v2885_v28 = vld [vmem:[#allocation9_spill] sm:$0xff] }
 0x1d2   :  { %v498_v25 = vadd.f32 0.5, %v497_v58  ;;  %v511_v58 = vmul.f32 %v508_v56, %v2885_v28  ;;  %v2037_v28 = vmov 9  }
 0x1d3   :  { %1791 = vset.pattern.permute.xlu1 %v2037_v28 }
 0x1d4   :  { %v472_v40 = vpop.f32.mrf.mxu2  ;;  %v485_v36 = vpop.f32.mrf.mxu3  ;;  %v501_v60 = vmul.f32 %v498_v25, %v2331_v16  ;;  %611 = vperm.xlu1 %1791, %v2089_v1  }
 0x1d5   :  { %v1835_v37 = vpop.eup %1834 }
 0x1d6   :  { %v502_v43 = vmul.f32 %v1835_v37, %v496_v17  ;;  %v1837_v63 = vpop.eup %1836 }
 0x1d7   :  { %v499_v54 = vmul.f32 0.5, %v1837_v63  ;;  %v513_v63 = vmul.f32 %v508_v56, %v2210_v15 }
 0x1d8   :  { %v2381_v12 = vadd.f32 %v502_v43, %v501_v60  ;;  %v512_v60 = vmul.f32 %v508_v56, %v2160_v4  ;;  %v2886_v56 = vld [vmem:[#allocation14_spill] sm:$0xff] }
 0x1d9   :  { %v500_v39 = vadd.f32 0.5, %v499_v54 }
 0x1da   :  { %1838 = vtanh.f32 %v2381_v12 }
 0x1e0   :  { %v1839_v45 = vpop.eup %1838 }
 0x1e1   :  { %v505_v2 = vmul.f32 %v1839_v45, %v500_v39 }
 0x1e3   :  { %v530_v0 = vpack.c.bf16 %v505_v2, %v505_v2 }
 0x1e5   :  { %539 = vmatmul.bf16.vlgmr.msra.gmra.mxu0 %v530_v0  ;;  %552 = vmatmul.bf16.vlgmr.msra.gmra.mxu1 %v530_v0 }
 0x1e6   :  { %565 = vmatmul.bf16.vlgmr.msra.gmra.mxu2 %v530_v0  ;;  %578 = vmatmul.bf16.vlgmr.msra.gmra.mxu3 %v530_v0  ;;  %v516_v16 = vpop.permute.xlu2 %515 }
 0x1e7   :  { %723 = vmatpush.bf16.msra.mxu0 %v2094_v6  ;;  %736 = vmatpush.bf16.msra.mxu1 %v2096_v10  ;;  %v518_v52 = vmul.f32 %v516_v16, %v2881_v8  ;;  %v519_v53 = vmul.f32 %v516_v16, %v2882_v57  ;;  %v520_v37 = vmul.f32 %v516_v16, %v2201_v3 }
 0x1e8   :  { %749 = vmatpush.bf16.msra.mxu2 %v2098_v11  ;;  %762 = vmatpush.bf16.msra.mxu3 %v2101_v14  ;;  %v521_v43 = vmul.f32 %v516_v16, %v2212_v19 }
 0x1e9   :  { %v522_v25 = vadd.f32 %v518_v52, %v510_v27  ;;  %v523_v17 = vadd.f32 %v519_v53, %v511_v58  ;;  %v524_v0 = vadd.f32 %v520_v37, %v512_v60  ;;  %v2038_v52 = vmov 8  }
 0x1ea   :  { %1790 = vset.pattern.permute.xlu0 %v2038_v52  ;;  %v525_v53 = vadd.f32 %v521_v43, %v513_v63 }
 0x1eb   :  { %724 = vmatpush.bf16.msra.mxu0 %v2106_v18  ;;  %737 = vmatpush.bf16.msra.mxu1 %v2108_v22  ;;  %v526_v40 = vadd.f32 %v522_v25, %v2214_v21  ;;  %v527_v36 = vadd.f32 %v523_v17, %v2883_v50  ;;  %v528_v16 = vadd.f32 %v524_v0, %v2234_v44 }
 0x1ec   :  { %750 = vmatpush.bf16.msra.mxu2 %v2110_v23  ;;  %763 = vmatpush.bf16.msra.mxu3 %v2113_v26  ;;  %v529_v58 = vadd.f32 %v525_v53, %v2886_v56 }
 0x1ed   :  { %603 = vperm.xlu0 %1790, %v2089_v1  }
 0x1ef   :  { %725 = vmatpush.bf16.msra.mxu0 %v2118_v30  ;;  %738 = vmatpush.bf16.msra.mxu1 %v2120_v34 }
 0x1f0   :  { %751 = vmatpush.bf16.msra.mxu2 %v2122_v35  ;;  %764 = vmatpush.bf16.msra.mxu3 %v2125_v38 }
 0x1f3   :  { %726 = vmatpush.bf16.msra.mxu0 %v2130_v42  ;;  %739 = vmatpush.bf16.msra.mxu1 %v2132_v46 }
 0x1f4   :  { %752 = vmatpush.bf16.msra.mxu2 %v2134_v47  ;;  %765 = vmatpush.bf16.msra.mxu3 %v2142_v51 }
 0x1f7   :  { %727 = vmatpush.bf16.msra.mxu0 %v2147_v55  ;;  %740 = vmatpush.bf16.msra.mxu1 %v2155_v61 }
 0x1f8   :  { %753 = vmatpush.bf16.msra.mxu2 %v2157_v62  ;;  %766 = vmatpush.bf16.msra.mxu3 %v2163_v5 }
 0x1fb   :  { %728 = vmatpush.bf16.msra.mxu0 %v2167_v9  ;;  %741 = vmatpush.bf16.msra.mxu1 %v2175_v20 }
 0x1fc   :  { %754 = vmatpush.bf16.msra.mxu2 %v2179_v31  ;;  %767 = vmatpush.bf16.msra.mxu3 %v2181_v32 }
 0x1ff   :  { %729 = vmatpush.bf16.msra.mxu0 %v2183_v33  ;;  %742 = vmatpush.bf16.msra.mxu1 %v2189_v41 }
 0x200   :  { %755 = vmatpush.bf16.msra.mxu2 %v2193_v48  ;;  %768 = vmatpush.bf16.msra.mxu3 %v2195_v49 }
 0x203   :  { %730 = vmatpush.bf16.msra.mxu0 %v2204_v7  ;;  %743 = vmatpush.bf16.msra.mxu1 %v2207_v13 }
 0x204   :  { %756 = vmatpush.bf16.msra.mxu2 %v2218_v24  ;;  %769 = vmatpush.bf16.msra.mxu3 %v2226_v29 }
 0x262   :  { %v540_v54 = vpop.f32.mrf.mxu0  ;;  %v553_v39 = vpop.f32.mrf.mxu1 }
 0x263   :  { %v583_v45 = vadd.f32 %v540_v54, %v526_v40  ;;  %v584_v2 = vadd.f32 %v553_v39, %v527_v36 }
 0x265   :  { %1840 = vtanh.f32 %v583_v45 }
 0x266   :  { %1842 = vtanh.f32 %v584_v2 }
 0x269   :  { %v566_v27 = vpop.f32.mrf.mxu2  ;;  %v579_v25 = vpop.f32.mrf.mxu3 }
 0x26a   :  { %v585_v17 = vadd.f32 %v566_v27, %v528_v16  ;;  %v542_v40 = vpop.f32.mrf.mxu0  ;;  %v555_v36 = vpop.f32.mrf.mxu1  ;;  %v586_v28 = vadd.f32 %v579_v25, %v529_v58 }
 0x26b   :  { %v1841_v37 = vpop.eup %1840  ;;  %v604_v40 = vpop.permute.xlu0 %603 }
 0x26c   :  { %v1843_v60 = vpop.eup %1842  ;;  %1844 = vtanh.f32 %v585_v17  ;;  %v591_v54 = vmul.f32 0.5, %v1841_v37 }
 0x26d   :  { %v593_v43 = vmul.f32 0.5, %v1843_v60  ;;  %1846 = vtanh.f32 %v586_v28  ;;  %v606_v28 = vmul.f32 %v604_v40, %v2884_v59  ;;  %v2887_v60 = vld [vmem:[#allocation9_spill] sm:$0xff] }
 0x26e   :  { %v592_v39 = vadd.f32 0.5, %v591_v54  ;;  %v607_v54 = vmul.f32 %v604_v40, %v2887_v60 }
 0x26f   :  { %v594_v63 = vadd.f32 0.5, %v593_v43 }
 0x271   :  { %v568_v1 = vpop.f32.mrf.mxu2  ;;  %v581_v45 = vpop.f32.mrf.mxu3  ;;  %v597_v0 = vmul.f32 %v594_v63, %v2381_v12 }
 0x272   :  { %v1845_v2 = vpop.eup %1844  ;;  %v612_v12 = vpop.permute.xlu1 %611 }
 0x273   :  { %v598_v52 = vmul.f32 %v1845_v2, %v592_v39  ;;  %v1847_v53 = vpop.eup %1846  ;;  %v614_v36 = vmul.f32 %v612_v12, %v2881_v8  ;;  %v615_v37 = vmul.f32 %v612_v12, %v2882_v57  ;;  %v616_v45 = vmul.f32 %v612_v12, %v2201_v3 }
 0x274   :  { %v595_v16 = vmul.f32 0.5, %v1847_v53  ;;  %v608_v2 = vmul.f32 %v604_v40, %v2160_v4 }
 0x275   :  { %v2431_v56 = vadd.f32 %v598_v52, %v597_v0  ;;  %v618_v43 = vadd.f32 %v614_v36, %v606_v28  ;;  %v619_v63 = vadd.f32 %v615_v37, %v607_v54  ;;  %v617_v0 = vmul.f32 %v612_v12, %v2212_v19  ;;  %v2479_v28 = vld [vmem:[%s2849_s0] sm:$0x3]  ;;  %v2889_v54 = vld [vmem:[#allocation14_spill] sm:$0xff] }
 0x276   :  { %v596_v27 = vadd.f32 0.5, %v595_v16  ;;  %v609_v52 = vmul.f32 %v604_v40, %v2210_v15  ;;  %v2040_v36 = vmov 10   ;;  %2888 = vst [vmem:[#allocation10_spill] sm:$0xff] %v2479_v28 }
 0x277   :  { %1848 = vtanh.f32 %v2431_v56  ;;  %v622_v39 = vadd.f32 %v618_v43, %v2214_v21  ;;  %v623_v1 = vadd.f32 %v619_v63, %v2883_v50  ;;  %1792 = vset.pattern.permute.xlu2 %v2040_v36 }
 0x278   :  { %v621_v37 = vadd.f32 %v617_v0, %v609_v52  ;;  %699 = vperm.xlu2 %1792, %v2479_v28  }
 0x27a   :  { %v625_v43 = vadd.f32 %v621_v37, %v2889_v54 }
 0x27d   :  { %v1849_v58 = vpop.eup %1848 }
 0x27e   :  { %v601_v25 = vmul.f32 %v1849_v58, %v596_v27 }
 0x280   :  { %v626_v17 = vpack.c.bf16 %v601_v25, %v601_v25  ;;  %v620_v25 = vadd.f32 %v616_v45, %v608_v2 }
 0x282   :  { %635 = vmatmul.bf16.vlgmr.msrb.gmra.mxu0 %v626_v17  ;;  %648 = vmatmul.bf16.vlgmr.msrb.gmra.mxu1 %v626_v17  ;;  %v624_v12 = vadd.f32 %v620_v25, %v2234_v44 }
 0x283   :  { %661 = vmatmul.bf16.vlgmr.msrb.gmra.mxu2 %v626_v17  ;;  %674 = vmatmul.bf16.vlgmr.msrb.gmra.mxu3 %v626_v17  ;;  %v2039_v17 = vmov 11  }
 0x284   :  { %819 = vmatpush.bf16.msrb.mxu0 %v2094_v6  ;;  %832 = vmatpush.bf16.msrb.mxu1 %v2096_v10 }
 0x285   :  { %845 = vmatpush.bf16.msrb.mxu2 %v2098_v11  ;;  %858 = vmatpush.bf16.msrb.mxu3 %v2101_v14 }
 0x286   :  { %1793 = vset.pattern.permute.xlu1 %v2039_v17 }
 0x287   :  { %707 = vperm.xlu1 %1793, %v2479_v28  }
 0x288   :  { %820 = vmatpush.bf16.msrb.mxu0 %v2106_v18  ;;  %833 = vmatpush.bf16.msrb.mxu1 %v2108_v22 }
 0x289   :  { %846 = vmatpush.bf16.msrb.mxu2 %v2110_v23  ;;  %859 = vmatpush.bf16.msrb.mxu3 %v2113_v26 }
 0x28c   :  { %821 = vmatpush.bf16.msrb.mxu0 %v2118_v30  ;;  %834 = vmatpush.bf16.msrb.mxu1 %v2120_v34 }
 0x28d   :  { %847 = vmatpush.bf16.msrb.mxu2 %v2122_v35  ;;  %860 = vmatpush.bf16.msrb.mxu3 %v2125_v38 }
 0x290   :  { %822 = vmatpush.bf16.msrb.mxu0 %v2130_v42  ;;  %835 = vmatpush.bf16.msrb.mxu1 %v2132_v46 }
 0x291   :  { %848 = vmatpush.bf16.msrb.mxu2 %v2134_v47  ;;  %861 = vmatpush.bf16.msrb.mxu3 %v2142_v51 }
 0x294   :  { %823 = vmatpush.bf16.msrb.mxu0 %v2147_v55  ;;  %836 = vmatpush.bf16.msrb.mxu1 %v2155_v61 }
 0x295   :  { %849 = vmatpush.bf16.msrb.mxu2 %v2157_v62  ;;  %862 = vmatpush.bf16.msrb.mxu3 %v2163_v5 }
 0x298   :  { %824 = vmatpush.bf16.msrb.mxu0 %v2167_v9  ;;  %837 = vmatpush.bf16.msrb.mxu1 %v2175_v20 }
 0x299   :  { %850 = vmatpush.bf16.msrb.mxu2 %v2179_v31  ;;  %863 = vmatpush.bf16.msrb.mxu3 %v2181_v32 }
 0x29c   :  { %825 = vmatpush.bf16.msrb.mxu0 %v2183_v33  ;;  %838 = vmatpush.bf16.msrb.mxu1 %v2189_v41 }
 0x29d   :  { %851 = vmatpush.bf16.msrb.mxu2 %v2193_v48  ;;  %864 = vmatpush.bf16.msrb.mxu3 %v2195_v49 }
 0x2a0   :  { %826 = vmatpush.bf16.msrb.mxu0 %v2204_v7  ;;  %839 = vmatpush.bf16.msrb.mxu1 %v2207_v13 }
 0x2a1   :  { %852 = vmatpush.bf16.msrb.mxu2 %v2218_v24  ;;  %865 = vmatpush.bf16.msrb.mxu3 %v2226_v29 }
 0x2ff   :  { %v636_v53 = vpop.f32.mrf.mxu0  ;;  %v649_v16 = vpop.f32.mrf.mxu1 }
 0x300   :  { %v679_v27 = vadd.f32 %v636_v53, %v622_v39  ;;  %v680_v58 = vadd.f32 %v649_v16, %v623_v1 }
 0x302   :  { %1850 = vtanh.f32 %v679_v27 }
 0x303   :  { %1852 = vtanh.f32 %v680_v58 }
 0x306   :  { %v662_v40 = vpop.f32.mrf.mxu2  ;;  %v675_v63 = vpop.f32.mrf.mxu3 }
 0x307   :  { %v681_v39 = vadd.f32 %v662_v40, %v624_v12  ;;  %v638_v1 = vpop.f32.mrf.mxu0  ;;  %v651_v45 = vpop.f32.mrf.mxu1  ;;  %v682_v0 = vadd.f32 %v675_v63, %v625_v43 }
 0x308   :  { %v1851_v2 = vpop.eup %1850 }
 0x309   :  { %v1853_v52 = vpop.eup %1852  ;;  %1854 = vtanh.f32 %v681_v39  ;;  %v687_v53 = vmul.f32 0.5, %v1851_v2  ;;  %v2893_v2 = vmov 0  }
 0x30a   :  { %v689_v16 = vmul.f32 0.5, %v1853_v52  ;;  %1856 = vtanh.f32 %v682_v0 }
 0x30b   :  { %v688_v17 = vadd.f32 0.5, %v687_v53 }
 0x30c   :  { %v690_v27 = vadd.f32 0.5, %v689_v16 }
 0x30e   :  { %v664_v36 = vpop.f32.mrf.mxu2  ;;  %v677_v58 = vpop.f32.mrf.mxu3  ;;  %v693_v25 = vmul.f32 %v690_v27, %v2431_v56 }
 0x30f   :  { %v1855_v28 = vpop.eup %1854 }
 0x310   :  { %v694_v44 = vmul.f32 %v1855_v28, %v688_v17  ;;  %v1857_v37 = vpop.eup %1856 }
 0x311   :  { %v691_v12 = vmul.f32 0.5, %v1857_v37 }
 0x312   :  { %v2486_v54 = vadd.f32 %v694_v44, %v693_v25 }
 0x313   :  { %v692_v40 = vadd.f32 0.5, %v691_v12 }
 0x314   :  { %1858 = vtanh.f32 %v2486_v54 }
 0x31a   :  { %v1859_v43 = vpop.eup %1858 }
 0x31b   :  { %v697_v63 = vmul.f32 %v1859_v43, %v692_v40 }
 0x31d   :  { %v722_v39 = vpack.c.bf16 %v697_v63, %v697_v63 }
 0x31f   :  { %731 = vmatmul.bf16.vlgmr.msra.gmra.mxu0 %v722_v39  ;;  %744 = vmatmul.bf16.vlgmr.msra.gmra.mxu1 %v722_v39 }
 0x320   :  { %757 = vmatmul.bf16.vlgmr.msra.gmra.mxu2 %v722_v39  ;;  %770 = vmatmul.bf16.vlgmr.msra.gmra.mxu3 %v722_v39 }
 0x321   :  { %915 = vmatpush.bf16.msra.mxu0 %v2094_v6  ;;  %928 = vmatpush.bf16.msra.mxu1 %v2096_v10  ;;  %v700_v6 = vpop.permute.xlu2 %699  ;;  %v708_v10 = vpop.permute.xlu1 %707 }
 0x322   :  { %941 = vmatpush.bf16.msra.mxu2 %v2098_v11  ;;  %954 = vmatpush.bf16.msra.mxu3 %v2101_v14  ;;  %v702_v11 = vmul.f32 %v700_v6, %v2884_v59  ;;  %v703_v14 = vmul.f32 %v700_v6, %v2887_v60 }
 0x325   :  { %916 = vmatpush.bf16.msra.mxu0 %v2106_v18  ;;  %929 = vmatpush.bf16.msra.mxu1 %v2108_v22  ;;  %v710_v18 = vmul.f32 %v708_v10, %v2881_v8  ;;  %v711_v22 = vmul.f32 %v708_v10, %v2882_v57 }
 0x326   :  { %942 = vmatpush.bf16.msra.mxu2 %v2110_v23  ;;  %955 = vmatpush.bf16.msra.mxu3 %v2113_v26 }
 0x327   :  { %v714_v23 = vadd.f32 %v710_v18, %v702_v11  ;;  %v715_v26 = vadd.f32 %v711_v22, %v703_v14 }
 0x329   :  { %917 = vmatpush.bf16.msra.mxu0 %v2118_v30  ;;  %930 = vmatpush.bf16.msra.mxu1 %v2120_v34  ;;  %v718_v30 = vadd.f32 %v714_v23, %v2214_v21  ;;  %v719_v34 = vadd.f32 %v715_v26, %v2883_v50 }
 0x32a   :  { %943 = vmatpush.bf16.msra.mxu2 %v2122_v35  ;;  %956 = vmatpush.bf16.msra.mxu3 %v2125_v38  ;;  %v704_v35 = vmul.f32 %v700_v6, %v2160_v4  ;;  %v712_v38 = vmul.f32 %v708_v10, %v2201_v3 }
 0x32d   :  { %918 = vmatpush.bf16.msra.mxu0 %v2130_v42  ;;  %931 = vmatpush.bf16.msra.mxu1 %v2132_v46  ;;  %v705_v42 = vmul.f32 %v700_v6, %v2210_v15  ;;  %v713_v46 = vmul.f32 %v708_v10, %v2212_v19 }
 0x32e   :  { %944 = vmatpush.bf16.msra.mxu2 %v2134_v47  ;;  %957 = vmatpush.bf16.msra.mxu3 %v2142_v51 }
 0x331   :  { %919 = vmatpush.bf16.msra.mxu0 %v2147_v55  ;;  %932 = vmatpush.bf16.msra.mxu1 %v2155_v61 }
 0x332   :  { %945 = vmatpush.bf16.msra.mxu2 %v2157_v62  ;;  %958 = vmatpush.bf16.msra.mxu3 %v2163_v5  ;;  %v716_v62 = vadd.f32 %v712_v38, %v704_v35  ;;  %v2041_v5 = vmov 13  }
 0x333   :  { %1795 = vset.pattern.permute.xlu0 %v2041_v5 }
 0x335   :  { %920 = vmatpush.bf16.msra.mxu0 %v2167_v9  ;;  %933 = vmatpush.bf16.msra.mxu1 %v2175_v20  ;;  %v2042_v9 = vmov 12   ;;  %v717_v20 = vadd.f32 %v713_v46, %v705_v42 }
 0x336   :  { %946 = vmatpush.bf16.msra.mxu2 %v2179_v31  ;;  %959 = vmatpush.bf16.msra.mxu3 %v2181_v32  ;;  %v2890_v31 = vld [vmem:[#allocation10_spill] sm:$0xff]  ;;  %v2891_v32 = vld [vmem:[#allocation13_spill] sm:$0xff] }
 0x337   :  { %1794 = vset.pattern.permute.xlu2 %v2042_v9  ;;  %803 = vperm.xlu0 %1795, %v2890_v31  }
 0x338   :  { %795 = vperm.xlu2 %1794, %v2890_v31  }
 0x339   :  { %921 = vmatpush.bf16.msra.mxu0 %v2183_v33  ;;  %934 = vmatpush.bf16.msra.mxu1 %v2189_v41  ;;  %v720_v33 = vadd.f32 %v716_v62, %v2891_v32  ;;  %v2044_v62 = vmov 15  }
 0x33a   :  { %947 = vmatpush.bf16.msra.mxu2 %v2193_v48  ;;  %960 = vmatpush.bf16.msra.mxu3 %v2195_v49  ;;  %v2892_v48 = vld [vmem:[#allocation14_spill] sm:$0xff] }
 0x33b   :  { %v721_v49 = vadd.f32 %v717_v20, %v2892_v48 }
 0x33d   :  { %922 = vmatpush.bf16.msra.mxu0 %v2204_v7  ;;  %935 = vmatpush.bf16.msra.mxu1 %v2207_v13 }
 0x33e   :  { %948 = vmatpush.bf16.msra.mxu2 %v2218_v24  ;;  %961 = vmatpush.bf16.msra.mxu3 %v2226_v29 }
 0x33f   :  { %1800 = vset.pattern.permute.xlu0 %v2893_v2 }
 0x340   :  { %1797 = vset.pattern.permute.xlu2 %v2044_v62  ;;  %v1028_v62 = vld [vmem:[#allocation4 + $0x150] sm:$0xff] }
 0x341   :  { %899 = vperm.xlu2 %1797, %v2890_v31  }
 0x392   :  { %v796_v39 = vpop.permute.xlu2 %795 }
 0x393   :  { %v798_v10 = vmul.f32 %v796_v39, %v2884_v59  ;;  %v799_v11 = vmul.f32 %v796_v39, %v2887_v60  ;;  %v801_v35 = vmul.f32 %v796_v39, %v2210_v15 }
 0x39c   :  { %v732_v47 = vpop.f32.mrf.mxu0  ;;  %v745_v51 = vpop.f32.mrf.mxu1 }
 0x39d   :  { %v775_v55 = vadd.f32 %v732_v47, %v718_v30  ;;  %v776_v61 = vadd.f32 %v745_v51, %v719_v34  ;;  %v800_v30 = vmul.f32 %v796_v39, %v2160_v4  ;;  %v1047_v39 = vld [vmem:[#allocation4 + $0x1e8] sm:$0xff] }
 0x39f   :  { %1860 = vtanh.f32 %v775_v55 }
 0x3a0   :  { %1862 = vtanh.f32 %v776_v61  ;;  %v2043_v61 = vmov 14  }
 0x3a1   :  { %1796 = vset.pattern.permute.xlu1 %v2043_v61  ;;  %v1027_v61 = vld [vmem:[#allocation4 + $0x148] sm:$0xff] }
 0x3a2   :  { %891 = vperm.xlu1 %1796, %v2890_v31  }
 0x3a3   :  { %v758_v41 = vpop.f32.mrf.mxu2  ;;  %v771_v7 = vpop.f32.mrf.mxu3 }
 0x3a4   :  { %v777_v13 = vadd.f32 %v758_v41, %v720_v33  ;;  %v734_v24 = vpop.f32.mrf.mxu0  ;;  %v747_v29 = vpop.f32.mrf.mxu1  ;;  %v778_v56 = vadd.f32 %v771_v7, %v721_v49 }
 0x3a5   :  { %v1861_v44 = vpop.eup %1860 }
 0x3a6   :  { %v1863_v28 = vpop.eup %1862  ;;  %1864 = vtanh.f32 %v777_v13  ;;  %v783_v1 = vmul.f32 0.5, %v1861_v44 }
 0x3a7   :  { %v785_v45 = vmul.f32 0.5, %v1863_v28  ;;  %1866 = vtanh.f32 %v778_v56 }
 0x3a8   :  { %v784_v52 = vadd.f32 0.5, %v783_v1  ;;  %v2894_v1 = vmov 1  }
 0x3a9   :  { %v786_v0 = vadd.f32 0.5, %v785_v45  ;;  %v804_v6 = vpop.permute.xlu0 %803  ;;  %1799 = vset.pattern.permute.xlu2 %v2894_v1 }
 0x3aa   :  { %v807_v14 = vmul.f32 %v804_v6, %v2882_v57  ;;  %v808_v34 = vmul.f32 %v804_v6, %v2201_v3  ;;  %v809_v38 = vmul.f32 %v804_v6, %v2212_v19  ;;  %1798 = vset.pattern.permute.xlu1 %v2893_v2 }
 0x3ab   :  { %v760_v53 = vpop.f32.mrf.mxu2  ;;  %v773_v16 = vpop.f32.mrf.mxu3  ;;  %v789_v17 = vmul.f32 %v786_v0, %v2486_v54  ;;  %v806_v54 = vmul.f32 %v804_v6, %v2881_v8  ;;  %v1048_v6 = vld [vmem:[#allocation4 + $0x1f0] sm:$0xff] }
 0x3ac   :  { %v1865_v27 = vpop.eup %1864  ;;  %v811_v22 = vadd.f32 %v807_v14, %v799_v11  ;;  %v812_v55 = vadd.f32 %v808_v34, %v800_v30  ;;  %v813_v5 = vadd.f32 %v809_v38, %v801_v35  ;;  %v1043_v11 = vld [vmem:[#allocation4 + $0x1c8] sm:$0xff]  ;;  %v1045_v14 = vld [vmem:[#allocation4 + $0x1d8] sm:$0xff]  ;;  %v1034_v30 = vld [vmem:[#allocation4 + $0x180] sm:$0xff] }
 0x3ad   :  { %v790_v36 = vmul.f32 %v1865_v27, %v784_v52  ;;  %v1867_v58 = vpop.eup %1866  ;;  %v810_v18 = vadd.f32 %v806_v54, %v798_v10  ;;  %v1042_v10 = vld [vmem:[#allocation4 + $0x1c0] sm:$0xff]  ;;  %v1044_v54 = vld [vmem:[#allocation4 + $0x1d0] sm:$0xff]  ;;  %v1035_v34 = vld [vmem:[#allocation4 + $0x188] sm:$0xff] }
 0x3ae   :  { %v787_v37 = vmul.f32 0.5, %v1867_v58  ;;  %v815_v26 = vadd.f32 %v811_v22, %v2883_v50  ;;  %v816_v9 = vadd.f32 %v812_v55, %v2891_v32  ;;  %v817_v33 = vadd.f32 %v813_v5, %v2892_v48  ;;  %v1039_v22 = vld [vmem:[#allocation4 + $0x1a8] sm:$0xff]  ;;  %v1036_v35 = vld [vmem:[#allocation4 + $0x190] sm:$0xff]  ;;  %v1037_v38 = vld [vmem:[#allocation4 + $0x198] sm:$0xff] }
 0x3af   :  { %v791_v25 = vadd.f32 %v790_v36, %v789_v17  ;;  %v814_v23 = vadd.f32 %v810_v18, %v2214_v21  ;;  %v1038_v18 = vld [vmem:[#allocation4 + $0x1a0] sm:$0xff]  ;;  %v1029_v5 = vld [vmem:[#allocation4 + $0x158] sm:$0xff] }
 0x3b0   :  { %v788_v12 = vadd.f32 0.5, %v787_v37  ;;  %v1026_v55 = vld [vmem:[#allocation4 + $0x140] sm:$0xff] }
 0x3b1   :  { %1868 = vtanh.f32 %v791_v25 }
 0x3b7   :  { %v1869_v40 = vpop.eup %1868 }
 0x3b8   :  { %v793_v43 = vmul.f32 %v1869_v40, %v788_v12 }
 0x3ba   :  { %v818_v63 = vpack.c.bf16 %v793_v43, %v793_v43 }
 0x3bc   :  { %827 = vmatmul.bf16.vlgmr.msrb.gmra.mxu0 %v818_v63  ;;  %840 = vmatmul.bf16.vlgmr.msrb.gmra.mxu1 %v818_v63 }
 0x3bd   :  { %853 = vmatmul.bf16.vlgmr.msrb.gmra.mxu2 %v818_v63  ;;  %866 = vmatmul.bf16.vlgmr.msrb.gmra.mxu3 %v818_v63  ;;  %v1046_v63 = vld [vmem:[#allocation4 + $0x1e0] sm:$0xff] }
 0x3be   :  { %1061 = vmatpush.msrb.mxu0 %v1046_v63  ;;  %1081 = vmatpush.msrb.mxu1 %v1047_v39  ;;  %v1002_v39 = vld [vmem:[#allocation4 + $0x80] sm:$0xff] }
 0x3bf   :  { %1101 = vmatpush.msrb.mxu2 %v1048_v6  ;;  %v1003_v6 = vld [vmem:[#allocation4 + $0x88] sm:$0xff] }
 0x3c0   :  { %1062 = vmatpush.msrb.mxu0 %v1042_v10  ;;  %1082 = vmatpush.msrb.mxu1 %v1043_v11  ;;  %v998_v10 = vld [vmem:[#allocation4 + $0x60] sm:$0xff]  ;;  %v999_v11 = vld [vmem:[#allocation4 + $0x68] sm:$0xff] }
 0x3c1   :  { %1102 = vmatpush.msrb.mxu2 %v1044_v54  ;;  %v1000_v54 = vld [vmem:[#allocation4 + $0x70] sm:$0xff] }
 0x3c2   :  { %1063 = vmatpush.msrb.mxu0 %v1038_v18  ;;  %1083 = vmatpush.msrb.mxu1 %v1039_v22  ;;  %v995_v18 = vld [vmem:[#allocation4 + $0x48] sm:$0xff]  ;;  %v996_v22 = vld [vmem:[#allocation4 + $0x50] sm:$0xff] }
 0x3c4   :  { %1064 = vmatpush.msrb.mxu0 %v1034_v30  ;;  %1084 = vmatpush.msrb.mxu1 %v1035_v34  ;;  %v991_v30 = vld [vmem:[#allocation4 + $0x28] sm:$0xff]  ;;  %v992_v34 = vld [vmem:[#allocation4 + $0x30] sm:$0xff] }
 0x439   :  { %v828_v42 = vpop.f32.mrf.mxu0  ;;  %v841_v46 = vpop.f32.mrf.mxu1 }
 0x43a   :  { %v871_v47 = vadd.f32 %v828_v42, %v814_v23  ;;  %v872_v51 = vadd.f32 %v841_v46, %v815_v26  ;;  %v1040_v23 = vld [vmem:[#allocation4 + $0x1b0] sm:$0xff]  ;;  %v1041_v26 = vld [vmem:[#allocation4 + $0x1b8] sm:$0xff]  ;;  %v1030_v42 = vld [vmem:[#allocation4 + $0x160] sm:$0xff] }
 0x43b   :  { %1103 = vmatpush.msrb.mxu2 %v1040_v23  ;;  %v1031_v46 = vld [vmem:[#allocation4 + $0x168] sm:$0xff]  ;;  %1065 = vmatpush.msrb.mxu0 %v1030_v42  ;;  %v997_v23 = vld [vmem:[#allocation4 + $0x58] sm:$0xff] }
 0x43c   :  { %1870 = vtanh.f32 %v871_v47  ;;  %v1032_v47 = vld [vmem:[#allocation4 + $0x170] sm:$0xff]  ;;  %1085 = vmatpush.msrb.mxu1 %v1031_v46  ;;  %v987_v42 = vld [vmem:[#allocation4 + $0x8] sm:$0xff] }
 0x43d   :  { %1872 = vtanh.f32 %v872_v51  ;;  %1104 = vmatpush.msrb.mxu2 %v1036_v35  ;;  %v1033_v51 = vld [vmem:[#allocation4 + $0x178] sm:$0xff]  ;;  %1066 = vmatpush.msrb.mxu0 %v1026_v55 }
 0x43e   :  { %1086 = vmatpush.msrb.mxu1 %v1027_v61  ;;  %v993_v35 = vld [vmem:[#allocation4 + $0x38] sm:$0xff] }
 0x43f   :  { %1105 = vmatpush.msrb.mxu2 %v1032_v47  ;;  %v989_v55 = vld [vmem:[#allocation4 + $0x18] sm:$0xff] }
 0x440   :  { %v854_v20 = vpop.f32.mrf.mxu2  ;;  %v867_v41 = vpop.f32.mrf.mxu3 }
 0x441   :  { %v873_v49 = vadd.f32 %v854_v20, %v816_v9  ;;  %v830_v7 = vpop.f32.mrf.mxu0  ;;  %v843_v13 = vpop.f32.mrf.mxu1  ;;  %v874_v29 = vadd.f32 %v867_v41, %v817_v33  ;;  %1106 = vmatpush.msrb.mxu2 %v1028_v62  ;;  %v1022_v9 = vld [vmem:[#allocation4 + $0x120] sm:$0xff]  ;;  %v1023_v20 = vld [vmem:[#allocation4 + $0x128] sm:$0xff]  ;;  %v1024_v33 = vld [vmem:[#allocation4 + $0x130] sm:$0xff] }
 0x442   :  { %v1871_v24 = vpop.eup %1870  ;;  %1067 = vmatpush.msrb.mxu0 %v1022_v9  ;;  %1087 = vmatpush.msrb.mxu1 %v1023_v20  ;;  %v1025_v41 = vld [vmem:[#allocation4 + $0x138] sm:$0xff]  ;;  %v1019_v7 = vld [vmem:[#allocation4 + $0x108] sm:$0xff]  ;;  %v1020_v13 = vld [vmem:[#allocation4 + $0x110] sm:$0xff] }
 0x443   :  { %v1873_v44 = vpop.eup %1872  ;;  %1874 = vtanh.f32 %v873_v49  ;;  %v879_v56 = vmul.f32 0.5, %v1871_v24  ;;  %1107 = vmatpush.msrb.mxu2 %v1024_v33  ;;  %v1018_v49 = vld [vmem:[#allocation4 + $0x100] sm:$0xff]  ;;  %v1021_v24 = vld [vmem:[#allocation4 + $0x118] sm:$0xff] }
 0x444   :  { %v881_v28 = vmul.f32 0.5, %v1873_v44  ;;  %1876 = vtanh.f32 %v874_v29  ;;  %1068 = vmatpush.msrb.mxu0 %v1018_v49  ;;  %1088 = vmatpush.msrb.mxu1 %v1019_v7  ;;  %v1014_v29 = vld [vmem:[#allocation4 + $0xe0] sm:$0xff]  ;;  %v1015_v44 = vld [vmem:[#allocation4 + $0xe8] sm:$0xff] }
 0x445   :  { %v880_v45 = vadd.f32 0.5, %v879_v56  ;;  %1108 = vmatpush.msrb.mxu2 %v1020_v13  ;;  %v1016_v56 = vld [vmem:[#allocation4 + $0xf0] sm:$0xff] }
 0x446   :  { %v882_v31 = vadd.f32 0.5, %v881_v28  ;;  %1069 = vmatpush.msrb.mxu0 %v1014_v29  ;;  %1089 = vmatpush.msrb.mxu1 %v1015_v44  ;;  %v1017_v28 = vld [vmem:[#allocation4 + $0xf8] sm:$0xff] }
 0x447   :  { %1109 = vmatpush.msrb.mxu2 %v1016_v56 }
 0x448   :  { %v856_v0 = vpop.f32.mrf.mxu2  ;;  %v869_v52 = vpop.f32.mrf.mxu3  ;;  %v885_v16 = vmul.f32 %v882_v31, %v791_v25  ;;  %v1049_v25 = vld [vmem:[#allocation4 + $0x1f8] sm:$0xff] }
 0x449   :  { %v1875_v53 = vpop.eup %1874  ;;  %1121 = vmatpush.msrb.mxu3 %v1049_v25  ;;  %v2556_v31 = vpop.permute.xlu2 %899  ;;  %v1011_v0 = vld [vmem:[#allocation4 + $0xc8] sm:$0xff]  ;;  %v1012_v52 = vld [vmem:[#allocation4 + $0xd0] sm:$0xff] }
 0x44a   :  { %v886_v27 = vmul.f32 %v1875_v53, %v880_v45  ;;  %v1877_v17 = vpop.eup %1876  ;;  %v1010_v45 = vld [vmem:[#allocation4 + $0xc0] sm:$0xff]  ;;  %v2558_v53 = vpop.permute.xlu1 %891  ;;  %1090 = vmatpush.msrb.mxu1 %v1011_v0  ;;  %1110 = vmatpush.msrb.mxu2 %v1012_v52  ;;  %v1004_v25 = vld [vmem:[#allocation4 + $0x90] sm:$0xff]  ;;  %v904_v61 = vmul.f32 %v2556_v31, %v2201_v3 }
 0x44b   :  { %v883_v58 = vmul.f32 0.5, %v1877_v17  ;;  %1122 = vmatpush.msrb.mxu3 %v1045_v14  ;;  %1070 = vmatpush.msrb.mxu0 %v1010_v45  ;;  %v1007_v17 = vld [vmem:[#allocation4 + $0xa8] sm:$0xff]  ;;  %v895_v63 = vmul.f32 %v2558_v53, %v2887_v60  ;;  %v994_v60 = vld [vmem:[#allocation4 + $0x40] sm:$0xff]  ;;  %v896_v62 = vmul.f32 %v2558_v53, %v2160_v4 }
 0x44c   :  { %v2553_v36 = vadd.f32 %v886_v27, %v885_v16  ;;  %v1013_v16 = vld [vmem:[#allocation4 + $0xd8] sm:$0xff]  ;;  %v1006_v27 = vld [vmem:[#allocation4 + $0xa0] sm:$0xff]  ;;  %1091 = vmatpush.msrb.mxu1 %v1007_v17 }
 0x44d   :  { %v884_v37 = vadd.f32 0.5, %v883_v58  ;;  %1123 = vmatpush.msrb.mxu3 %v1041_v26  ;;  %v1008_v58 = vld [vmem:[#allocation4 + $0xb0] sm:$0xff]  ;;  %1071 = vmatpush.msrb.mxu0 %v1006_v27  ;;  %v990_v26 = vld [vmem:[#allocation4 + $0x20] sm:$0xff] }
 0x44e   :  { %1878 = vtanh.f32 %v2553_v36  ;;  %1111 = vmatpush.msrb.mxu2 %v1008_v58  ;;  %1092 = vmatpush.msrb.mxu1 %v1003_v6 }
 0x44f   :  { %1124 = vmatpush.msrb.mxu3 %v1037_v38  ;;  %1072 = vmatpush.msrb.mxu0 %v1002_v39  ;;  %v986_v38 = vld [vmem:[#allocation4] sm:$0xff] }
 0x450   :  { %1112 = vmatpush.msrb.mxu2 %v1004_v25  ;;  %1093 = vmatpush.msrb.mxu1 %v999_v11 }
 0x451   :  { %1125 = vmatpush.msrb.mxu3 %v1033_v51  ;;  %1073 = vmatpush.msrb.mxu0 %v998_v10  ;;  %v988_v51 = vld [vmem:[#allocation4 + $0x10] sm:$0xff] }
 0x452   :  { %1113 = vmatpush.msrb.mxu2 %v1000_v54  ;;  %1094 = vmatpush.msrb.mxu1 %v995_v18 }
 0x453   :  { %1126 = vmatpush.msrb.mxu3 %v1029_v5  ;;  %1074 = vmatpush.msrb.mxu0 %v994_v60  ;;  %v905_v5 = vmul.f32 %v2556_v31, %v2212_v19 }
 0x454   :  { %v1879_v12 = vpop.eup %1878  ;;  %1114 = vmatpush.msrb.mxu2 %v996_v22  ;;  %1095 = vmatpush.msrb.mxu1 %v991_v30 }
 0x455   :  { %v889_v40 = vmul.f32 %v1879_v12, %v884_v37  ;;  %1127 = vmatpush.msrb.mxu3 %v1025_v41  ;;  %v902_v37 = vmul.f32 %v2556_v31, %v2881_v8  ;;  %v1009_v12 = vld [vmem:[#allocation4 + $0xb8] sm:$0xff]  ;;  %1075 = vmatpush.msrb.mxu0 %v990_v26  ;;  %v908_v41 = vadd.f32 %v904_v61, %v896_v62 }
 0x456   :  { %v1005_v8 = vld [vmem:[#allocation4 + $0x98] sm:$0xff]  ;;  %1115 = vmatpush.msrb.mxu2 %v992_v34  ;;  %1096 = vmatpush.msrb.mxu1 %v987_v42 }
 0x457   :  { %v914_v43 = vpack.c.bf16 %v889_v40, %v889_v40  ;;  %1128 = vmatpush.msrb.mxu3 %v1021_v24  ;;  %v903_v40 = vmul.f32 %v2556_v31, %v2882_v57  ;;  %v1001_v57 = vld [vmem:[#allocation4 + $0x78] sm:$0xff]  ;;  %1076 = vmatpush.msrb.mxu0 %v986_v38  ;;  %v912_v4 = vadd.f32 %v908_v41, %v2891_v32 }
 0x458   :  { %1116 = vmatpush.msrb.mxu2 %v988_v51  ;;  %v1717_v62 = vld [vmem:[%s2852_s3 + $0x2] ss:$8 sm:$0xf] }
 0x459   :  { %923 = vmatmul.bf16.vlgmr.msra.gmra.mxu0 %v914_v43  ;;  %936 = vmatmul.bf16.vlgmr.msra.gmra.mxu1 %v914_v43  ;;  %v907_v14 = vadd.f32 %v903_v40, %v895_v63 }
 0x45a   :  { %949 = vmatmul.bf16.vlgmr.msra.gmra.mxu2 %v914_v43  ;;  %962 = vmatmul.bf16.vlgmr.msra.gmra.mxu3 %v914_v43  ;;  %v894_v43 = vmul.f32 %v2558_v53, %v2884_v59 }
 0x45b   :  { %1129 = vmatpush.msrb.mxu3 %v1017_v28  ;;  %v911_v47 = vadd.f32 %v907_v14, %v2883_v50 }
 0x45c   :  { %v906_v59 = vadd.f32 %v902_v37, %v894_v43  ;;  %v1716_v43 = vld [vmem:[%s2852_s3 + $0x1] ss:$8 sm:$0xf] }
 0x45d   :  { %1130 = vmatpush.msrb.mxu3 %v1013_v16  ;;  %v1053_v63 = vperm.slane %v1716_v43, 0  ;;  %v1054_v39 = vperm.slane %v1716_v43, 1  ;;  %v1055_v10 = vperm.slane %v1716_v43, 2  ;;  %v1056_v11 = vperm.slane %v1716_v43, 3 }
 0x45e   :  { %v910_v46 = vadd.f32 %v906_v59, %v2214_v21  ;;  %v897_v21 = vmul.f32 %v2558_v53, %v2210_v15 }
 0x45f   :  { %1131 = vmatpush.msrb.mxu3 %v1009_v12 }
 0x460   :  { %v909_v3 = vadd.f32 %v905_v5, %v897_v21  ;;  %v1718_v5 = vld [vmem:[%s2852_s3 + $0x3] ss:$8 sm:$0xf]  ;;  %v2604_v21 = vperm.slane %v1717_v62, 0 }
 0x461   :  { %1132 = vmatpush.msrb.mxu3 %v1005_v8 }
 0x462   :  { %v913_v7 = vadd.f32 %v909_v3, %v2892_v48  ;;  %v2616_v3 = vperm.slane %v1717_v62, 3 }
 0x463   :  { %1133 = vmatpush.msrb.mxu3 %v1001_v57 }
 0x465   :  { %1134 = vmatpush.msrb.mxu3 %v997_v23 }
 0x467   :  { %1135 = vmatpush.msrb.mxu3 %v993_v35 }
 0x469   :  { %1136 = vmatpush.msrb.mxu3 %v989_v55 }
 0x4d6   :  { %v924_v50 = vpop.f32.mrf.mxu0  ;;  %v937_v9 = vpop.f32.mrf.mxu1 }
 0x4d7   :  { %v967_v20 = vadd.f32 %v924_v50, %v910_v46  ;;  %v968_v33 = vadd.f32 %v937_v9, %v911_v47  ;;  %v2606_v50 = vperm.slane %v1717_v62, 1  ;;  %v2608_v9 = vperm.slane %v1717_v62, 2 }
 0x4d9   :  { %1880 = vtanh.f32 %v967_v20  ;;  %v2610_v20 = vperm.slane %v1718_v5, 0 }
 0x4da   :  { %1882 = vtanh.f32 %v968_v33  ;;  %v2612_v33 = vperm.slane %v1718_v5, 1 }
 0x4dd   :  { %v950_v49 = vpop.f32.mrf.mxu2  ;;  %v963_v13 = vpop.f32.mrf.mxu3 }
 0x4de   :  { %v969_v19 = vadd.f32 %v950_v49, %v912_v4  ;;  %v926_v24 = vpop.f32.mrf.mxu0  ;;  %v939_v29 = vpop.f32.mrf.mxu1  ;;  %v970_v44 = vadd.f32 %v963_v13, %v913_v7  ;;  %v2620_v49 = vperm.slane %v1718_v5, 2 }
 0x4df   :  { %v1881_v15 = vpop.eup %1880 }
 0x4e0   :  { %v1883_v56 = vpop.eup %1882  ;;  %1884 = vtanh.f32 %v969_v19  ;;  %v975_v28 = vmul.f32 0.5, %v1881_v15 }
 0x4e1   :  { %v977_v31 = vmul.f32 0.5, %v1883_v56  ;;  %1886 = vtanh.f32 %v970_v44 }
 0x4e2   :  { %v976_v0 = vadd.f32 0.5, %v975_v28 }
 0x4e3   :  { %v978_v45 = vadd.f32 0.5, %v977_v31  ;;  %v2637_v31 = vperm.slane %v1718_v5, 3 }
 0x4e5   :  { %v952_v52 = vpop.f32.mrf.mxu2  ;;  %v965_v53 = vpop.f32.mrf.mxu3  ;;  %v981_v32 = vmul.f32 %v978_v45, %v2553_v36 }
 0x4e6   :  { %v1885_v16 = vpop.eup %1884 }
 0x4e7   :  { %v982_v27 = vmul.f32 %v1885_v16, %v976_v0  ;;  %v1887_v48 = vpop.eup %1886 }
 0x4e8   :  { %v979_v58 = vmul.f32 0.5, %v1887_v48 }
 0x4e9   :  { %v983_v17 = vadd.f32 %v982_v27, %v981_v32 }
 0x4ea   :  { %v980_v37 = vadd.f32 0.5, %v979_v58 }
 0x4eb   :  { %1888 = vtanh.f32 %v983_v17 }
 0x4f1   :  { %v1889_v12 = vpop.eup %1888 }
 0x4f2   :  { %v985_v40 = vmul.f32 %v1889_v12, %v980_v37 }
 0x4f4   :  { %1077 = vmatmul.f32.vlgmr.msrb.gmra.mxu0 %v985_v40  ;;  %1097 = vmatmul.f32.vlgmr.msrb.gmra.mxu1 %v985_v40 }
 0x4f5   :  { %1117 = vmatmul.f32.vlgmr.msrb.gmra.mxu2 %v985_v40  ;;  %1137 = vmatmul.f32.vlgmr.msrb.gmra.mxu3 %v985_v40 }
 0x571   :  { %v1078_v6 = vpop.f32.mrf.mxu0  ;;  %v1098_v36 = vpop.f32.mrf.mxu1 }
 0x572   :  { %v2584_v25 = vadd.f32 %v1078_v6, %v1053_v63  ;;  %v2586_v8 = vadd.f32 %v1098_v36, %v1054_v39 }
 0x574   :  { %1890 = vtanh.f32 %v2584_v25 }
 0x575   :  { %1892 = vtanh.f32 %v2586_v8 }
 0x578   :  { %v1118_v54 = vpop.f32.mrf.mxu2  ;;  %v1138_v57 = vpop.f32.mrf.mxu3 }
 0x579   :  { %v2590_v59 = vadd.f32 %v1118_v54, %v1055_v10  ;;  %v2592_v60 = vadd.f32 %v1138_v57, %v1056_v11 }
 0x57a   :  { %v1891_v14 = vpop.eup %1890 }
 0x57b   :  { %v1893_v18 = vpop.eup %1892  ;;  %1894 = vtanh.f32 %v2590_v59  ;;  %v1150_v22 = vmul.f32 0.5, %v1891_v14 }
 0x57c   :  { %v1152_v23 = vmul.f32 0.5, %v1893_v18  ;;  %1896 = vtanh.f32 %v2592_v60 }
 0x57d   :  { %v1151_v30 = vadd.f32 0.5, %v1150_v22 }
 0x57e   :  { %v1153_v26 = vadd.f32 0.5, %v1152_v23 }
 0x580   :  { %v1156_v35 = vmul.f32 0.0, %v1153_v26 }
 0x581   :  { %v1895_v34 = vpop.eup %1894 }
 0x582   :  { %v1157_v38 = vmul.f32 %v1895_v34, %v1151_v30  ;;  %v1897_v42 = vpop.eup %1896 }
 0x583   :  { %v1154_v47 = vmul.f32 0.5, %v1897_v42 }
 0x584   :  { %v1158_v46 = vadd.f32 %v1157_v38, %v1156_v35 }
 0x585   :  { %v1155_v51 = vadd.f32 0.5, %v1154_v47 }
 0x586   :  { %1898 = vtanh.f32 %v1158_v46 }
 0x58c   :  { %v1899_v55 = vpop.eup %1898 }
 0x58d   :  { %v1160_v61 = vmul.f32 %v1899_v55, %v1155_v51 }
 0x58f   :  { %1168 = vperm.xlu2 %1799, %v1160_v61   ;;  %1163 = vperm.xlu1 %1798, %v1160_v61  }
 0x597   :  { %1801 = vset.pattern.permute.xlu1 %v2894_v1  ;;  %1802 = vset.pattern.permute.xlu2 %v2893_v2 }
 0x5e9   :  { %v2614_v41 = vpop.permute.xlu2 %1168 }
 0x5ea   :  { %v1210_v24 = vmul.f32 %v2610_v20, %v2614_v41  ;;  %v1211_v29 = vmul.f32 %v2612_v33, %v2614_v41  ;;  %v1212_v45 = vmul.f32 %v2620_v49, %v2614_v41  ;;  %v1213_v32 = vmul.f32 %v2637_v31, %v2614_v41 }
 0x601   :  { %v2618_v4 = vpop.permute.xlu1 %1163 }
 0x602   :  { %v1193_v7 = vmul.f32 %v2604_v21, %v2618_v4  ;;  %v1194_v13 = vmul.f32 %v2606_v50, %v2618_v4  ;;  %v1195_v19 = vmul.f32 %v2608_v9, %v2618_v4  ;;  %v1196_v15 = vmul.f32 %v2616_v3, %v2618_v4 }
 0x604   :  { %v1197_v44 = vadd.f32 %v1193_v7, %v2584_v25  ;;  %v1198_v56 = vadd.f32 %v1194_v13, %v2586_v8  ;;  %v1199_v28 = vadd.f32 %v1195_v19, %v2590_v59  ;;  %v1200_v53 = vadd.f32 %v1196_v15, %v2592_v60 }
 0x606   :  { %v1214_v0 = vadd.f32 %v1210_v24, %v1197_v44  ;;  %v1215_v52 = vadd.f32 %v1211_v29, %v1198_v56  ;;  %v1216_v16 = vadd.f32 %v1212_v45, %v1199_v28  ;;  %v1217_v27 = vadd.f32 %v1213_v32, %v1200_v53 }
 0x608   :  { %1900 = vtanh.f32 %v1214_v0 }
 0x609   :  { %1902 = vtanh.f32 %v1215_v52 }
 0x60a   :  { %1904 = vtanh.f32 %v1216_v16 }
 0x60b   :  { %1906 = vtanh.f32 %v1217_v27 }
 0x60e   :  { %v1901_v48 = vpop.eup %1900 }
 0x60f   :  { %v1903_v17 = vpop.eup %1902  ;;  %v1222_v58 = vmul.f32 0.5, %v1901_v48 }
 0x610   :  { %v1224_v37 = vmul.f32 0.5, %v1903_v17  ;;  %v1905_v40 = vpop.eup %1904 }
 0x611   :  { %v1223_v12 = vadd.f32 0.5, %v1222_v58  ;;  %v1907_v6 = vpop.eup %1906 }
 0x612   :  { %v1225_v43 = vadd.f32 0.5, %v1224_v37  ;;  %v1226_v10 = vmul.f32 0.5, %v1907_v6 }
 0x613   :  { %v1229_v63 = vmul.f32 %v1905_v40, %v1223_v12 }
 0x614   :  { %v1228_v39 = vmul.f32 %v1225_v43, %v1158_v46  ;;  %v1227_v11 = vadd.f32 0.5, %v1226_v10 }
 0x616   :  { %v1230_v36 = vadd.f32 %v1229_v63, %v1228_v39 }
 0x618   :  { %1908 = vtanh.f32 %v1230_v36 }
 0x61e   :  { %v1909_v54 = vpop.eup %1908 }
 0x61f   :  { %v1232_v57 = vmul.f32 %v1909_v54, %v1227_v11 }
 0x621   :  { %1240 = vperm.xlu1 %1801, %v1232_v57   ;;  %1235 = vperm.xlu0 %1800, %v1232_v57  }
 0x629   :  { %1803 = vset.pattern.permute.xlu0 %v2894_v1 }
 0x693   :  { %v2645_v14 = vpop.permute.xlu1 %1240  ;;  %v2647_v18 = vpop.permute.xlu0 %1235 }
 0x694   :  { %v1256_v22 = vmul.f32 %v2647_v18, %v2604_v21  ;;  %v1257_v23 = vmul.f32 %v2647_v18, %v2606_v50  ;;  %v1258_v26 = vmul.f32 %v2647_v18, %v2608_v9  ;;  %v1264_v30 = vmul.f32 %v2645_v14, %v2610_v20 }
 0x695   :  { %v1265_v34 = vmul.f32 %v2645_v14, %v2612_v33  ;;  %v1259_v35 = vmul.f32 %v2647_v18, %v2616_v3  ;;  %v1266_v47 = vmul.f32 %v2645_v14, %v2620_v49  ;;  %v1267_v5 = vmul.f32 %v2645_v14, %v2637_v31 }
 0x696   :  { %v1260_v38 = vadd.f32 %v1256_v22, %v2584_v25  ;;  %v1261_v42 = vadd.f32 %v1257_v23, %v2586_v8  ;;  %v1262_v46 = vadd.f32 %v1258_v26, %v2590_v59 }
 0x697   :  { %v1263_v61 = vadd.f32 %v1259_v35, %v2592_v60 }
 0x698   :  { %v1268_v51 = vadd.f32 %v1264_v30, %v1260_v38  ;;  %v1269_v55 = vadd.f32 %v1265_v34, %v1261_v42  ;;  %v1270_v62 = vadd.f32 %v1266_v47, %v1262_v46 }
 0x699   :  { %v1271_v7 = vadd.f32 %v1267_v5, %v1263_v61 }
 0x69a   :  { %1910 = vtanh.f32 %v1268_v51 }
 0x69b   :  { %1912 = vtanh.f32 %v1269_v55 }
 0x69c   :  { %1914 = vtanh.f32 %v1270_v62 }
 0x69d   :  { %1916 = vtanh.f32 %v1271_v7 }
 0x6a0   :  { %v1911_v13 = vpop.eup %1910 }
 0x6a1   :  { %v1913_v19 = vpop.eup %1912  ;;  %v1276_v24 = vmul.f32 0.5, %v1911_v13 }
 0x6a2   :  { %v1278_v29 = vmul.f32 0.5, %v1913_v19  ;;  %v1915_v44 = vpop.eup %1914 }
 0x6a3   :  { %v1277_v15 = vadd.f32 0.5, %v1276_v24  ;;  %v1917_v0 = vpop.eup %1916 }
 0x6a4   :  { %v1279_v56 = vadd.f32 0.5, %v1278_v29  ;;  %v1280_v53 = vmul.f32 0.5, %v1917_v0 }
 0x6a5   :  { %v1283_v28 = vmul.f32 %v1915_v44, %v1277_v15 }
 0x6a6   :  { %v1282_v45 = vmul.f32 %v1279_v56, %v1230_v36  ;;  %v1281_v16 = vadd.f32 0.5, %v1280_v53 }
 0x6a8   :  { %v1284_v52 = vadd.f32 %v1283_v28, %v1282_v45 }
 0x6aa   :  { %1918 = vtanh.f32 %v1284_v52 }
 0x6b0   :  { %v1919_v32 = vpop.eup %1918 }
 0x6b1   :  { %v1286_v27 = vmul.f32 %v1919_v32, %v1281_v16 }
 0x6b3   :  { %1294 = vperm.xlu1 %1801, %v1286_v27   ;;  %1289 = vperm.xlu2 %1802, %v1286_v27  }
 0x6bb   :  { %1804 = vset.pattern.permute.xlu1 %v2893_v2 }
 0x70d   :  { %v2670_v48 = vpop.permute.xlu2 %1289 }
 0x70e   :  { %v1310_v17 = vmul.f32 %v2670_v48, %v2604_v21  ;;  %v1311_v58 = vmul.f32 %v2670_v48, %v2606_v50  ;;  %v1312_v37 = vmul.f32 %v2670_v48, %v2608_v9  ;;  %v1313_v36 = vmul.f32 %v2670_v48, %v2616_v3 }
 0x710   :  { %v1314_v12 = vadd.f32 %v1310_v17, %v2584_v25  ;;  %v1315_v43 = vadd.f32 %v1311_v58, %v2586_v8  ;;  %v1316_v10 = vadd.f32 %v1312_v37, %v2590_v59  ;;  %v1317_v23 = vadd.f32 %v1313_v36, %v2592_v60 }
 0x725   :  { %v2679_v40 = vpop.permute.xlu1 %1294 }
 0x726   :  { %v1318_v63 = vmul.f32 %v2679_v40, %v2610_v20  ;;  %v1319_v39 = vmul.f32 %v2679_v40, %v2612_v33  ;;  %v1320_v6 = vmul.f32 %v2679_v40, %v2620_v49  ;;  %v1321_v57 = vmul.f32 %v2679_v40, %v2637_v31 }
 0x728   :  { %v1322_v11 = vadd.f32 %v1318_v63, %v1314_v12  ;;  %v1323_v54 = vadd.f32 %v1319_v39, %v1315_v43  ;;  %v1324_v22 = vadd.f32 %v1320_v6, %v1316_v10  ;;  %v1325_v26 = vadd.f32 %v1321_v57, %v1317_v23 }
 0x72a   :  { %1920 = vtanh.f32 %v1322_v11 }
 0x72b   :  { %1922 = vtanh.f32 %v1323_v54 }
 0x72c   :  { %1924 = vtanh.f32 %v1324_v22 }
 0x72d   :  { %1926 = vtanh.f32 %v1325_v26 }
 0x730   :  { %v1921_v30 = vpop.eup %1920 }
 0x731   :  { %v1923_v34 = vpop.eup %1922  ;;  %v1330_v35 = vmul.f32 0.5, %v1921_v30 }
 0x732   :  { %v1332_v38 = vmul.f32 0.5, %v1923_v34  ;;  %v1925_v46 = vpop.eup %1924 }
 0x733   :  { %v1331_v42 = vadd.f32 0.5, %v1330_v35  ;;  %v1927_v61 = vpop.eup %1926 }
 0x734   :  { %v1333_v47 = vadd.f32 0.5, %v1332_v38  ;;  %v1334_v5 = vmul.f32 0.5, %v1927_v61 }
 0x735   :  { %v1337_v51 = vmul.f32 %v1925_v46, %v1331_v42 }
 0x736   :  { %v1336_v55 = vmul.f32 %v1333_v47, %v1284_v52  ;;  %v1335_v7 = vadd.f32 0.5, %v1334_v5 }
 0x738   :  { %v1338_v62 = vadd.f32 %v1337_v51, %v1336_v55 }
 0x73a   :  { %1928 = vtanh.f32 %v1338_v62 }
 0x740   :  { %v1929_v13 = vpop.eup %1928 }
 0x741   :  { %v1340_v19 = vmul.f32 %v1929_v13, %v1335_v7 }
 0x743   :  { %1348 = vperm.xlu0 %1803, %v1340_v19   ;;  %1343 = vperm.xlu2 %1802, %v1340_v19  }
 0x74b   :  { %1805 = vset.pattern.permute.xlu2 %v2894_v1  ;;  %1806 = vset.pattern.permute.xlu0 %v2893_v2 }
 0x79d   :  { %v2696_v24 = vpop.permute.xlu2 %1343 }
 0x79e   :  { %v1364_v29 = vmul.f32 %v2696_v24, %v2604_v21  ;;  %v1365_v15 = vmul.f32 %v2696_v24, %v2606_v50  ;;  %v1366_v44 = vmul.f32 %v2696_v24, %v2608_v9  ;;  %v1367_v16 = vmul.f32 %v2696_v24, %v2616_v3 }
 0x7a0   :  { %v1368_v56 = vadd.f32 %v1364_v29, %v2584_v25  ;;  %v1369_v45 = vadd.f32 %v1365_v15, %v2586_v8  ;;  %v1370_v32 = vadd.f32 %v1366_v44, %v2590_v59  ;;  %v1371_v12 = vadd.f32 %v1367_v16, %v2592_v60 }
 0x7b5   :  { %v2705_v28 = vpop.permute.xlu0 %1348 }
 0x7b6   :  { %v1372_v0 = vmul.f32 %v2705_v28, %v2610_v20  ;;  %v1373_v52 = vmul.f32 %v2705_v28, %v2612_v33  ;;  %v1374_v53 = vmul.f32 %v2705_v28, %v2620_v49  ;;  %v1375_v58 = vmul.f32 %v2705_v28, %v2637_v31 }
 0x7b8   :  { %v1376_v27 = vadd.f32 %v1372_v0, %v1368_v56  ;;  %v1377_v17 = vadd.f32 %v1373_v52, %v1369_v45  ;;  %v1378_v37 = vadd.f32 %v1374_v53, %v1370_v32  ;;  %v1379_v43 = vadd.f32 %v1375_v58, %v1371_v12 }
 0x7ba   :  { %1930 = vtanh.f32 %v1376_v27 }
 0x7bb   :  { %1932 = vtanh.f32 %v1377_v17 }
 0x7bc   :  { %1934 = vtanh.f32 %v1378_v37 }
 0x7bd   :  { %1936 = vtanh.f32 %v1379_v43 }
 0x7c0   :  { %v1931_v63 = vpop.eup %1930 }
 0x7c1   :  { %v1933_v39 = vpop.eup %1932  ;;  %v1384_v6 = vmul.f32 0.5, %v1931_v63 }
 0x7c2   :  { %v1386_v36 = vmul.f32 0.5, %v1933_v39  ;;  %v1935_v11 = vpop.eup %1934 }
 0x7c3   :  { %v1385_v10 = vadd.f32 0.5, %v1384_v6  ;;  %v1937_v23 = vpop.eup %1936 }
 0x7c4   :  { %v1387_v54 = vadd.f32 0.5, %v1386_v36  ;;  %v1388_v30 = vmul.f32 0.5, %v1937_v23 }
 0x7c5   :  { %v1391_v57 = vmul.f32 %v1935_v11, %v1385_v10 }
 0x7c6   :  { %v1390_v22 = vmul.f32 %v1387_v54, %v1338_v62  ;;  %v1389_v34 = vadd.f32 0.5, %v1388_v30 }
 0x7c8   :  { %v1392_v26 = vadd.f32 %v1391_v57, %v1390_v22 }
 0x7ca   :  { %1938 = vtanh.f32 %v1392_v26 }
 0x7d0   :  { %v1939_v35 = vpop.eup %1938 }
 0x7d1   :  { %v1394_v38 = vmul.f32 %v1939_v35, %v1389_v34 }
 0x7d3   :  { %1402 = vperm.xlu2 %1805, %v1394_v38   ;;  %1397 = vperm.xlu1 %1804, %v1394_v38  }
 0x82d   :  { %v2720_v42 = vpop.permute.xlu2 %1402 }
 0x82e   :  { %v1426_v61 = vmul.f32 %v2720_v42, %v2610_v20  ;;  %v1427_v62 = vmul.f32 %v2720_v42, %v2612_v33  ;;  %v1428_v29 = vmul.f32 %v2720_v42, %v2620_v49  ;;  %v1429_v0 = vmul.f32 %v2720_v42, %v2637_v31 }
 0x845   :  { %v2722_v46 = vpop.permute.xlu1 %1397 }
 0x846   :  { %v1418_v47 = vmul.f32 %v2722_v46, %v2604_v21  ;;  %v1419_v51 = vmul.f32 %v2722_v46, %v2606_v50  ;;  %v1420_v55 = vmul.f32 %v2722_v46, %v2608_v9  ;;  %v1421_v5 = vmul.f32 %v2722_v46, %v2616_v3 }
 0x848   :  { %v1422_v7 = vadd.f32 %v1418_v47, %v2584_v25  ;;  %v1423_v13 = vadd.f32 %v1419_v51, %v2586_v8  ;;  %v1424_v19 = vadd.f32 %v1420_v55, %v2590_v59  ;;  %v1425_v56 = vadd.f32 %v1421_v5, %v2592_v60 }
 0x84a   :  { %v1430_v15 = vadd.f32 %v1426_v61, %v1422_v7  ;;  %v1431_v44 = vadd.f32 %v1427_v62, %v1423_v13  ;;  %v1432_v45 = vadd.f32 %v1428_v29, %v1424_v19  ;;  %v1433_v52 = vadd.f32 %v1429_v0, %v1425_v56 }
 0x84c   :  { %1940 = vtanh.f32 %v1430_v15 }
 0x84d   :  { %1942 = vtanh.f32 %v1431_v44 }
 0x84e   :  { %1944 = vtanh.f32 %v1432_v45 }
 0x84f   :  { %1946 = vtanh.f32 %v1433_v52 }
 0x852   :  { %v1941_v53 = vpop.eup %1940 }
 0x853   :  { %v1943_v16 = vpop.eup %1942  ;;  %v1438_v32 = vmul.f32 0.5, %v1941_v53 }
 0x854   :  { %v1440_v27 = vmul.f32 0.5, %v1943_v16  ;;  %v1945_v58 = vpop.eup %1944 }
 0x855   :  { %v1439_v17 = vadd.f32 0.5, %v1438_v32  ;;  %v1947_v63 = vpop.eup %1946 }
 0x856   :  { %v1441_v37 = vadd.f32 0.5, %v1440_v27  ;;  %v1442_v6 = vmul.f32 0.5, %v1947_v63 }
 0x857   :  { %v1445_v12 = vmul.f32 %v1945_v58, %v1439_v17 }
 0x858   :  { %v1444_v43 = vmul.f32 %v1441_v37, %v1392_v26  ;;  %v1443_v36 = vadd.f32 0.5, %v1442_v6 }
 0x85a   :  { %v1446_v39 = vadd.f32 %v1445_v12, %v1444_v43  ;;  %v2766_v43 = vld [vmem:[%s2852_s3 + $0x6] ss:$0 sm:$0xff]  ;;  %s2047_s3 = smov 6  }
 0x85b   :  { %v1243_v63 = vmul.f32 %v2645_v14, %v2766_v43 }
 0x85c   :  { %1948 = vtanh.f32 %v1446_v39 }
 0x862   :  { %v1949_v10 = vpop.eup %1948 }
 0x863   :  { %v1448_v11 = vmul.f32 %v1949_v10, %v1443_v36 }
 0x865   :  { %1456 = vperm.xlu2 %1805, %v1448_v11   ;;  %1451 = vperm.xlu1 %1804, %v1448_v11  }
 0x86d   :  { %1807 = vset.pattern.permute.xlu1 %v2894_v1 }
 0x8bf   :  { %v1457_v54 = vpop.permute.xlu2 %1456 }
 0x8c0   :  { %v1480_v30 = vmul.f32 %v1457_v54, %v2610_v20  ;;  %v1481_v34 = vmul.f32 %v1457_v54, %v2612_v33  ;;  %v1482_v55 = vmul.f32 %v1457_v54, %v2620_v49  ;;  %v1483_v13 = vmul.f32 %v1457_v54, %v2637_v31 }
 0x8c1   :  { %v1459_v6 = vmul.f32 %v1457_v54, %v2766_v43 }
 0x8d7   :  { %v2745_v57 = vpop.permute.xlu1 %1451 }
 0x8d8   :  { %v1472_v22 = vmul.f32 %v2745_v57, %v2604_v21  ;;  %v1473_v23 = vmul.f32 %v2745_v57, %v2606_v50  ;;  %v1474_v26 = vmul.f32 %v2745_v57, %v2608_v9  ;;  %v1475_v35 = vmul.f32 %v2745_v57, %v2616_v3 }
 0x8da   :  { %v1476_v38 = vadd.f32 %v1472_v22, %v2584_v25  ;;  %v1477_v47 = vadd.f32 %v1473_v23, %v2586_v8  ;;  %v1478_v51 = vadd.f32 %v1474_v26, %v2590_v59  ;;  %v1479_v5 = vadd.f32 %v1475_v35, %v2592_v60 }
 0x8dc   :  { %v1484_v61 = vadd.f32 %v1480_v30, %v1476_v38  ;;  %v1485_v62 = vadd.f32 %v1481_v34, %v1477_v47  ;;  %v1486_v7 = vadd.f32 %v1482_v55, %v1478_v51  ;;  %v1487_v19 = vadd.f32 %v1483_v13, %v1479_v5 }
 0x8dd   :  { %v1171_v13 = vmul.f32 %v2614_v41, %v2766_v43 }
 0x8de   :  { %1950 = vtanh.f32 %v1484_v61 }
 0x8df   :  { %1952 = vtanh.f32 %v1485_v62 }
 0x8e0   :  { %1954 = vtanh.f32 %v1486_v7 }
 0x8e1   :  { %1956 = vtanh.f32 %v1487_v19  ;;  %v1297_v19 = vmul.f32 %v2679_v40, %v2766_v43  ;;  %v1238_v40 = vmul.f32 %v2647_v18, %v2766_v43  ;;  %v1454_v18 = vmul.f32 %v2745_v57, %v2766_v43 }
 0x8e4   :  { %v1951_v29 = vpop.eup %1950 }
 0x8e5   :  { %v1953_v15 = vpop.eup %1952  ;;  %v1492_v44 = vmul.f32 0.5, %v1951_v29 }
 0x8e6   :  { %v1494_v56 = vmul.f32 0.5, %v1953_v15  ;;  %v1955_v0 = vpop.eup %1954  ;;  %v1346_v15 = vmul.f32 %v2696_v24, %v2766_v43 }
 0x8e7   :  { %v1493_v45 = vadd.f32 0.5, %v1492_v44  ;;  %v1957_v32 = vpop.eup %1956 }
 0x8e8   :  { %v1495_v52 = vadd.f32 0.5, %v1494_v56  ;;  %v1496_v17 = vmul.f32 0.5, %v1957_v32 }
 0x8e9   :  { %v1499_v53 = vmul.f32 %v1955_v0, %v1493_v45  ;;  %v1405_v0 = vmul.f32 %v2720_v42, %v2766_v43  ;;  %v1292_v42 = vmul.f32 %v2670_v48, %v2766_v43 }
 0x8ea   :  { %v1498_v16 = vmul.f32 %v1495_v52, %v1446_v39  ;;  %v1497_v58 = vadd.f32 0.5, %v1496_v17  ;;  %v1351_v39 = vmul.f32 %v2705_v28, %v2766_v43 }
 0x8ec   :  { %v1500_v27 = vadd.f32 %v1499_v53, %v1498_v16 }
 0x8ee   :  { %1958 = vtanh.f32 %v1500_v27 }
 0x8f4   :  { %v1959_v37 = vpop.eup %1958 }
 0x8f5   :  { %v1502_v12 = vmul.f32 %v1959_v37, %v1497_v58 }
 0x8f7   :  { %1510 = vperm.xlu1 %1807, %v1502_v12   ;;  %1505 = vperm.xlu0 %1806, %v1502_v12   ;;  %v1400_v12 = vmul.f32 %v2722_v46, %v2766_v43  ;;  %v1166_v46 = vmul.f32 %v2618_v4, %v2766_v43 }
 0x8ff   :  { %1245 = vrot.lane.b32.xlu1 %v1243_v63, %s2045_s18  ;;  %1178 = vrot.lane.b32.xlu0 %v2766_v43, %s2046_s19 }
 0x900   :  { %1808 = vset.pattern.permute.xlu1 %v2893_v2  ;;  %1809 = vset.pattern.permute.xlu0 %v2894_v1 }
 0x907   :  { %1353 = vrot.lane.b32.xlu1 %v1351_v39, %s2045_s18  ;;  %1461 = vrot.lane.b32.xlu0 %v1459_v6, %s2045_s18 }
 0x969   :  { %v1511_v14 = vpop.permute.xlu1 %1510  ;;  %v2779_v36 = vpop.permute.xlu0 %1505 }
 0x96a   :  { %v1526_v10 = vmul.f32 %v2779_v36, %v2604_v21  ;;  %v1527_v2 = vmul.f32 %v2779_v36, %v2606_v50  ;;  %v1528_v1 = vmul.f32 %v2779_v36, %v2608_v9  ;;  %v1534_v28 = vmul.f32 %v1511_v14, %v2610_v20 }
 0x96b   :  { %v1535_v11 = vmul.f32 %v1511_v14, %v2612_v33  ;;  %v1529_v54 = vmul.f32 %v2779_v36, %v2616_v3  ;;  %v1536_v21 = vmul.f32 %v1511_v14, %v2620_v49  ;;  %v1537_v20 = vmul.f32 %v1511_v14, %v2637_v31 }
 0x96c   :  { %v1530_v22 = vadd.f32 %v1526_v10, %v2584_v25  ;;  %v1531_v23 = vadd.f32 %v1527_v2, %v2586_v8  ;;  %v1532_v26 = vadd.f32 %v1528_v1, %v2590_v59  ;;  %v1513_v41 = vmul.f32 %v1511_v14, %v2766_v43 }
 0x96d   :  { %v1533_v34 = vadd.f32 %v1529_v54, %v2592_v60  ;;  %v1508_v48 = vmul.f32 %v2779_v36, %v2766_v43 }
 0x96e   :  { %v1538_v30 = vadd.f32 %v1534_v28, %v1530_v22  ;;  %v1539_v50 = vadd.f32 %v1535_v11, %v1531_v23  ;;  %v1540_v9 = vadd.f32 %v1536_v21, %v1532_v26 }
 0x96f   :  { %v1541_v33 = vadd.f32 %v1537_v20, %v1533_v34 }
 0x970   :  { %1960 = vtanh.f32 %v1538_v30 }
 0x971   :  { %1962 = vtanh.f32 %v1539_v50  ;;  %v1246_v7 = vpop.permute.xlu1 %1245  ;;  %v1179_v56 = vpop.permute.xlu0 %1178 }
 0x972   :  { %1964 = vtanh.f32 %v1540_v9  ;;  %v1248_v24 = vadd.f32 %v1246_v7, %v1238_v40 }
 0x973   :  { %1966 = vtanh.f32 %v1541_v33 }
 0x974   :  { %v1249_v52 = vadd.f32 %v1248_v24, %v1179_v56 }
 0x976   :  { %v1961_v3 = vpop.eup %1960 }
 0x977   :  { %v1963_v35 = vpop.eup %1962  ;;  %v1546_v25 = vmul.f32 0.5, %v1961_v3 }
 0x978   :  { %v1548_v38 = vmul.f32 0.5, %v1963_v35  ;;  %v1965_v59 = vpop.eup %1964 }
 0x979   :  { %v1547_v8 = vadd.f32 0.5, %v1546_v25  ;;  %v1967_v55 = vpop.eup %1966  ;;  %v1354_v29 = vpop.permute.xlu1 %1353 }
 0x97a   :  { %v1549_v47 = vadd.f32 0.5, %v1548_v38  ;;  %v1550_v60 = vmul.f32 0.5, %v1967_v55  ;;  %v1356_v44 = vadd.f32 %v1354_v29, %v1346_v15  ;;  %v1462_v58 = vpop.permute.xlu0 %1461 }
 0x97b   :  { %v1553_v49 = vmul.f32 %v1965_v59, %v1547_v8  ;;  %v1464_v37 = vadd.f32 %v1462_v58, %v1454_v18 }
 0x97c   :  { %v1552_v51 = vmul.f32 %v1549_v47, %v1500_v27  ;;  %v1551_v62 = vadd.f32 0.5, %v1550_v60  ;;  %v1357_v45 = vadd.f32 %v1356_v44, %v1179_v56 }
 0x97d   :  { %v1465_v6 = vadd.f32 %v1464_v37, %v1179_v56 }
 0x97e   :  { %v1554_v61 = vadd.f32 %v1553_v49, %v1552_v51 }
 0x980   :  { %1968 = vtanh.f32 %v1554_v61 }
 0x986   :  { %v1969_v5 = vpop.eup %1968 }
 0x987   :  { %v1556_v31 = vmul.f32 %v1969_v5, %v1551_v62 }
 0x989   :  { %1559 = vperm.xlu1 %1808, %v1556_v31   ;;  %1564 = vperm.xlu2 %1805, %v1556_v31  }
 0x991   :  { %1173 = vrot.lane.b32.xlu1 %v1171_v13, %s2045_s18  ;;  %1299 = vrot.lane.b32.xlu2 %v1297_v19, %s2045_s18 }
 0x999   :  { %1407 = vrot.lane.b32.xlu2 %v1405_v0, %s2045_s18  ;;  %1359 = vrot.lane.b32.xlu1 %v1357_v45, %s2047_s3 }
 0x9a1   :  { %1515 = vrot.lane.b32.xlu2 %v1513_v41, %s2045_s18 }
 0x9a9   :  { %1251 = vrot.lane.b32.xlu2 %v1249_v52, %s2048_s20 }
 0x9e3   :  { %v1565_v53 = vpop.permute.xlu2 %1564 }
 0x9e4   :  { %v1567_v16 = vmul.f32 %v1565_v53, %v2766_v43 }
 0x9e6   :  { %1569 = vrot.lane.b32.xlu0 %v1567_v16, %s2045_s18 }
 0x9eb   :  { %v1300_v32 = vpop.permute.xlu2 %1299 }
 0x9ec   :  { %v1302_v27 = vadd.f32 %v1300_v32, %v1292_v42 }
 0x9ee   :  { %v1303_v17 = vadd.f32 %v1302_v27, %v1179_v56 }
 0x9f0   :  { %1305 = vrot.lane.b32.xlu0 %v1303_v17, %s2049_s21 }
 0x9f3   :  { %v1408_v63 = vpop.permute.xlu2 %1407 }
 0x9f4   :  { %v1410_v39 = vadd.f32 %v1408_v63, %v1400_v12 }
 0x9f6   :  { %v1411_v14 = vadd.f32 %v1410_v39, %v1179_v56 }
 0x9f8   :  { %1467 = vrot.lane.b32.xlu0 %v1465_v6, %s2050_s22  ;;  %1413 = vrot.lane.b32.xlu2 %v1411_v14, %s2051_s23 }
 0x9fb   :  { %v1560_v10 = vpop.permute.xlu1 %1559  ;;  %v1516_v2 = vpop.permute.xlu2 %1515 }
 0x9fc   :  { %v1518_v57 = vadd.f32 %v1516_v2, %v1508_v48  ;;  %v1562_v36 = vmul.f32 %v1560_v10, %v2766_v43 }
 0x9fe   :  { %v1519_v1 = vadd.f32 %v1518_v57, %v1179_v56 }
 0xa00   :  { %1521 = vrot.lane.b32.xlu1 %v1519_v1, %s2052_s24 }
 0xa03   :  { %v1174_v28 = vpop.permute.xlu1 %1173  ;;  %v1252_v22 = vpop.permute.xlu2 %1251 }
 0xa04   :  { %v1176_v11 = vadd.f32 %v1174_v28, %v1166_v46 }
 0xa06   :  { %v1181_v54 = vadd.f32 %v1179_v56, %v1176_v11 }
 0xa08   :  { %1183 = vst.msk [vmem:[%s2853_s4] sm:$0x3] %vm1182_vm0, %v1181_v54 }
 0xa09   :  { %1255 = vst.msk [vmem:[%s2853_s4] sm:$0x3] %vm1254_vm1, %v1252_v22 }
 0xa0b   :  { %v1360_v30 = vpop.permute.xlu1 %1359 }
 0xa52   :  { %v1414_v50 = vpop.permute.xlu2 %1413 }
 0xa58   :  { %v1570_v23 = vpop.permute.xlu0 %1569 }
 0xa59   :  { %v1572_v26 = vadd.f32 %v1570_v23, %v1562_v36 }
 0xa5b   :  { %v1573_v21 = vadd.f32 %v1572_v26, %v1179_v56 }
 0xa5d   :  { %1575 = vrot.lane.b32.xlu2 %v1573_v21, %s2053_s1 }
 0xa62   :  { %v1306_v4 = vpop.permute.xlu0 %1305 }
 0xa63   :  { %1309 = vst.msk [vmem:[%s2853_s4] sm:$0x3] %vm1308_vm2, %v1306_v4 }
 0xa64   :  { %1363 = vst.msk [vmem:[%s2853_s4] sm:$0x3] %vm1362_vm3, %v1360_v30 }
 0xa65   :  { %1417 = vst.msk [vmem:[%s2853_s4] sm:$0x3] %vm1416_vm4, %v1414_v50 }
 0xa6a   :  { %v1468_v43 = vpop.permute.xlu0 %1467 }
 0xa6b   :  { %1471 = vst.msk [vmem:[%s2853_s4] sm:$0x3] %vm1470_vm5, %v1468_v43 }
 0xa72   :  { %v1522_v34 = vpop.permute.xlu1 %1521 }
 0xa73   :  { %1525 = vst.msk [vmem:[%s2853_s4] sm:$0x3] %vm1524_vm6, %v1522_v34 }
 0xab7   :  { %v1576_v9 = vpop.permute.xlu2 %1575 }
 0xab8   :  { %1579 = vst.msk [vmem:[%s2853_s4] sm:$0x3] %vm1578_vm7, %v1576_v9 }
 0xab9   :  { %1584 = vsyncpa [#allocation3], 1 }
 0xaba   :  { %1585 = vsyncpa [#allocation5], 1 }

</bundles_post_ra>
